<compile_context>
chip_gen: v6e
topology: v6e:2x2x1
jax: 0.10.0
libtpu: 0.0.40
codegen_flags: <defaults>
</compile_context>

<pallas_src>
import functools

import jax
import jax.numpy as jnp
from jax import lax
from jax.experimental import pallas as pl
from jax.experimental.pallas import tpu as pltpu


# ---------------------------------------------------------------------------
# Helpers replicating the PyTorch reference semantics
# ---------------------------------------------------------------------------
def _to3(v):
    if isinstance(v, int):
        return (v, v, v)
    v = tuple(v)
    assert len(v) == 3
    return v


def get_padding_shape(filter_shape, stride):
    """Replica of hp.get_padding_shape (incl. its H/W axis-ordering quirk)."""
    def _pad_top_bottom(filter_dim, stride_val):
        pad_along = max(filter_dim - stride_val, 0)
        pad_top = pad_along // 2
        pad_bottom = pad_along - pad_top
        return pad_top, pad_bottom

    padding_shape = []
    for filter_dim, stride_val in zip(filter_shape, stride):
        pad_top, pad_bottom = _pad_top_bottom(filter_dim, stride_val)
        padding_shape.append(pad_top)
        padding_shape.append(pad_bottom)
    depth_top = padding_shape.pop(0)
    depth_bottom = padding_shape.pop(0)
    padding_shape.append(depth_top)
    padding_shape.append(depth_bottom)
    return tuple(padding_shape)


def _ceil_pool_out_len(length, k, s):
    """PyTorch MaxPool3d(ceil_mode=True, padding=0) output length."""
    out = -(-(length - k) // s) + 1  # ceil((L-k)/s) + 1
    if (out - 1) * s >= length:      # last window must start inside the input
        out -= 1
    return out


def _cdiv(a, b):
    return -(-a // b)


def _round_up(a, b):
    return _cdiv(a, b) * b


def _vmem_capacity_bytes():
    """Per-core VMEM capacity; conservative (v7x) fallback if unavailable."""
    try:
        if hasattr(pltpu, "get_tpu_info"):
            cap = getattr(pltpu.get_tpu_info(), "vmem_capacity_bytes", None)
            if cap:
                return int(cap)
    except Exception:
        pass
    return 64 * 1024 * 1024


# ---------------------------------------------------------------------------
# In-kernel pooling of one LEADING (untiled) axis.
# Only unit-stride slices and leading-dim reshapes are used (robust on Mosaic),
# and the max is computed only at output positions (phase decomposition).
# ---------------------------------------------------------------------------
def _pool_axis(x, axis, k, s, out_len):
    if s == 1:
        m = lax.slice_in_dim(x, 0, out_len, axis=axis)
        for d in range(1, k):
            m = jnp.maximum(m, lax.slice_in_dim(x, d, d + out_len, axis=axis))
        return m
    groups = out_len + (k - 1) // s
    assert x.shape[axis] >= groups * s
    x = lax.slice_in_dim(x, 0, groups * s, axis=axis)
    x = x.reshape(x.shape[:axis] + (groups, s) + x.shape[axis + 1:])
    m = None
    for d in range(k):
        q, r = divmod(d, s)
        piece = lax.slice_in_dim(x, q, q + out_len, axis=axis)       # groups
        piece = lax.slice_in_dim(piece, r, r + 1, axis=axis + 1)     # phase r
        m = piece if m is None else jnp.maximum(m, piece)
    return m.reshape(m.shape[:axis] + (out_len,) + m.shape[axis + 2:])


def _maxpool3d_kernel(*refs, kernel, stride, axis_order, out_t, out_hw,
                      f_t, halo_len, has_halo):
    """Block layout: (T_in, H_in, W_in, CB, LANE); pooled axes are leading."""
    h_out, w_out = out_hw
    if has_halo:
        xm_ref, xh_ref, o_ref, tail_ref = refs
    else:
        xm_ref, o_ref = refs

    def pool(x, t_len):
        lens = {0: t_len, 1: h_out, 2: w_out}
        for ax in axis_order:
            x = _pool_axis(x, ax, kernel[ax], stride[ax], lens[ax])
        return x

    if not has_halo:
        o_ref[...] = pool(xm_ref[...], out_t)
        return

    s_t = stride[0]
    main_out = out_t - f_t
    # Output rows [0, main_out) depend only on the main block: pool it straight
    # from the ref (no full-block VMEM round-trip).
    if main_out > 0:
        o_ref[0:main_out, :, :, :, :] = pool(xm_ref[...], main_out)
    # Output rows [main_out, out_t) straddle the block boundary: stitch only
    # the last halo_len main rows with the halo rows in a tiny VMEM scratch.
    tail_ref[0:halo_len, :, :, :, :] = (
        xm_ref[out_t * s_t - halo_len:out_t * s_t, :, :, :, :])
    tail_ref[halo_len:2 * halo_len, :, :, :, :] = xh_ref[...]
    o_ref[main_out:out_t, :, :, :, :] = pool(tail_ref[...], f_t)


# ---------------------------------------------------------------------------
# Block-size heuristic (VMEM-aware, keeps enough grid steps for pipelining)
# ---------------------------------------------------------------------------
def _choose_block_t(t_out, req, step_bytes, budget, block_t=None, min_steps=4):
    bt_max = _round_up(t_out, req)
    if block_t is not None:
        bt = _round_up(max(1, int(block_t)), req)
        return max(req, min(bt, bt_max))
    # Largest multiple of `req` whose per-step VMEM footprint fits the budget.
    fit = req
    while fit + req <= bt_max and step_bytes(fit + req) <= budget:
        fit += req
    # Keep >= min_steps grid steps when t_out allows: lets BlockSpec
    # double-buffering overlap DMAs with compute and lets megacore shard the
    # "parallel" T axis across both v7x TensorCores.
    want_steps = min(min_steps, _cdiv(t_out, req))
    cap = max(req, _round_up(_cdiv(t_out, want_steps), req))
    bt = min(fit, cap)
    # Prefer exactly tiling t_out (no padded tail) when it costs < 2x steps.
    for c in range(bt, req - 1, -req):
        if t_out % c == 0 and 2 * c >= bt:
            return c
    return bt


# ---------------------------------------------------------------------------
# Wrapper (single fused pad, layout glue, pipelined pallas_call)
# ---------------------------------------------------------------------------
def max_pool3d_tf_padding(x, kernel_size, stride=None, padding="SAME",
                          block_t=None):
    """Forward pass of MaxPool3dTFPadding. x is NCDHW: (N, C, T, H, W)."""
    assert padding == "SAME"
    kernel = _to3(kernel_size)
    strides = kernel if stride is None else _to3(stride)
    n, c, t, h, w = x.shape
    nc = n * c
    dt = x.dtype
    esize = jnp.dtype(dt).itemsize

    if jnp.issubdtype(dt, jnp.floating):
        neg = float("-inf")
    elif jnp.issubdtype(dt, jnp.integer):
        neg = int(jnp.iinfo(dt).min)
    else:
        raise TypeError(f"unsupported dtype {dt}")

    # TF-"SAME" pad amounts, with the reference module's H/W ordering quirk:
    # ConstantPad3d(ps) applies ps as (W_l, W_r, H_t, H_b, T_f, T_b).
    ps = get_padding_shape(kernel, strides)
    pad_t, pad_h, pad_w = (ps[4], ps[5]), (ps[2], ps[3]), (ps[0], ps[1])
    t_pad = t + sum(pad_t)
    h_pad = h + sum(pad_h)
    w_pad = w + sum(pad_w)

    t_out = _ceil_pool_out_len(t_pad, kernel[0], strides[0])
    h_out = _ceil_pool_out_len(h_pad, kernel[1], strides[1])
    w_out = _ceil_pool_out_len(w_pad, kernel[2], strides[2])

    f_t = (kernel[0] - 1) // strides[0]
    f_h = (kernel[1] - 1) // strides[1]
    f_w = (kernel[2] - 1) // strides[2]
    has_halo = kernel[0] > strides[0]           # T blocks overlap iff k_t > s_t
    halo_len = f_t * strides[0] if has_halo else 0
    req = f_t if has_halo else 1

    # Channel trailing layout: lane-dense when possible, never pads channels.
    if nc % 128 == 0:
        cb, ln = nc // 128, 128
    else:
        cb, ln = 1, nc

    # Full (untiled) extents needed along H/W by the phase-decomposed pooling.
    h_need = max(h_pad, strides[1] * (h_out + f_h))
    w_need = max(w_pad, strides[2] * (w_out + f_w))

    # Pool the strongest-reducing axes first; skip identity axes.
    axis_order = tuple(
        ax for ax in sorted(range(3), key=lambda a: (-strides[a], a))
        if not (kernel[ax] == 1 and strides[ax] == 1))
    s_first = strides[axis_order[0]] if axis_order else 1

    # (8,128)-tile-padded bytes of one (CB, LANE) slab, as Mosaic stores it.
    sub = max(8, 32 // esize)
    pcl = _round_up(cb, sub) * _round_up(ln, 128) * esize

    def step_bytes(bt_):
        rows_in = bt_ * strides[0]
        in_b = rows_in * h_need * w_need * pcl
        halo_b = halo_len * h_need * w_need * pcl
        tail_b = 2 * halo_len * h_need * w_need * pcl
        out_b = bt_ * h_out * w_out * pcl
        # double-buffered DMA windows + first-stage pooling intermediates
        work = in_b + 2 * (in_b // max(s_first, 1)) + 2 * out_b
        return 2 * (in_b + halo_b + out_b) + tail_b + work

    vmem_cap = _vmem_capacity_bytes()
    vmem_limit = int(min(vmem_cap * 3 // 4, 96 * 1024 * 1024))
    budget = int(vmem_limit * 0.7)

    bt = _choose_block_t(t_out, req, step_bytes, budget, block_t=block_t)
    n_tb = _cdiv(t_out, bt)
    t_out_pad = n_tb * bt
    t_need = max(t_pad, t_out_pad * strides[0] + halo_len)

    # Single pad: SAME zeros + ceil-mode / block-rounding fill merged.
    # Back fill can be 0 when a trailing SAME zero is already inside the last
    # (overhanging) window; otherwise use the dtype minimum (max identity).
    back_t = t_need - t - pad_t[0]
    back_h = h_need - h - pad_h[0]
    back_w = w_need - w - pad_w[0]
    fill_t = 0 if pad_t[1] >= 1 else neg
    fill_h = 0 if pad_h[1] >= 1 else neg
    fill_w = 0 if pad_w[1] >= 1 else neg

    # Layout glue: transpose touches only unpadded bytes; pad writes straight
    # into the kernel layout (one copy each, XLA may fuse them).
    # TODO(synk): folding this relayout into the kernel DMA would need lane-
    #             axis W pooling; kept as XLA glue for lowering robustness.
    xt = jnp.transpose(x.reshape(nc, t, h, w), (1, 2, 3, 0))       # (T,H,W,NC)
    xp = jnp.pad(
        xt,
        ((pad_t[0], back_t), (pad_h[0], back_h), (pad_w[0], back_w), (0, 0)),
        constant_values=((0, fill_t), (0, fill_h), (0, fill_w), (0, 0)))
    xk = xp.reshape(t_need, h_need, w_need, cb, ln)

    kern = functools.partial(
        _maxpool3d_kernel, kernel=kernel, stride=strides,
        axis_order=axis_order, out_t=bt, out_hw=(h_out, w_out),
        f_t=f_t, halo_len=halo_len, has_halo=has_halo)

    in_specs = [pl.BlockSpec((bt * strides[0], h_need, w_need, cb, ln),
                             lambda tb: (tb, 0, 0, 0, 0))]
    inputs = [xk]
    scratch = []
    if has_halo:
        ratio = (bt * strides[0]) // halo_len
        assert (bt * strides[0]) % halo_len == 0
        in_specs.append(pl.BlockSpec((halo_len, h_need, w_need, cb, ln),
                                     lambda tb: ((tb + 1) * ratio, 0, 0, 0, 0)))
        inputs.append(xk)
        scratch.append(pltpu.VMEM((2 * halo_len, h_need, w_need, cb, ln), dt))

    out_elems = t_out_pad * h_out * w_out * nc
    cost = pl.CostEstimate(
        flops=out_elems * ((kernel[0] - 1) + (kernel[1] - 1) + (kernel[2] - 1)),
        transcendentals=0,
        bytes_accessed=(n_tb * (bt * strides[0] + halo_len)
                        * h_need * w_need * nc + out_elems) * esize)

    out = pl.pallas_call(
        kern,
        out_shape=jax.ShapeDtypeStruct((t_out_pad, h_out, w_out, cb, ln), dt),
        grid=(n_tb,),
        in_specs=in_specs,
        out_specs=pl.BlockSpec((bt, h_out, w_out, cb, ln),
                               lambda tb: (tb, 0, 0, 0, 0)),
        scratch_shapes=scratch,
        compiler_params=pltpu.CompilerParams(
            dimension_semantics=("parallel",),
            vmem_limit_bytes=vmem_limit),
        cost_estimate=cost,
    )(*inputs)

    if t_out_pad != t_out:
        out = out[:t_out]
    out = out.reshape(t_out, h_out, w_out, nc)
    out = jnp.transpose(out, (3, 0, 1, 2)).reshape(n, c, t_out, h_out, w_out)
    return out


class MaxPool3dTFPadding:
    """JAX/Pallas port of the PyTorch module (no learnable parameters)."""

    def __init__(self, kernel_size, stride=None, padding="SAME"):
        assert padding == "SAME"
        self.kernel_size = _to3(kernel_size)
        self.stride = self.kernel_size if stride is None else _to3(stride)
        self.padding_shape = get_padding_shape(self.kernel_size, self.stride)

    def __call__(self, x, block_t=None):
        return max_pool3d_tf_padding(x, self.kernel_size, self.stride,
                                     block_t=block_t)


# ---------------------------------------------------------------------------
# Pure-JAX reference (ConstantPad3d(0) + MaxPool3d(ceil_mode=True))
# ---------------------------------------------------------------------------
def _reference(x, kernel_size, stride=None):
    kernel = _to3(kernel_size)
    strides = kernel if stride is None else _to3(stride)
    ps = get_padding_shape(kernel, strides)
    xp = jnp.pad(x, ((0, 0), (0, 0), (ps[4], ps[5]), (ps[2], ps[3]),
                     (ps[0], ps[1])))
    dims = xp.shape[2:]
    outs = [_ceil_pool_out_len(L, k, s) for L, k, s in zip(dims, kernel, strides)]
    extra = [(o - 1) * s + k - L for o, L, k, s in zip(outs, dims, kernel, strides)]
    extra = [max(e, 0) for e in extra]
    return lax.reduce_window(
        xp, jnp.array(-jnp.inf, dtype=x.dtype), lax.max,
        (1, 1) + kernel, (1, 1) + strides,
        ((0, 0), (0, 0), (0, extra[0]), (0, extra[1]), (0, extra[2])))


if __name__ == "__main__":
    key = jax.random.PRNGKey(0)
    x = jax.random.normal(key, (2, 32, 8, 8, 8), dtype=jnp.float32)  # NCDHW
    x_neg = -jnp.abs(x) - 1.0   # all-negative: locks in the SAME-zero argument

    # (kernel, stride, forced T-out block, input): exercise the halo path, the
    # output-T-padding path, the ceil-mode dtype-min fill path, and the
    # auto-chosen tiny-block (tail-only halo) path on all-negative data.
    configs = (((3, 3, 3), (2, 2, 2), 2, x),
               ((1, 3, 3), (1, 2, 2), 3, x),
               ((3, 3, 3), (3, 3, 3), None, x),
               ((3, 3, 3), (2, 2, 2), None, x_neg))

    all_ok = True
    for kernel_size, stride, blk_t, xin in configs:
        pool = MaxPool3dTFPadding(kernel_size, stride, padding="SAME")
        y = pool(xin, block_t=blk_t)
        jax.block_until_ready(y)
        y_ref = _reference(xin, kernel_size, stride)
        assert y.shape == y_ref.shape, (y.shape, y_ref.shape)
        all_ok &= bool(jnp.allclose(y, y_ref))

    assert all_ok
    print("KERNEL_OK")
</pallas_src>

<mosaic_0001>
module attributes {stable_mosaic.version = 11 : i64} {
  func.func @_maxpool3d_kernel(%arg0: i32, %arg1: memref<4x10x10x1x64xf32, #tpu.memory_space<vmem>>, %arg2: memref<2x10x10x1x64xf32, #tpu.memory_space<vmem>>, %arg3: memref<2x4x4x1x64xf32, #tpu.memory_space<vmem>>, %arg4: memref<4x10x10x1x64xf32, #tpu.memory_space<vmem>>) attributes {dimension_semantics = [#tpu.dimension_semantics<parallel>], iteration_bounds = array<i64: 2>, scalar_prefetch = 0 : i64, scratch_operands = 1 : i64, tpu.core_type = #tpu.core_type<tc>, window_params = [{transform_indices = @transform_0, window_bounds = array<i64: 4, 10, 10, 1, 64>}, {transform_indices = @transform_1, window_bounds = array<i64: 2, 10, 10, 1, 64>}, {transform_indices = @transform_2, window_bounds = array<i64: 2, 4, 4, 1, 64>}]} {
    %c0 = arith.constant 0 : index
    %c0_0 = arith.constant 0 : index
    %c0_1 = arith.constant 0 : index
    %c0_2 = arith.constant 0 : index
    %c0_3 = arith.constant 0 : index
    %0 = vector.load %arg1[%c0, %c0_0, %c0_1, %c0_2, %c0_3] : memref<4x10x10x1x64xf32, #tpu.memory_space<vmem>>, vector<4x10x10x1x64xf32>
    %1 = vector.extract_strided_slice %0 {offsets = [0, 0, 0, 0, 0], sizes = [4, 10, 10, 1, 64], strides = [1, 1, 1, 1, 1]} : vector<4x10x10x1x64xf32> to vector<4x10x10x1x64xf32>
    %2 = vector.shape_cast %1 : vector<4x10x10x1x64xf32> to vector<2x2x10x10x1x64xf32>
    %3 = vector.extract_strided_slice %2 {offsets = [0, 0, 0, 0, 0, 0], sizes = [1, 2, 10, 10, 1, 64], strides = [1, 1, 1, 1, 1, 1]} : vector<2x2x10x10x1x64xf32> to vector<1x2x10x10x1x64xf32>
    %4 = vector.extract_strided_slice %3 {offsets = [0, 0, 0, 0, 0, 0], sizes = [1, 1, 10, 10, 1, 64], strides = [1, 1, 1, 1, 1, 1]} : vector<1x2x10x10x1x64xf32> to vector<1x1x10x10x1x64xf32>
    %5 = vector.extract_strided_slice %2 {offsets = [0, 0, 0, 0, 0, 0], sizes = [1, 2, 10, 10, 1, 64], strides = [1, 1, 1, 1, 1, 1]} : vector<2x2x10x10x1x64xf32> to vector<1x2x10x10x1x64xf32>
    %6 = vector.extract_strided_slice %5 {offsets = [0, 1, 0, 0, 0, 0], sizes = [1, 1, 10, 10, 1, 64], strides = [1, 1, 1, 1, 1, 1]} : vector<1x2x10x10x1x64xf32> to vector<1x1x10x10x1x64xf32>
    %7 = arith.maximumf %4, %6 : vector<1x1x10x10x1x64xf32>
    %8 = vector.extract_strided_slice %2 {offsets = [1, 0, 0, 0, 0, 0], sizes = [1, 2, 10, 10, 1, 64], strides = [1, 1, 1, 1, 1, 1]} : vector<2x2x10x10x1x64xf32> to vector<1x2x10x10x1x64xf32>
    %9 = vector.extract_strided_slice %8 {offsets = [0, 0, 0, 0, 0, 0], sizes = [1, 1, 10, 10, 1, 64], strides = [1, 1, 1, 1, 1, 1]} : vector<1x2x10x10x1x64xf32> to vector<1x1x10x10x1x64xf32>
    %10 = arith.maximumf %7, %9 : vector<1x1x10x10x1x64xf32>
    %11 = vector.shape_cast %10 : vector<1x1x10x10x1x64xf32> to vector<1x10x10x1x64xf32>
    %12 = vector.extract_strided_slice %11 {offsets = [0, 0, 0, 0, 0], sizes = [1, 10, 10, 1, 64], strides = [1, 1, 1, 1, 1]} : vector<1x10x10x1x64xf32> to vector<1x10x10x1x64xf32>
    %13 = vector.shape_cast %12 : vector<1x10x10x1x64xf32> to vector<1x5x2x10x1x64xf32>
    %14 = vector.extract_strided_slice %13 {offsets = [0, 0, 0, 0, 0, 0], sizes = [1, 4, 2, 10, 1, 64], strides = [1, 1, 1, 1, 1, 1]} : vector<1x5x2x10x1x64xf32> to vector<1x4x2x10x1x64xf32>
    %15 = vector.extract_strided_slice %14 {offsets = [0, 0, 0, 0, 0, 0], sizes = [1, 4, 1, 10, 1, 64], strides = [1, 1, 1, 1, 1, 1]} : vector<1x4x2x10x1x64xf32> to vector<1x4x1x10x1x64xf32>
    %16 = vector.extract_strided_slice %13 {offsets = [0, 0, 0, 0, 0, 0], sizes = [1, 4, 2, 10, 1, 64], strides = [1, 1, 1, 1, 1, 1]} : vector<1x5x2x10x1x64xf32> to vector<1x4x2x10x1x64xf32>
    %17 = vector.extract_strided_slice %16 {offsets = [0, 0, 1, 0, 0, 0], sizes = [1, 4, 1, 10, 1, 64], strides = [1, 1, 1, 1, 1, 1]} : vector<1x4x2x10x1x64xf32> to vector<1x4x1x10x1x64xf32>
    %18 = arith.maximumf %15, %17 : vector<1x4x1x10x1x64xf32>
    %19 = vector.extract_strided_slice %13 {offsets = [0, 1, 0, 0, 0, 0], sizes = [1, 4, 2, 10, 1, 64], strides = [1, 1, 1, 1, 1, 1]} : vector<1x5x2x10x1x64xf32> to vector<1x4x2x10x1x64xf32>
    %20 = vector.extract_strided_slice %19 {offsets = [0, 0, 0, 0, 0, 0], sizes = [1, 4, 1, 10, 1, 64], strides = [1, 1, 1, 1, 1, 1]} : vector<1x4x2x10x1x64xf32> to vector<1x4x1x10x1x64xf32>
    %21 = arith.maximumf %18, %20 : vector<1x4x1x10x1x64xf32>
    %22 = vector.shape_cast %21 : vector<1x4x1x10x1x64xf32> to vector<1x4x10x1x64xf32>
    %23 = vector.extract_strided_slice %22 {offsets = [0, 0, 0, 0, 0], sizes = [1, 4, 10, 1, 64], strides = [1, 1, 1, 1, 1]} : vector<1x4x10x1x64xf32> to vector<1x4x10x1x64xf32>
    %24 = vector.shape_cast %23 : vector<1x4x10x1x64xf32> to vector<1x4x5x2x1x64xf32>
    %25 = vector.extract_strided_slice %24 {offsets = [0, 0, 0, 0, 0, 0], sizes = [1, 4, 4, 2, 1, 64], strides = [1, 1, 1, 1, 1, 1]} : vector<1x4x5x2x1x64xf32> to vector<1x4x4x2x1x64xf32>
    %26 = vector.extract_strided_slice %25 {offsets = [0, 0, 0, 0, 0, 0], sizes = [1, 4, 4, 1, 1, 64], strides = [1, 1, 1, 1, 1, 1]} : vector<1x4x4x2x1x64xf32> to vector<1x4x4x1x1x64xf32>
    %27 = vector.extract_strided_slice %24 {offsets = [0, 0, 0, 0, 0, 0], sizes = [1, 4, 4, 2, 1, 64], strides = [1, 1, 1, 1, 1, 1]} : vector<1x4x5x2x1x64xf32> to vector<1x4x4x2x1x64xf32>
    %28 = vector.extract_strided_slice %27 {offsets = [0, 0, 0, 1, 0, 0], sizes = [1, 4, 4, 1, 1, 64], strides = [1, 1, 1, 1, 1, 1]} : vector<1x4x4x2x1x64xf32> to vector<1x4x4x1x1x64xf32>
    %29 = arith.maximumf %26, %28 : vector<1x4x4x1x1x64xf32>
    %30 = vector.extract_strided_slice %24 {offsets = [0, 0, 1, 0, 0, 0], sizes = [1, 4, 4, 2, 1, 64], strides = [1, 1, 1, 1, 1, 1]} : vector<1x4x5x2x1x64xf32> to vector<1x4x4x2x1x64xf32>
    %31 = vector.extract_strided_slice %30 {offsets = [0, 0, 0, 0, 0, 0], sizes = [1, 4, 4, 1, 1, 64], strides = [1, 1, 1, 1, 1, 1]} : vector<1x4x4x2x1x64xf32> to vector<1x4x4x1x1x64xf32>
    %32 = arith.maximumf %29, %31 : vector<1x4x4x1x1x64xf32>
    %33 = vector.shape_cast %32 : vector<1x4x4x1x1x64xf32> to vector<1x4x4x1x64xf32>
    %c0_4 = arith.constant 0 : index
    %c0_5 = arith.constant 0 : index
    %c0_6 = arith.constant 0 : index
    %c0_7 = arith.constant 0 : index
    %c0_8 = arith.constant 0 : index
    %34 = vector.load %arg3[%c0_4, %c0_5, %c0_6, %c0_7, %c0_8] : memref<2x4x4x1x64xf32, #tpu.memory_space<vmem>>, vector<1x4x4x1x64xf32>
    tpu.vector_store %arg3[%c0_4, %c0_5, %c0_6, %c0_7, %c0_8], %33 {strides = array<i32>} : memref<2x4x4x1x64xf32, #tpu.memory_space<vmem>>, vector<1x4x4x1x64xf32>,
    %c2 = arith.constant 2 : index
    %c0_9 = arith.constant 0 : index
    %c0_10 = arith.constant 0 : index
    %c0_11 = arith.constant 0 : index
    %c0_12 = arith.constant 0 : index
    %35 = vector.load %arg1[%c2, %c0_9, %c0_10, %c0_11, %c0_12] : memref<4x10x10x1x64xf32, #tpu.memory_space<vmem>>, vector<2x10x10x1x64xf32>
    %c0_13 = arith.constant 0 : index
    %c0_14 = arith.constant 0 : index
    %c0_15 = arith.constant 0 : index
    %c0_16 = arith.constant 0 : index
    %c0_17 = arith.constant 0 : index
    %36 = vector.load %arg4[%c0_13, %c0_14, %c0_15, %c0_16, %c0_17] : memref<4x10x10x1x64xf32, #tpu.memory_space<vmem>>, vector<2x10x10x1x64xf32>
    tpu.vector_store %arg4[%c0_13, %c0_14, %c0_15, %c0_16, %c0_17], %35 {strides = array<i32>} : memref<4x10x10x1x64xf32, #tpu.memory_space<vmem>>, vector<2x10x10x1x64xf32>,
    %c0_18 = arith.constant 0 : index
    %c0_19 = arith.constant 0 : index
    %c0_20 = arith.constant 0 : index
    %c0_21 = arith.constant 0 : index
    %c0_22 = arith.constant 0 : index
    %37 = vector.load %arg2[%c0_18, %c0_19, %c0_20, %c0_21, %c0_22] : memref<2x10x10x1x64xf32, #tpu.memory_space<vmem>>, vector<2x10x10x1x64xf32>
    %c2_23 = arith.constant 2 : index
    %c0_24 = arith.constant 0 : index
    %c0_25 = arith.constant 0 : index
    %c0_26 = arith.constant 0 : index
    %c0_27 = arith.constant 0 : index
    %38 = vector.load %arg4[%c2_23, %c0_24, %c0_25, %c0_26, %c0_27] : memref<4x10x10x1x64xf32, #tpu.memory_space<vmem>>, vector<2x10x10x1x64xf32>
    tpu.vector_store %arg4[%c2_23, %c0_24, %c0_25, %c0_26, %c0_27], %37 {strides = array<i32>} : memref<4x10x10x1x64xf32, #tpu.memory_space<vmem>>, vector<2x10x10x1x64xf32>,
    %c0_28 = arith.constant 0 : index
    %c0_29 = arith.constant 0 : index
    %c0_30 = arith.constant 0 : index
    %c0_31 = arith.constant 0 : index
    %c0_32 = arith.constant 0 : index
    %39 = vector.load %arg4[%c0_28, %c0_29, %c0_30, %c0_31, %c0_32] : memref<4x10x10x1x64xf32, #tpu.memory_space<vmem>>, vector<4x10x10x1x64xf32>
    %40 = vector.extract_strided_slice %39 {offsets = [0, 0, 0, 0, 0], sizes = [4, 10, 10, 1, 64], strides = [1, 1, 1, 1, 1]} : vector<4x10x10x1x64xf32> to vector<4x10x10x1x64xf32>
    %41 = vector.shape_cast %40 : vector<4x10x10x1x64xf32> to vector<2x2x10x10x1x64xf32>
    %42 = vector.extract_strided_slice %41 {offsets = [0, 0, 0, 0, 0, 0], sizes = [1, 2, 10, 10, 1, 64], strides = [1, 1, 1, 1, 1, 1]} : vector<2x2x10x10x1x64xf32> to vector<1x2x10x10x1x64xf32>
    %43 = vector.extract_strided_slice %42 {offsets = [0, 0, 0, 0, 0, 0], sizes = [1, 1, 10, 10, 1, 64], strides = [1, 1, 1, 1, 1, 1]} : vector<1x2x10x10x1x64xf32> to vector<1x1x10x10x1x64xf32>
    %44 = vector.extract_strided_slice %41 {offsets = [0, 0, 0, 0, 0, 0], sizes = [1, 2, 10, 10, 1, 64], strides = [1, 1, 1, 1, 1, 1]} : vector<2x2x10x10x1x64xf32> to vector<1x2x10x10x1x64xf32>
    %45 = vector.extract_strided_slice %44 {offsets = [0, 1, 0, 0, 0, 0], sizes = [1, 1, 10, 10, 1, 64], strides = [1, 1, 1, 1, 1, 1]} : vector<1x2x10x10x1x64xf32> to vector<1x1x10x10x1x64xf32>
    %46 = arith.maximumf %43, %45 : vector<1x1x10x10x1x64xf32>
    %47 = vector.extract_strided_slice %41 {offsets = [1, 0, 0, 0, 0, 0], sizes = [1, 2, 10, 10, 1, 64], strides = [1, 1, 1, 1, 1, 1]} : vector<2x2x10x10x1x64xf32> to vector<1x2x10x10x1x64xf32>
    %48 = vector.extract_strided_slice %47 {offsets = [0, 0, 0, 0, 0, 0], sizes = [1, 1, 10, 10, 1, 64], strides = [1, 1, 1, 1, 1, 1]} : vector<1x2x10x10x1x64xf32> to vector<1x1x10x10x1x64xf32>
    %49 = arith.maximumf %46, %48 : vector<1x1x10x10x1x64xf32>
    %50 = vector.shape_cast %49 : vector<1x1x10x10x1x64xf32> to vector<1x10x10x1x64xf32>
    %51 = vector.extract_strided_slice %50 {offsets = [0, 0, 0, 0, 0], sizes = [1, 10, 10, 1, 64], strides = [1, 1, 1, 1, 1]} : vector<1x10x10x1x64xf32> to vector<1x10x10x1x64xf32>
    %52 = vector.shape_cast %51 : vector<1x10x10x1x64xf32> to vector<1x5x2x10x1x64xf32>
    %53 = vector.extract_strided_slice %52 {offsets = [0, 0, 0, 0, 0, 0], sizes = [1, 4, 2, 10, 1, 64], strides = [1, 1, 1, 1, 1, 1]} : vector<1x5x2x10x1x64xf32> to vector<1x4x2x10x1x64xf32>
    %54 = vector.extract_strided_slice %53 {offsets = [0, 0, 0, 0, 0, 0], sizes = [1, 4, 1, 10, 1, 64], strides = [1, 1, 1, 1, 1, 1]} : vector<1x4x2x10x1x64xf32> to vector<1x4x1x10x1x64xf32>
    %55 = vector.extract_strided_slice %52 {offsets = [0, 0, 0, 0, 0, 0], sizes = [1, 4, 2, 10, 1, 64], strides = [1, 1, 1, 1, 1, 1]} : vector<1x5x2x10x1x64xf32> to vector<1x4x2x10x1x64xf32>
    %56 = vector.extract_strided_slice %55 {offsets = [0, 0, 1, 0, 0, 0], sizes = [1, 4, 1, 10, 1, 64], strides = [1, 1, 1, 1, 1, 1]} : vector<1x4x2x10x1x64xf32> to vector<1x4x1x10x1x64xf32>
    %57 = arith.maximumf %54, %56 : vector<1x4x1x10x1x64xf32>
    %58 = vector.extract_strided_slice %52 {offsets = [0, 1, 0, 0, 0, 0], sizes = [1, 4, 2, 10, 1, 64], strides = [1, 1, 1, 1, 1, 1]} : vector<1x5x2x10x1x64xf32> to vector<1x4x2x10x1x64xf32>
    %59 = vector.extract_strided_slice %58 {offsets = [0, 0, 0, 0, 0, 0], sizes = [1, 4, 1, 10, 1, 64], strides = [1, 1, 1, 1, 1, 1]} : vector<1x4x2x10x1x64xf32> to vector<1x4x1x10x1x64xf32>
    %60 = arith.maximumf %57, %59 : vector<1x4x1x10x1x64xf32>
    %61 = vector.shape_cast %60 : vector<1x4x1x10x1x64xf32> to vector<1x4x10x1x64xf32>
    %62 = vector.extract_strided_slice %61 {offsets = [0, 0, 0, 0, 0], sizes = [1, 4, 10, 1, 64], strides = [1, 1, 1, 1, 1]} : vector<1x4x10x1x64xf32> to vector<1x4x10x1x64xf32>
    %63 = vector.shape_cast %62 : vector<1x4x10x1x64xf32> to vector<1x4x5x2x1x64xf32>
    %64 = vector.extract_strided_slice %63 {offsets = [0, 0, 0, 0, 0, 0], sizes = [1, 4, 4, 2, 1, 64], strides = [1, 1, 1, 1, 1, 1]} : vector<1x4x5x2x1x64xf32> to vector<1x4x4x2x1x64xf32>
    %65 = vector.extract_strided_slice %64 {offsets = [0, 0, 0, 0, 0, 0], sizes = [1, 4, 4, 1, 1, 64], strides = [1, 1, 1, 1, 1, 1]} : vector<1x4x4x2x1x64xf32> to vector<1x4x4x1x1x64xf32>
    %66 = vector.extract_strided_slice %63 {offsets = [0, 0, 0, 0, 0, 0], sizes = [1, 4, 4, 2, 1, 64], strides = [1, 1, 1, 1, 1, 1]} : vector<1x4x5x2x1x64xf32> to vector<1x4x4x2x1x64xf32>
    %67 = vector.extract_strided_slice %66 {offsets = [0, 0, 0, 1, 0, 0], sizes = [1, 4, 4, 1, 1, 64], strides = [1, 1, 1, 1, 1, 1]} : vector<1x4x4x2x1x64xf32> to vector<1x4x4x1x1x64xf32>
    %68 = arith.maximumf %65, %67 : vector<1x4x4x1x1x64xf32>
    %69 = vector.extract_strided_slice %63 {offsets = [0, 0, 1, 0, 0, 0], sizes = [1, 4, 4, 2, 1, 64], strides = [1, 1, 1, 1, 1, 1]} : vector<1x4x5x2x1x64xf32> to vector<1x4x4x2x1x64xf32>
    %70 = vector.extract_strided_slice %69 {offsets = [0, 0, 0, 0, 0, 0], sizes = [1, 4, 4, 1, 1, 64], strides = [1, 1, 1, 1, 1, 1]} : vector<1x4x4x2x1x64xf32> to vector<1x4x4x1x1x64xf32>
    %71 = arith.maximumf %68, %70 : vector<1x4x4x1x1x64xf32>
    %72 = vector.shape_cast %71 : vector<1x4x4x1x1x64xf32> to vector<1x4x4x1x64xf32>
    %c1 = arith.constant 1 : index
    %c0_33 = arith.constant 0 : index
    %c0_34 = arith.constant 0 : index
    %c0_35 = arith.constant 0 : index
    %c0_36 = arith.constant 0 : index
    %73 = vector.load %arg3[%c1, %c0_33, %c0_34, %c0_35, %c0_36] : memref<2x4x4x1x64xf32, #tpu.memory_space<vmem>>, vector<1x4x4x1x64xf32>
    tpu.vector_store %arg3[%c1, %c0_33, %c0_34, %c0_35, %c0_36], %72 {strides = array<i32>} : memref<2x4x4x1x64xf32, #tpu.memory_space<vmem>>, vector<1x4x4x1x64xf32>,
    return
  }
  func.func @transform_0(%arg0: i32) -> (i32, i32, i32, i32, i32) {
    %c0_i32 = arith.constant 0 : i32
    %c0_i32_0 = arith.constant 0 : i32
    %c0_i32_1 = arith.constant 0 : i32
    %c0_i32_2 = arith.constant 0 : i32
    %c0_i32_3 = arith.constant 0 : i32
    return %arg0, %c0_i32, %c0_i32_0, %c0_i32_1, %c0_i32_2 : i32, i32, i32, i32, i32
  }
  func.func @transform_1(%arg0: i32) -> (i32, i32, i32, i32, i32) {
    %c1_i32 = arith.constant 1 : i32
    %0 = arith.addi %arg0, %c1_i32 : i32
    %c2_i32 = arith.constant 2 : i32
    %1 = arith.muli %0, %c2_i32 : i32
    %c0_i32 = arith.constant 0 : i32
    %c0_i32_0 = arith.constant 0 : i32
    %c0_i32_1 = arith.constant 0 : i32
    %c0_i32_2 = arith.constant 0 : i32
    %c0_i32_3 = arith.constant 0 : i32
    return %1, %c0_i32, %c0_i32_0, %c0_i32_1, %c0_i32_2 : i32, i32, i32, i32, i32
  }
  func.func @transform_2(%arg0: i32) -> (i32, i32, i32, i32, i32) {
    %c0_i32 = arith.constant 0 : i32
    %c0_i32_0 = arith.constant 0 : i32
    %c0_i32_1 = arith.constant 0 : i32
    %c0_i32_2 = arith.constant 0 : i32
    %c0_i32_3 = arith.constant 0 : i32
    return %arg0, %c0_i32, %c0_i32_0, %c0_i32_1, %c0_i32_2 : i32, i32, i32, i32, i32
  }
}

</mosaic_0001>

<bundles_post_ra>
// kernel: tpu_custom_call.1
= control target key start
LH: loop header
LB: loop body
LE: loop exit
PB: predicated region body
PF: predicated region fallthrough
CT: control target
= control target key end

     0   :  { %s3963_s0 = inlined_call_operand.hbm [shape: f32[10,10,10,1,64], index: 0, kind: input, shape index: {}]   ;;  %s3964_s1 = inlined_call_operand.hbm [shape: f32[10,10,10,1,64], index: 1, kind: input, shape index: {}]   ;;  %s3965_s2 = inlined_call_operand.hbm [shape: f32[4,4,4,1,64], index: 2, kind: output, shape index: {}]  }
   0x1   :  { %3969 = sst [smem:[#allocation13_spill]] %s3963_s0 }
   0x2   :  { %7 = vsyncpa [#allocation4], 0 }
   0x3   :  { %9 = vsyncpa [#allocation4 + $0x1], 0 }
   0x4   :  { %10 = vsyncpa [#allocation7], 0 }
   0x5   :  { %12 = vsyncpa [#allocation7 + $0x1], 0 }
   0x6   :  { %13 = vsyncpa [#allocation5], 0 }
   0x7   :  { %15 = vsyncpa [#allocation5 + $0x1], 0  ;;  %s2688_s9 = smov 0   ;;  %s2690_s10 = smov 0  }
   0x8   :  { %s2692_s11 = smov 0   ;;  %s2694_s12 = smov 0  }
   0x9   :  { %s2696_s13 = smov 0   ;;  %s2698_s14 = smov 0  }
   0xa   :  { %s2700_s15 = smov 0  }
   0xb LB: > { %s2722_s16 = sadd.s32 4294967295, %s2662_s15   ;;  %s2195_s17 = sadd.s32 4294967294, %s2662_s15   ;;  %s2662_s15 = sphi %s2700_s15, %s3989_s15   ;;  %s2658_s14 = sphi %s2698_s14, %s3988_s14   ;;  %s2654_s13 = sphi %s2696_s13, %s3987_s13   ;;  %s2650_s12 = sphi %s2694_s12, %s3986_s12   ;;  %s2646_s11 = sphi %s2692_s11, %s3985_s11   ;;  %s2642_s10 = sphi %s2690_s10, %s3984_s10   ;;  %s2638_s9 = sphi %s2688_s9, %s3983_s9  }
   0xc   : > { %s2726_s18 = sadd.s32 1, %s2662_s15   ;;  %s28_s19 = sadd.s32 1, %s2658_s14 }
   0xd   : > { %s25_s20 = ssub.s32 %s2662_s15, %s2726_s18  ;;  %p35_p0 = scmp.ne.s32.totalorder %s2658_s14, %s2654_s13 }
   0xe   : > { %p26_p1 = scmp.eq.s32.totalorder %s25_s20, 0  ;;  %p36_p2 = scmp.eq.s32.totalorder %s2662_s15, 0 }
   0xf   : > { %p41_p3 = scmp.ne.s32.totalorder %s2654_s13, %s2650_s12  ;;  %p42_p4 = scmp.eq.s32.totalorder %s2722_s16, 0 }
  0x10   : > { %s2738_s21 = scalar_select %p26_p1, %s2658_s14, %s28_s19  }
  0x11   : > { %p2745_p5 = por %p36_p2, %p35_p0  ;;  %p2754_p6 = por %p42_p4, %p41_p3 }
  0x12   : > { %3970 = sst [smem:[#allocation12_spill]] %s2738_s21  ;;  %s2432_s24 = sshll.u32 %s2662_s15, 1 }
  0x13   : > { %s58_s25 = sadd.s32 1, %s2646_s11  ;;  %s2433_s26 = sadd.s32 2, %s2432_s24 }
  0x14   : > { %p65_p7 = scmp.ne.s32.totalorder %s2646_s11, %s2642_s10  ;;  %s2435_s27 = sadd.s32 2, %s2433_s26 }
  0x15   : > { %p71_p8 = scmp.ne.s32.totalorder %s2642_s10, %s2638_s9  ;;  %s55_s28 = ssub.s32 %s2433_s26, %s2435_s27 }
  0x16   : > { %p2765_p9 = por %p65_p7, %p36_p2  ;;  %p56_p10 = scmp.eq.s32.totalorder %s55_s28, 0 }
  0x17   : > { %p2771_p11 = por %p71_p8, %p42_p4  ;;  %p95_p12 = scmp.eq.s32.totalorder %s2722_s16, 1 }
  0x18   : > { %p101_p13 = scmp.eq.s32.totalorder %s2195_s17, 1  ;;  %p3966_p4 = scmp.ge.s32.totalorder %s2662_s15, 2 }
  0x19   : > { %s3974_s30 = scalar_select %p2771_p11, 1, 0 }
  0x1a   : > { %s2777_s3 = scalar_select %p56_p10, %s2646_s11, %s58_s25  }
  0x1b   : > { %p2782_p1 = por %p95_p12, %p35_p0  ;;  %p2789_p2 = por %p101_p13, %p41_p3 }
  0x1c   : > { %117 = sbr.rel (%p3966_p4) target bundleno = 98 (0x62), region = 16 }
  0x1d   : > { %s3975_s4 = scalar_select %p2782_p1, 1, 0 }
  0x1e   : > { %s3976_s5 = scalar_select %p2789_p2, 1, 0 }
  0x21   : > { %120 = sbr.rel (!%p2745_p5) target bundleno = 72 (0x48), region = 20  ;;  %s121_s6 = sand.u32 (%p2745_p5), 1, %s2658_s14  }
  0x22   : > { %s2200_s7 = sshll.u32 (%p2745_p5), %s2662_s15, 2  ;;  %s2440_s8 = smul.u32 (%p2745_p5), 400, %s121_s6 }
  0x23   : > { %s127_s9 = ssub.s32 (%p2745_p5), 10, %s2200_s7  ;;  %s2803_s20 = scalar_lea.sflag (%p2745_p5), [#allocation4], %s121_s6 }
  0x24   : > { %p128_p0 = scmp.lt.s32.totalorder (%p2745_p5), %s127_s9, 4  ;;  %s125_s24 = scalar_lea.vmem (%p2745_p5), [#allocation3], %s2440_s8 }
  0x26   : > { %s3991_s9 = smov (!%p128_p0, %s127_s9), 4 }
  0x27   : > { %s2800_s17 = smul.u32 1600, %s3991_s9 }
  0x29   : > { %s134_s19 = ssub.s32 6400, %s2800_s17 }
  0x2a   : > { %135 = vsyncadd %s2803_s20, %s134_s19  ;;  %p2204_p3 = scmp.ne.s32.totalorder %s2800_s17, 0  ;;  %s2441_s22 = smul.u32 6400, %s2662_s15 }
  0x2b   : > { %s141_s25 = sshll.u32 %s125_s24, 4  ;;  %s3977_s0 = sld [smem:[#allocation13_spill]]  ;;  %s2813_s25 = int_to_ptr.vmem [resolvable:$true] %s141_s25 }
  0x31   : > { %s2811_s28 = scalar_lea.hbm %s3977_s0, %s2441_s22  ;;  %s2521_s9 = scalar_lea.hbm %s3977_s0, 16000 }
  0x32   : > { %s2517_s6 = scalar_lea.hbm %s2811_s28, %s2800_s17  ;;  %p2522_p10 = scmp.lt.s32.totalorder %s2811_s28, %s3977_s0 }
  0x33   : > { %p2518_p5 = scmp.ne.s32.totalorder %s2811_s28, %s2517_s6  ;;  %p2523_p12 = scmp.lt.s32.totalorder %s2521_s9, %s2517_s6 }
  0x35   : > { %p2519_p7 = pnand %p2518_p5, %p2204_p3  ;;  %p2524_p13 = por %p2523_p12, %p2522_p10 }
  0x37   : > { %p2520_p8 = pneg %p2519_p7 }
  0x39   : > { %p2525_p0 = pnand %p2524_p13, %p2520_p8 }
  0x3b   : > { %2528 = shalt.err (!%p2525_p0)
}
  0x3c   : > { %s2529_s22 = scalar_lea.vmem %s2813_s25, %s2800_s17  ;;  %s2664_s26 = smov [#allocation3]  }
  0x3d   : > { %p2530_p5 = scmp.ne.s32.totalorder %s2813_s25, %s2529_s22  ;;  %s2533_s27 = sshll.u32 %s2664_s26, 4  ;;  %s2534_s27 = int_to_ptr.vmem [resolvable:$false] %s2533_s27 }
  0x3e   : > { %s2535_s7 = scalar_lea.vmem %s2534_s27, 12800  ;;  %p2536_p2 = scmp.lt.s32.totalorder %s2813_s25, %s2534_s27 }
  0x3f   : > { %p2531_p7 = pnand %p2530_p5, %p2204_p3  ;;  %p2537_p1 = scmp.lt.s32.totalorder %s2535_s7, %s2529_s22 }
  0x41   : > { %p2532_p4 = pneg %p2531_p7  ;;  %p2538_p11 = por %p2537_p1, %p2536_p2 }
  0x43   : > { %p2539_p10 = pnand %p2538_p11, %p2532_p4 }
  0x45   : > { %2542 = shalt.err (!%p2539_p10)
}
  0x46   : > { %s2665_s6 = smov 16   ;;  %s2666_s8 = smov 1  }
  0x47   : > { %147 = dma.hbm_to_vmem [thread:$0]  (%p2204_p3), %s2811_s28, %s2800_s17, %s2813_s25, %s2803_s20, %s2665_s6, %s2665_s6, %s2666_s8  }
  0x48 PF: > { %s151_s9 = sand.u32 1, %s2646_s11   ;;  %s2136_s19 = smul.u32 6400, %s2662_s15 }
  0x49   : > { %s2442_s24 = smul.u32 200, %s151_s9  ;;  %s2848_s17 = scalar_lea.sflag [#allocation7], %s151_s9 }
  0x4a   : > { %s2137_s27 = scalar_lea.hbm %s3964_s1, %s2136_s19  ;;  %s2547_s6 = scalar_lea.hbm %s3964_s1, 16000 }
  0x4b   : > { %s2844_s7 = scalar_lea.hbm %s2137_s27, 6400  ;;  %s155_s0 = scalar_lea.vmem [#allocation6], %s2442_s24 }
  0x4c   : > { %s165_s21 = sshll.u32 %s155_s0, 4  ;;  %s2569_s20 = scalar_lea.hbm %s2137_s27, 9600  ;;  %s2846_s21 = int_to_ptr.vmem [resolvable:$true] %s165_s21 }
  0x4d   : > { %p2544_p11 = scmp.ne.s32.totalorder %s2844_s7, %s2569_s20  ;;  %p2548_p4 = scmp.lt.s32.totalorder %s2844_s7, %s3964_s1 }
  0x4e   : > { %p2549_p3 = scmp.lt.s32.totalorder %s2547_s6, %s2569_s20 }
  0x4f   : > { %p2545_p1 = pnand %p2544_p11, %p2765_p9 }
  0x50   : > { %p2550_p8 = por %p2549_p3, %p2548_p4 }
  0x51   : > { %p2546_p2 = pneg %p2545_p1 }
  0x53   : > { %p2551_p12 = pnand %p2550_p8, %p2546_p2 }
  0x55   : > { %2554 = shalt.err (!%p2551_p12)
}
  0x56   : > { %s2555_s0 = scalar_lea.vmem %s2846_s21, 3200  ;;  %s2667_s9 = smov [#allocation6]  }
  0x57   : > { %p2556_p13 = scmp.ne.s32.totalorder %s2846_s21, %s2555_s0  ;;  %s2559_s24 = sshll.u32 %s2667_s9, 4  ;;  %s2560_s24 = int_to_ptr.vmem [resolvable:$false] %s2559_s24 }
  0x58   : > { %s2561_s22 = scalar_lea.vmem %s2560_s24, 6400  ;;  %p2562_p7 = scmp.lt.s32.totalorder %s2846_s21, %s2560_s24 }
  0x59   : > { %p2557_p0 = pnand %p2556_p13, %p2765_p9  ;;  %p2563_p10 = scmp.lt.s32.totalorder %s2561_s22, %s2555_s0 }
  0x5b   : > { %p2558_p5 = pneg %p2557_p0  ;;  %p2564_p11 = por %p2563_p10, %p2562_p7 }
  0x5d   : > { %p2565_p1 = pnand %p2564_p11, %p2558_p5 }
  0x5f   : > { %2568 = shalt.err (!%p2565_p1)
}
  0x60   : > { %s2668_s26 = smov 16   ;;  %s2669_s27 = smov 1  }
  0x61   : > { %2445 = dma.hbm_to_vmem [thread:$0]  (%p2765_p9), %s2844_s7, 3200, %s2846_s21, %s2848_s17, %s2668_s26, %s2668_s26, %s2669_s27  }
  0x62 PF: > { %p2208_p2 = scmp.ge.s32.totalorder %s2662_s15, 1  ;;  %p173_p4 = scmp.lt.s32.totalorder %s2662_s15, 3 }
  0x64   : > { %p174_p3 = pnand %p2208_p2, %p173_p4 }
  0x65   : > { %s2873_s20 = sand.u32 (!%p174_p3), 1, %s2654_s13  }
  0x66   : > { %177 = sbr.rel (%p174_p3) target bundleno = 472 (0x1d8), region = 28  ;;  %s180_s28 = scalar_lea.sflag (!%p174_p3), [#allocation4], %s2873_s20 }
  0x67   : > { %s2443_s25 = smul.u32 (!%p174_p3), 400, %s2873_s20 }
  0x69   : > { %s2877_s6 = scalar_lea.vmem (!%p174_p3), [#allocation3], %s2443_s25 }
  0x6b   : > { %2625 = dma.done.wait (%p2754_p6), %s180_s28, 6400  }
  0x6c   : > { %2627 = vsyncadd (%p2754_p6), %s180_s28, 4294960896  ;;  %s188_s21 = sand.u32 1, %s2642_s10   ;;  %p3978_p9 = scmp.ne.s32.totalorder %s3974_s30, 0 }
  0x6d   : > { %s2444_s29 = smul.u32 200, %s188_s21  ;;  %s189_s7 = scalar_lea.sflag [#allocation7], %s188_s21 }
  0x6f   : > { %s2884_s17 = scalar_lea.vmem [#allocation6], %s2444_s29 }
  0x70   : > { %2629 = dma.done.wait (%p3978_p9), %s189_s7, 3200  }
  0x71   : > { %2631 = vsyncadd (%p3978_p9), %s189_s7, 4294964096  ;;  %vm738_vm0 = vcmask 516096   ;;  %s2209_s23 = sshll.u32 %s2873_s20, 5  ;;  %v2210_v0 = vld [vmem:[%s2877_s6 + $0xc8] sm:$0x1]  ;;  %s2437_s8 = sshll.u32 %s2722_s16, 9 }
  0x72   : > { %v2211_v1 = vld [vmem:[%s2877_s6 + $0xc9] sm:$0x1]  ;;  %v2212_v2 = vld [vmem:[%s2877_s6 + $0xca] sm:$0x1]  ;;  %956 = vst.msk [vmem:[#allocation2] sm:$0x1] %vm738_vm0, %v2210_v0  ;;  %s3908_s9 = scalar_lea.hbm %s3965_s2, %s2437_s8 }
  0x73   : > { %957 = vst.msk [vmem:[#allocation2 + $0x1] sm:$0x1] %vm738_vm0, %v2211_v1  ;;  %958 = vst.msk [vmem:[#allocation2 + $0x2] sm:$0x1] %vm738_vm0, %v2212_v2  ;;  %v2213_v3 = vld [vmem:[%s2877_s6 + $0xcb] sm:$0x1] }
  0x74   : > { %v2214_v4 = vld [vmem:[%s2877_s6 + $0xcc] sm:$0x1]  ;;  %v2215_v5 = vld [vmem:[%s2877_s6 + $0xcd] sm:$0x1]  ;;  %959 = vst.msk [vmem:[#allocation2 + $0x3] sm:$0x1] %vm738_vm0, %v2213_v3 }
  0x75   : > { %960 = vst.msk [vmem:[#allocation2 + $0x4] sm:$0x1] %vm738_vm0, %v2214_v4  ;;  %961 = vst.msk [vmem:[#allocation2 + $0x5] sm:$0x1] %vm738_vm0, %v2215_v5  ;;  %v2216_v6 = vld [vmem:[%s2877_s6 + $0xce] sm:$0x1] }
  0x76   : > { %v2217_v7 = vld [vmem:[%s2877_s6 + $0xcf] sm:$0x1]  ;;  %v2218_v8 = vld [vmem:[%s2877_s6 + $0xd0] sm:$0x1]  ;;  %962 = vst.msk [vmem:[#allocation2 + $0x6] sm:$0x1] %vm738_vm0, %v2216_v6 }
  0x77   : > { %963 = vst.msk [vmem:[#allocation2 + $0x7] sm:$0x1] %vm738_vm0, %v2217_v7  ;;  %964 = vst.msk [vmem:[#allocation2 + $0x8] sm:$0x1] %vm738_vm0, %v2218_v8  ;;  %v2220_v9 = vld [vmem:[%s2877_s6 + $0xd2] sm:$0x1] }
  0x78   : > { %v2221_v10 = vld [vmem:[%s2877_s6 + $0xd3] sm:$0x1]  ;;  %v2222_v11 = vld [vmem:[%s2877_s6 + $0xd4] sm:$0x1]  ;;  %966 = vst.msk [vmem:[#allocation2 + $0xa] sm:$0x1] %vm738_vm0, %v2220_v9 }
  0x79   : > { %967 = vst.msk [vmem:[#allocation2 + $0xb] sm:$0x1] %vm738_vm0, %v2221_v10  ;;  %968 = vst.msk [vmem:[#allocation2 + $0xc] sm:$0x1] %vm738_vm0, %v2222_v11  ;;  %v2223_v12 = vld [vmem:[%s2877_s6 + $0xd5] sm:$0x1] }
  0x7a   : > { %v2224_v13 = vld [vmem:[%s2877_s6 + $0xd6] sm:$0x1]  ;;  %v2225_v14 = vld [vmem:[%s2877_s6 + $0xd7] sm:$0x1]  ;;  %969 = vst.msk [vmem:[#allocation2 + $0xd] sm:$0x1] %vm738_vm0, %v2223_v12 }
  0x7b   : > { %970 = vst.msk [vmem:[#allocation2 + $0xe] sm:$0x1] %vm738_vm0, %v2224_v13  ;;  %971 = vst.msk [vmem:[#allocation2 + $0xf] sm:$0x1] %vm738_vm0, %v2225_v14  ;;  %v2226_v15 = vld [vmem:[%s2877_s6 + $0xd8] sm:$0x1] }
  0x7c   : > { %v2227_v16 = vld [vmem:[%s2877_s6 + $0xd9] sm:$0x1]  ;;  %v2228_v17 = vld [vmem:[%s2877_s6 + $0xda] sm:$0x1]  ;;  %972 = vst.msk [vmem:[#allocation2 + $0x10] sm:$0x1] %vm738_vm0, %v2226_v15 }
  0x7d   : > { %973 = vst.msk [vmem:[#allocation2 + $0x11] sm:$0x1] %vm738_vm0, %v2227_v16  ;;  %974 = vst.msk [vmem:[#allocation2 + $0x12] sm:$0x1] %vm738_vm0, %v2228_v17  ;;  %v2230_v18 = vld [vmem:[%s2877_s6 + $0xdc] sm:$0x1] }
  0x7e   : > { %v2231_v19 = vld [vmem:[%s2877_s6 + $0xdd] sm:$0x1]  ;;  %v2232_v20 = vld [vmem:[%s2877_s6 + $0xde] sm:$0x1]  ;;  %976 = vst.msk [vmem:[#allocation2 + $0x14] sm:$0x1] %vm738_vm0, %v2230_v18 }
  0x7f   : > { %977 = vst.msk [vmem:[#allocation2 + $0x15] sm:$0x1] %vm738_vm0, %v2231_v19  ;;  %978 = vst.msk [vmem:[#allocation2 + $0x16] sm:$0x1] %vm738_vm0, %v2232_v20  ;;  %v2233_v21 = vld [vmem:[%s2877_s6 + $0xdf] sm:$0x1] }
  0x80   : > { %v2234_v22 = vld [vmem:[%s2877_s6 + $0xe0] sm:$0x1]  ;;  %v2235_v23 = vld [vmem:[%s2877_s6 + $0xe1] sm:$0x1]  ;;  %979 = vst.msk [vmem:[#allocation2 + $0x17] sm:$0x1] %vm738_vm0, %v2233_v21 }
  0x81   : > { %980 = vst.msk [vmem:[#allocation2 + $0x18] sm:$0x1] %vm738_vm0, %v2234_v22  ;;  %981 = vst.msk [vmem:[#allocation2 + $0x19] sm:$0x1] %vm738_vm0, %v2235_v23  ;;  %v2236_v24 = vld [vmem:[%s2877_s6 + $0xe2] sm:$0x1] }
  0x82   : > { %v2237_v25 = vld [vmem:[%s2877_s6 + $0xe3] sm:$0x1]  ;;  %v2238_v26 = vld [vmem:[%s2877_s6 + $0xe4] sm:$0x1]  ;;  %982 = vst.msk [vmem:[#allocation2 + $0x1a] sm:$0x1] %vm738_vm0, %v2236_v24 }
  0x83   : > { %983 = vst.msk [vmem:[#allocation2 + $0x1b] sm:$0x1] %vm738_vm0, %v2237_v25  ;;  %984 = vst.msk [vmem:[#allocation2 + $0x1c] sm:$0x1] %vm738_vm0, %v2238_v26  ;;  %v2240_v27 = vld [vmem:[%s2877_s6 + $0xe6] sm:$0x1] }
  0x84   : > { %v2241_v28 = vld [vmem:[%s2877_s6 + $0xe7] sm:$0x1]  ;;  %v2242_v29 = vld [vmem:[%s2877_s6 + $0xe8] sm:$0x1]  ;;  %986 = vst.msk [vmem:[#allocation2 + $0x1e] sm:$0x1] %vm738_vm0, %v2240_v27 }
  0x85   : > { %987 = vst.msk [vmem:[#allocation2 + $0x1f] sm:$0x1] %vm738_vm0, %v2241_v28  ;;  %988 = vst.msk [vmem:[#allocation2 + $0x20] sm:$0x1] %vm738_vm0, %v2242_v29  ;;  %v2243_v30 = vld [vmem:[%s2877_s6 + $0xe9] sm:$0x1] }
  0x86   : > { %v2244_v31 = vld [vmem:[%s2877_s6 + $0xea] sm:$0x1]  ;;  %v2245_v32 = vld [vmem:[%s2877_s6 + $0xeb] sm:$0x1]  ;;  %989 = vst.msk [vmem:[#allocation2 + $0x21] sm:$0x1] %vm738_vm0, %v2243_v30 }
  0x87   : > { %990 = vst.msk [vmem:[#allocation2 + $0x22] sm:$0x1] %vm738_vm0, %v2244_v31  ;;  %991 = vst.msk [vmem:[#allocation2 + $0x23] sm:$0x1] %vm738_vm0, %v2245_v32  ;;  %v2246_v33 = vld [vmem:[%s2877_s6 + $0xec] sm:$0x1] }
  0x88   : > { %v2247_v34 = vld [vmem:[%s2877_s6 + $0xed] sm:$0x1]  ;;  %v2248_v35 = vld [vmem:[%s2877_s6 + $0xee] sm:$0x1]  ;;  %992 = vst.msk [vmem:[#allocation2 + $0x24] sm:$0x1] %vm738_vm0, %v2246_v33 }
  0x89   : > { %993 = vst.msk [vmem:[#allocation2 + $0x25] sm:$0x1] %vm738_vm0, %v2247_v34  ;;  %994 = vst.msk [vmem:[#allocation2 + $0x26] sm:$0x1] %vm738_vm0, %v2248_v35  ;;  %v2250_v36 = vld [vmem:[%s2877_s6 + $0xf0] sm:$0x1] }
  0x8a   : > { %v2251_v37 = vld [vmem:[%s2877_s6 + $0xf1] sm:$0x1]  ;;  %v2252_v38 = vld [vmem:[%s2877_s6 + $0xf2] sm:$0x1]  ;;  %996 = vst.msk [vmem:[#allocation2 + $0x28] sm:$0x1] %vm738_vm0, %v2250_v36 }
  0x8b   : > { %997 = vst.msk [vmem:[#allocation2 + $0x29] sm:$0x1] %vm738_vm0, %v2251_v37  ;;  %998 = vst.msk [vmem:[#allocation2 + $0x2a] sm:$0x1] %vm738_vm0, %v2252_v38  ;;  %v2253_v39 = vld [vmem:[%s2877_s6 + $0xf3] sm:$0x1] }
  0x8c   : > { %v2254_v40 = vld [vmem:[%s2877_s6 + $0xf4] sm:$0x1]  ;;  %v2255_v41 = vld [vmem:[%s2877_s6 + $0xf5] sm:$0x1]  ;;  %999 = vst.msk [vmem:[#allocation2 + $0x2b] sm:$0x1] %vm738_vm0, %v2253_v39 }
  0x8d   : > { %1000 = vst.msk [vmem:[#allocation2 + $0x2c] sm:$0x1] %vm738_vm0, %v2254_v40  ;;  %1001 = vst.msk [vmem:[#allocation2 + $0x2d] sm:$0x1] %vm738_vm0, %v2255_v41  ;;  %v2256_v42 = vld [vmem:[%s2877_s6 + $0xf6] sm:$0x1] }
  0x8e   : > { %v2257_v43 = vld [vmem:[%s2877_s6 + $0xf7] sm:$0x1]  ;;  %v2258_v44 = vld [vmem:[%s2877_s6 + $0xf8] sm:$0x1]  ;;  %1002 = vst.msk [vmem:[#allocation2 + $0x2e] sm:$0x1] %vm738_vm0, %v2256_v42 }
  0x8f   : > { %1003 = vst.msk [vmem:[#allocation2 + $0x2f] sm:$0x1] %vm738_vm0, %v2257_v43  ;;  %1004 = vst.msk [vmem:[#allocation2 + $0x30] sm:$0x1] %vm738_vm0, %v2258_v44  ;;  %v2260_v45 = vld [vmem:[%s2877_s6 + $0xfa] sm:$0x1] }
  0x90   : > { %v2261_v46 = vld [vmem:[%s2877_s6 + $0xfb] sm:$0x1]  ;;  %v2262_v47 = vld [vmem:[%s2877_s6 + $0xfc] sm:$0x1]  ;;  %1006 = vst.msk [vmem:[#allocation2 + $0x32] sm:$0x1] %vm738_vm0, %v2260_v45 }
  0x91   : > { %1007 = vst.msk [vmem:[#allocation2 + $0x33] sm:$0x1] %vm738_vm0, %v2261_v46  ;;  %1008 = vst.msk [vmem:[#allocation2 + $0x34] sm:$0x1] %vm738_vm0, %v2262_v47  ;;  %v2263_v48 = vld [vmem:[%s2877_s6 + $0xfd] sm:$0x1] }
  0x92   : > { %v2264_v49 = vld [vmem:[%s2877_s6 + $0xfe] sm:$0x1]  ;;  %v2265_v50 = vld [vmem:[%s2877_s6 + $0xff] sm:$0x1]  ;;  %1009 = vst.msk [vmem:[#allocation2 + $0x35] sm:$0x1] %vm738_vm0, %v2263_v48 }
  0x93   : > { %1010 = vst.msk [vmem:[#allocation2 + $0x36] sm:$0x1] %vm738_vm0, %v2264_v49  ;;  %1011 = vst.msk [vmem:[#allocation2 + $0x37] sm:$0x1] %vm738_vm0, %v2265_v50  ;;  %v2266_v51 = vld [vmem:[%s2877_s6 + $0x100] sm:$0x1] }
  0x94   : > { %v2267_v52 = vld [vmem:[%s2877_s6 + $0x101] sm:$0x1]  ;;  %v2268_v53 = vld [vmem:[%s2877_s6 + $0x102] sm:$0x1]  ;;  %1012 = vst.msk [vmem:[#allocation2 + $0x38] sm:$0x1] %vm738_vm0, %v2266_v51 }
  0x95   : > { %1013 = vst.msk [vmem:[#allocation2 + $0x39] sm:$0x1] %vm738_vm0, %v2267_v52  ;;  %1014 = vst.msk [vmem:[#allocation2 + $0x3a] sm:$0x1] %vm738_vm0, %v2268_v53  ;;  %v2270_v54 = vld [vmem:[%s2877_s6 + $0x104] sm:$0x1] }
  0x96   : > { %v2271_v55 = vld [vmem:[%s2877_s6 + $0x105] sm:$0x1]  ;;  %v2272_v56 = vld [vmem:[%s2877_s6 + $0x106] sm:$0x1]  ;;  %1016 = vst.msk [vmem:[#allocation2 + $0x3c] sm:$0x1] %vm738_vm0, %v2270_v54 }
  0x97   : > { %1017 = vst.msk [vmem:[#allocation2 + $0x3d] sm:$0x1] %vm738_vm0, %v2271_v55  ;;  %1018 = vst.msk [vmem:[#allocation2 + $0x3e] sm:$0x1] %vm738_vm0, %v2272_v56  ;;  %v2273_v57 = vld [vmem:[%s2877_s6 + $0x107] sm:$0x1] }
  0x98   : > { %v2274_v58 = vld [vmem:[%s2877_s6 + $0x108] sm:$0x1]  ;;  %v2275_v59 = vld [vmem:[%s2877_s6 + $0x109] sm:$0x1]  ;;  %1019 = vst.msk [vmem:[#allocation2 + $0x3f] sm:$0x1] %vm738_vm0, %v2273_v57 }
  0x99   : > { %1020 = vst.msk [vmem:[#allocation2 + $0x40] sm:$0x1] %vm738_vm0, %v2274_v58  ;;  %1021 = vst.msk [vmem:[#allocation2 + $0x41] sm:$0x1] %vm738_vm0, %v2275_v59  ;;  %v2276_v60 = vld [vmem:[%s2877_s6 + $0x10a] sm:$0x1] }
  0x9a   : > { %v2277_v61 = vld [vmem:[%s2877_s6 + $0x10b] sm:$0x1]  ;;  %v2280_v62 = vld [vmem:[%s2877_s6 + $0x10e] sm:$0x1]  ;;  %1022 = vst.msk [vmem:[#allocation2 + $0x42] sm:$0x1] %vm738_vm0, %v2276_v60 }
  0x9b   : > { %1023 = vst.msk [vmem:[#allocation2 + $0x43] sm:$0x1] %vm738_vm0, %v2277_v61  ;;  %1026 = vst.msk [vmem:[#allocation2 + $0x46] sm:$0x1] %vm738_vm0, %v2280_v62  ;;  %v2281_v63 = vld [vmem:[%s2877_s6 + $0x10f] sm:$0x1] }
  0x9c   : > { %v2282_v0 = vld [vmem:[%s2877_s6 + $0x110] sm:$0x1]  ;;  %v2283_v1 = vld [vmem:[%s2877_s6 + $0x111] sm:$0x1]  ;;  %1027 = vst.msk [vmem:[#allocation2 + $0x47] sm:$0x1] %vm738_vm0, %v2281_v63 }
  0x9d   : > { %1028 = vst.msk [vmem:[#allocation2 + $0x48] sm:$0x1] %vm738_vm0, %v2282_v0  ;;  %1029 = vst.msk [vmem:[#allocation2 + $0x49] sm:$0x1] %vm738_vm0, %v2283_v1  ;;  %v2284_v2 = vld [vmem:[%s2877_s6 + $0x112] sm:$0x1] }
  0x9e   : > { %v2285_v3 = vld [vmem:[%s2877_s6 + $0x113] sm:$0x1]  ;;  %v2286_v4 = vld [vmem:[%s2877_s6 + $0x114] sm:$0x1]  ;;  %1030 = vst.msk [vmem:[#allocation2 + $0x4a] sm:$0x1] %vm738_vm0, %v2284_v2 }
  0x9f   : > { %1031 = vst.msk [vmem:[#allocation2 + $0x4b] sm:$0x1] %vm738_vm0, %v2285_v3  ;;  %1032 = vst.msk [vmem:[#allocation2 + $0x4c] sm:$0x1] %vm738_vm0, %v2286_v4  ;;  %v2287_v5 = vld [vmem:[%s2877_s6 + $0x115] sm:$0x1] }
  0xa0   : > { %v2310_v6 = vld [vmem:[%s2877_s6 + $0x12c] sm:$0x1]  ;;  %v2311_v7 = vld [vmem:[%s2877_s6 + $0x12d] sm:$0x1]  ;;  %1033 = vst.msk [vmem:[#allocation2 + $0x4d] sm:$0x1] %vm738_vm0, %v2287_v5 }
  0xa1   : > { %1056 = vst.msk [vmem:[#allocation2 + $0x64] sm:$0x1] %vm738_vm0, %v2310_v6  ;;  %1057 = vst.msk [vmem:[#allocation2 + $0x65] sm:$0x1] %vm738_vm0, %v2311_v7  ;;  %v2312_v8 = vld [vmem:[%s2877_s6 + $0x12e] sm:$0x1] }
  0xa2   : > { %v2313_v9 = vld [vmem:[%s2877_s6 + $0x12f] sm:$0x1]  ;;  %v2314_v10 = vld [vmem:[%s2877_s6 + $0x130] sm:$0x1]  ;;  %1058 = vst.msk [vmem:[#allocation2 + $0x66] sm:$0x1] %vm738_vm0, %v2312_v8 }
  0xa3   : > { %1059 = vst.msk [vmem:[#allocation2 + $0x67] sm:$0x1] %vm738_vm0, %v2313_v9  ;;  %1060 = vst.msk [vmem:[#allocation2 + $0x68] sm:$0x1] %vm738_vm0, %v2314_v10  ;;  %v2315_v11 = vld [vmem:[%s2877_s6 + $0x131] sm:$0x1] }
  0xa4   : > { %v2316_v12 = vld [vmem:[%s2877_s6 + $0x132] sm:$0x1]  ;;  %v2317_v13 = vld [vmem:[%s2877_s6 + $0x133] sm:$0x1]  ;;  %1061 = vst.msk [vmem:[#allocation2 + $0x69] sm:$0x1] %vm738_vm0, %v2315_v11 }
  0xa5   : > { %1062 = vst.msk [vmem:[#allocation2 + $0x6a] sm:$0x1] %vm738_vm0, %v2316_v12  ;;  %1063 = vst.msk [vmem:[#allocation2 + $0x6b] sm:$0x1] %vm738_vm0, %v2317_v13  ;;  %v2318_v14 = vld [vmem:[%s2877_s6 + $0x134] sm:$0x1] }
  0xa6   : > { %v2320_v15 = vld [vmem:[%s2877_s6 + $0x136] sm:$0x1]  ;;  %v2321_v16 = vld [vmem:[%s2877_s6 + $0x137] sm:$0x1]  ;;  %1064 = vst.msk [vmem:[#allocation2 + $0x6c] sm:$0x1] %vm738_vm0, %v2318_v14 }
  0xa7   : > { %1066 = vst.msk [vmem:[#allocation2 + $0x6e] sm:$0x1] %vm738_vm0, %v2320_v15  ;;  %1067 = vst.msk [vmem:[#allocation2 + $0x6f] sm:$0x1] %vm738_vm0, %v2321_v16  ;;  %v2322_v17 = vld [vmem:[%s2877_s6 + $0x138] sm:$0x1] }
  0xa8   : > { %v2323_v18 = vld [vmem:[%s2877_s6 + $0x139] sm:$0x1]  ;;  %v2324_v19 = vld [vmem:[%s2877_s6 + $0x13a] sm:$0x1]  ;;  %1068 = vst.msk [vmem:[#allocation2 + $0x70] sm:$0x1] %vm738_vm0, %v2322_v17 }
  0xa9   : > { %1069 = vst.msk [vmem:[#allocation2 + $0x71] sm:$0x1] %vm738_vm0, %v2323_v18  ;;  %1070 = vst.msk [vmem:[#allocation2 + $0x72] sm:$0x1] %vm738_vm0, %v2324_v19  ;;  %v2325_v20 = vld [vmem:[%s2877_s6 + $0x13b] sm:$0x1] }
  0xaa   : > { %v2326_v21 = vld [vmem:[%s2877_s6 + $0x13c] sm:$0x1]  ;;  %v2327_v22 = vld [vmem:[%s2877_s6 + $0x13d] sm:$0x1]  ;;  %1071 = vst.msk [vmem:[#allocation2 + $0x73] sm:$0x1] %vm738_vm0, %v2325_v20 }
  0xab   : > { %1072 = vst.msk [vmem:[#allocation2 + $0x74] sm:$0x1] %vm738_vm0, %v2326_v21  ;;  %1073 = vst.msk [vmem:[#allocation2 + $0x75] sm:$0x1] %vm738_vm0, %v2327_v22  ;;  %v2328_v23 = vld [vmem:[%s2877_s6 + $0x13e] sm:$0x1] }
  0xac   : > { %v2330_v24 = vld [vmem:[%s2877_s6 + $0x140] sm:$0x1]  ;;  %v2331_v25 = vld [vmem:[%s2877_s6 + $0x141] sm:$0x1]  ;;  %1074 = vst.msk [vmem:[#allocation2 + $0x76] sm:$0x1] %vm738_vm0, %v2328_v23 }
  0xad   : > { %1076 = vst.msk [vmem:[#allocation2 + $0x78] sm:$0x1] %vm738_vm0, %v2330_v24  ;;  %1077 = vst.msk [vmem:[#allocation2 + $0x79] sm:$0x1] %vm738_vm0, %v2331_v25  ;;  %v2332_v26 = vld [vmem:[%s2877_s6 + $0x142] sm:$0x1] }
  0xae   : > { %v2333_v27 = vld [vmem:[%s2877_s6 + $0x143] sm:$0x1]  ;;  %v2334_v28 = vld [vmem:[%s2877_s6 + $0x144] sm:$0x1]  ;;  %1078 = vst.msk [vmem:[#allocation2 + $0x7a] sm:$0x1] %vm738_vm0, %v2332_v26 }
  0xaf   : > { %1079 = vst.msk [vmem:[#allocation2 + $0x7b] sm:$0x1] %vm738_vm0, %v2333_v27  ;;  %1080 = vst.msk [vmem:[#allocation2 + $0x7c] sm:$0x1] %vm738_vm0, %v2334_v28  ;;  %v2335_v29 = vld [vmem:[%s2877_s6 + $0x145] sm:$0x1] }
  0xb0   : > { %v2336_v30 = vld [vmem:[%s2877_s6 + $0x146] sm:$0x1]  ;;  %v2337_v31 = vld [vmem:[%s2877_s6 + $0x147] sm:$0x1]  ;;  %1081 = vst.msk [vmem:[#allocation2 + $0x7d] sm:$0x1] %vm738_vm0, %v2335_v29 }
  0xb1   : > { %1082 = vst.msk [vmem:[#allocation2 + $0x7e] sm:$0x1] %vm738_vm0, %v2336_v30  ;;  %1083 = vst.msk [vmem:[#allocation2 + $0x7f] sm:$0x1] %vm738_vm0, %v2337_v31  ;;  %v2338_v32 = vld [vmem:[%s2877_s6 + $0x148] sm:$0x1] }
  0xb2   : > { %v2340_v33 = vld [vmem:[%s2877_s6 + $0x14a] sm:$0x1]  ;;  %v2341_v34 = vld [vmem:[%s2877_s6 + $0x14b] sm:$0x1]  ;;  %1084 = vst.msk [vmem:[#allocation2 + $0x80] sm:$0x1] %vm738_vm0, %v2338_v32 }
  0xb3   : > { %1086 = vst.msk [vmem:[#allocation2 + $0x82] sm:$0x1] %vm738_vm0, %v2340_v33  ;;  %1087 = vst.msk [vmem:[#allocation2 + $0x83] sm:$0x1] %vm738_vm0, %v2341_v34  ;;  %v2342_v35 = vld [vmem:[%s2877_s6 + $0x14c] sm:$0x1] }
  0xb4   : > { %v2343_v36 = vld [vmem:[%s2877_s6 + $0x14d] sm:$0x1]  ;;  %v2344_v37 = vld [vmem:[%s2877_s6 + $0x14e] sm:$0x1]  ;;  %1088 = vst.msk [vmem:[#allocation2 + $0x84] sm:$0x1] %vm738_vm0, %v2342_v35 }
  0xb5   : > { %1089 = vst.msk [vmem:[#allocation2 + $0x85] sm:$0x1] %vm738_vm0, %v2343_v36  ;;  %1090 = vst.msk [vmem:[#allocation2 + $0x86] sm:$0x1] %vm738_vm0, %v2344_v37  ;;  %v2345_v38 = vld [vmem:[%s2877_s6 + $0x14f] sm:$0x1] }
  0xb6   : > { %v2346_v39 = vld [vmem:[%s2877_s6 + $0x150] sm:$0x1]  ;;  %v2347_v40 = vld [vmem:[%s2877_s6 + $0x151] sm:$0x1]  ;;  %1091 = vst.msk [vmem:[#allocation2 + $0x87] sm:$0x1] %vm738_vm0, %v2345_v38 }
  0xb7   : > { %1092 = vst.msk [vmem:[#allocation2 + $0x88] sm:$0x1] %vm738_vm0, %v2346_v39  ;;  %1093 = vst.msk [vmem:[#allocation2 + $0x89] sm:$0x1] %vm738_vm0, %v2347_v40  ;;  %v2348_v41 = vld [vmem:[%s2877_s6 + $0x152] sm:$0x1] }
  0xb8   : > { %v2350_v42 = vld [vmem:[%s2877_s6 + $0x154] sm:$0x1]  ;;  %v2351_v43 = vld [vmem:[%s2877_s6 + $0x155] sm:$0x1]  ;;  %1094 = vst.msk [vmem:[#allocation2 + $0x8a] sm:$0x1] %vm738_vm0, %v2348_v41 }
  0xb9   : > { %1096 = vst.msk [vmem:[#allocation2 + $0x8c] sm:$0x1] %vm738_vm0, %v2350_v42  ;;  %1097 = vst.msk [vmem:[#allocation2 + $0x8d] sm:$0x1] %vm738_vm0, %v2351_v43  ;;  %v2352_v44 = vld [vmem:[%s2877_s6 + $0x156] sm:$0x1] }
  0xba   : > { %v2353_v45 = vld [vmem:[%s2877_s6 + $0x157] sm:$0x1]  ;;  %v2354_v46 = vld [vmem:[%s2877_s6 + $0x158] sm:$0x1]  ;;  %1098 = vst.msk [vmem:[#allocation2 + $0x8e] sm:$0x1] %vm738_vm0, %v2352_v44 }
  0xbb   : > { %1099 = vst.msk [vmem:[#allocation2 + $0x8f] sm:$0x1] %vm738_vm0, %v2353_v45  ;;  %1100 = vst.msk [vmem:[#allocation2 + $0x90] sm:$0x1] %vm738_vm0, %v2354_v46  ;;  %v2355_v47 = vld [vmem:[%s2877_s6 + $0x159] sm:$0x1] }
  0xbc   : > { %v2356_v48 = vld [vmem:[%s2877_s6 + $0x15a] sm:$0x1]  ;;  %v2357_v49 = vld [vmem:[%s2877_s6 + $0x15b] sm:$0x1]  ;;  %1101 = vst.msk [vmem:[#allocation2 + $0x91] sm:$0x1] %vm738_vm0, %v2355_v47 }
  0xbd   : > { %1102 = vst.msk [vmem:[#allocation2 + $0x92] sm:$0x1] %vm738_vm0, %v2356_v48  ;;  %1103 = vst.msk [vmem:[#allocation2 + $0x93] sm:$0x1] %vm738_vm0, %v2357_v49  ;;  %v2358_v50 = vld [vmem:[%s2877_s6 + $0x15c] sm:$0x1] }
  0xbe   : > { %v2360_v51 = vld [vmem:[%s2877_s6 + $0x15e] sm:$0x1]  ;;  %v2361_v52 = vld [vmem:[%s2877_s6 + $0x15f] sm:$0x1]  ;;  %1104 = vst.msk [vmem:[#allocation2 + $0x94] sm:$0x1] %vm738_vm0, %v2358_v50 }
  0xbf   : > { %1106 = vst.msk [vmem:[#allocation2 + $0x96] sm:$0x1] %vm738_vm0, %v2360_v51  ;;  %1107 = vst.msk [vmem:[#allocation2 + $0x97] sm:$0x1] %vm738_vm0, %v2361_v52  ;;  %v2362_v53 = vld [vmem:[%s2877_s6 + $0x160] sm:$0x1] }
  0xc0   : > { %v2363_v54 = vld [vmem:[%s2877_s6 + $0x161] sm:$0x1]  ;;  %v2364_v55 = vld [vmem:[%s2877_s6 + $0x162] sm:$0x1]  ;;  %1108 = vst.msk [vmem:[#allocation2 + $0x98] sm:$0x1] %vm738_vm0, %v2362_v53 }
  0xc1   : > { %1109 = vst.msk [vmem:[#allocation2 + $0x99] sm:$0x1] %vm738_vm0, %v2363_v54  ;;  %1110 = vst.msk [vmem:[#allocation2 + $0x9a] sm:$0x1] %vm738_vm0, %v2364_v55  ;;  %v2365_v56 = vld [vmem:[%s2877_s6 + $0x163] sm:$0x1] }
  0xc2   : > { %v2366_v57 = vld [vmem:[%s2877_s6 + $0x164] sm:$0x1]  ;;  %v2367_v58 = vld [vmem:[%s2877_s6 + $0x165] sm:$0x1]  ;;  %1111 = vst.msk [vmem:[#allocation2 + $0x9b] sm:$0x1] %vm738_vm0, %v2365_v56 }
  0xc3   : > { %1112 = vst.msk [vmem:[#allocation2 + $0x9c] sm:$0x1] %vm738_vm0, %v2366_v57  ;;  %1113 = vst.msk [vmem:[#allocation2 + $0x9d] sm:$0x1] %vm738_vm0, %v2367_v58  ;;  %v2368_v59 = vld [vmem:[%s2877_s6 + $0x166] sm:$0x1] }
  0xc4   : > { %v2370_v60 = vld [vmem:[%s2877_s6 + $0x168] sm:$0x1]  ;;  %v2371_v61 = vld [vmem:[%s2877_s6 + $0x169] sm:$0x1]  ;;  %1114 = vst.msk [vmem:[#allocation2 + $0x9e] sm:$0x1] %vm738_vm0, %v2368_v59 }
  0xc5   : > { %1116 = vst.msk [vmem:[#allocation2 + $0xa0] sm:$0x1] %vm738_vm0, %v2370_v60  ;;  %1117 = vst.msk [vmem:[#allocation2 + $0xa1] sm:$0x1] %vm738_vm0, %v2371_v61  ;;  %v2372_v62 = vld [vmem:[%s2877_s6 + $0x16a] sm:$0x1] }
  0xc6   : > { %v2373_v63 = vld [vmem:[%s2877_s6 + $0x16b] sm:$0x1]  ;;  %v2374_v0 = vld [vmem:[%s2877_s6 + $0x16c] sm:$0x1]  ;;  %1118 = vst.msk [vmem:[#allocation2 + $0xa2] sm:$0x1] %vm738_vm0, %v2372_v62 }
  0xc7   : > { %1119 = vst.msk [vmem:[#allocation2 + $0xa3] sm:$0x1] %vm738_vm0, %v2373_v63  ;;  %1120 = vst.msk [vmem:[#allocation2 + $0xa4] sm:$0x1] %vm738_vm0, %v2374_v0  ;;  %v2375_v1 = vld [vmem:[%s2877_s6 + $0x16d] sm:$0x1] }
  0xc8   : > { %v2376_v2 = vld [vmem:[%s2877_s6 + $0x16e] sm:$0x1]  ;;  %v2377_v3 = vld [vmem:[%s2877_s6 + $0x16f] sm:$0x1]  ;;  %1121 = vst.msk [vmem:[#allocation2 + $0xa5] sm:$0x1] %vm738_vm0, %v2375_v1 }
  0xc9   : > { %1122 = vst.msk [vmem:[#allocation2 + $0xa6] sm:$0x1] %vm738_vm0, %v2376_v2  ;;  %1123 = vst.msk [vmem:[#allocation2 + $0xa7] sm:$0x1] %vm738_vm0, %v2377_v3  ;;  %v2380_v4 = vld [vmem:[%s2877_s6 + $0x172] sm:$0x1] }
  0xca   : > { %v2381_v5 = vld [vmem:[%s2877_s6 + $0x173] sm:$0x1]  ;;  %v2382_v6 = vld [vmem:[%s2877_s6 + $0x174] sm:$0x1]  ;;  %1126 = vst.msk [vmem:[#allocation2 + $0xaa] sm:$0x1] %vm738_vm0, %v2380_v4 }
  0xcb   : > { %1127 = vst.msk [vmem:[#allocation2 + $0xab] sm:$0x1] %vm738_vm0, %v2381_v5  ;;  %1128 = vst.msk [vmem:[#allocation2 + $0xac] sm:$0x1] %vm738_vm0, %v2382_v6  ;;  %v2383_v7 = vld [vmem:[%s2877_s6 + $0x175] sm:$0x1] }
  0xcc   : > { %v2384_v8 = vld [vmem:[%s2877_s6 + $0x176] sm:$0x1]  ;;  %v2385_v9 = vld [vmem:[%s2877_s6 + $0x177] sm:$0x1]  ;;  %1129 = vst.msk [vmem:[#allocation2 + $0xad] sm:$0x1] %vm738_vm0, %v2383_v7 }
  0xcd   : > { %1130 = vst.msk [vmem:[#allocation2 + $0xae] sm:$0x1] %vm738_vm0, %v2384_v8  ;;  %1131 = vst.msk [vmem:[#allocation2 + $0xaf] sm:$0x1] %vm738_vm0, %v2385_v9  ;;  %v2386_v10 = vld [vmem:[%s2877_s6 + $0x178] sm:$0x1] }
  0xce   : > { %v2387_v11 = vld [vmem:[%s2877_s6 + $0x179] sm:$0x1]  ;;  %v2278_v12 = vld [vmem:[%s2877_s6 + $0x10c] sm:$0x1]  ;;  %1132 = vst.msk [vmem:[#allocation2 + $0xb0] sm:$0x1] %vm738_vm0, %v2386_v10 }
  0xcf   : > { %1133 = vst.msk [vmem:[#allocation2 + $0xb1] sm:$0x1] %vm738_vm0, %v2387_v11  ;;  %1024 = vst.msk [vmem:[#allocation2 + $0x44] sm:$0x1] %vm738_vm0, %v2278_v12  ;;  %v2288_v13 = vld [vmem:[%s2877_s6 + $0x116] sm:$0x1] }
  0xd0   : > { %v2290_v14 = vld [vmem:[%s2877_s6 + $0x118] sm:$0x1]  ;;  %v2291_v15 = vld [vmem:[%s2877_s6 + $0x119] sm:$0x1]  ;;  %1034 = vst.msk [vmem:[#allocation2 + $0x4e] sm:$0x1] %vm738_vm0, %v2288_v13 }
  0xd1   : > { %1036 = vst.msk [vmem:[#allocation2 + $0x50] sm:$0x1] %vm738_vm0, %v2290_v14  ;;  %1037 = vst.msk [vmem:[#allocation2 + $0x51] sm:$0x1] %vm738_vm0, %v2291_v15  ;;  %v2292_v16 = vld [vmem:[%s2877_s6 + $0x11a] sm:$0x1] }
  0xd2   : > { %v2293_v17 = vld [vmem:[%s2877_s6 + $0x11b] sm:$0x1]  ;;  %v2294_v18 = vld [vmem:[%s2877_s6 + $0x11c] sm:$0x1]  ;;  %1038 = vst.msk [vmem:[#allocation2 + $0x52] sm:$0x1] %vm738_vm0, %v2292_v16 }
  0xd3   : > { %1039 = vst.msk [vmem:[#allocation2 + $0x53] sm:$0x1] %vm738_vm0, %v2293_v17  ;;  %1040 = vst.msk [vmem:[#allocation2 + $0x54] sm:$0x1] %vm738_vm0, %v2294_v18  ;;  %v2295_v19 = vld [vmem:[%s2877_s6 + $0x11d] sm:$0x1] }
  0xd4   : > { %v2296_v20 = vld [vmem:[%s2877_s6 + $0x11e] sm:$0x1]  ;;  %v2297_v21 = vld [vmem:[%s2877_s6 + $0x11f] sm:$0x1]  ;;  %1041 = vst.msk [vmem:[#allocation2 + $0x55] sm:$0x1] %vm738_vm0, %v2295_v19 }
  0xd5   : > { %1042 = vst.msk [vmem:[#allocation2 + $0x56] sm:$0x1] %vm738_vm0, %v2296_v20  ;;  %1043 = vst.msk [vmem:[#allocation2 + $0x57] sm:$0x1] %vm738_vm0, %v2297_v21  ;;  %v2378_v22 = vld [vmem:[%s2877_s6 + $0x170] sm:$0x1] }
  0xd6   : > { %v2388_v23 = vld [vmem:[%s2877_s6 + $0x17a] sm:$0x1]  ;;  %v2390_v24 = vld [vmem:[%s2877_s6 + $0x17c] sm:$0x1]  ;;  %1124 = vst.msk [vmem:[#allocation2 + $0xa8] sm:$0x1] %vm738_vm0, %v2378_v22 }
  0xd7   : > { %1134 = vst.msk [vmem:[#allocation2 + $0xb2] sm:$0x1] %vm738_vm0, %v2388_v23  ;;  %1136 = vst.msk [vmem:[#allocation2 + $0xb4] sm:$0x1] %vm738_vm0, %v2390_v24  ;;  %v2391_v25 = vld [vmem:[%s2877_s6 + $0x17d] sm:$0x1] }
  0xd8   : > { %v2392_v26 = vld [vmem:[%s2877_s6 + $0x17e] sm:$0x1]  ;;  %v2393_v27 = vld [vmem:[%s2877_s6 + $0x17f] sm:$0x1]  ;;  %1137 = vst.msk [vmem:[#allocation2 + $0xb5] sm:$0x1] %vm738_vm0, %v2391_v25 }
  0xd9   : > { %1138 = vst.msk [vmem:[#allocation2 + $0xb6] sm:$0x1] %vm738_vm0, %v2392_v26  ;;  %1139 = vst.msk [vmem:[#allocation2 + $0xb7] sm:$0x1] %vm738_vm0, %v2393_v27  ;;  %v2394_v28 = vld [vmem:[%s2877_s6 + $0x180] sm:$0x1] }
  0xda   : > { %v2395_v29 = vld [vmem:[%s2877_s6 + $0x181] sm:$0x1]  ;;  %v2396_v30 = vld [vmem:[%s2877_s6 + $0x182] sm:$0x1]  ;;  %1140 = vst.msk [vmem:[#allocation2 + $0xb8] sm:$0x1] %vm738_vm0, %v2394_v28 }
  0xdb   : > { %1141 = vst.msk [vmem:[#allocation2 + $0xb9] sm:$0x1] %vm738_vm0, %v2395_v29  ;;  %1142 = vst.msk [vmem:[#allocation2 + $0xba] sm:$0x1] %vm738_vm0, %v2396_v30  ;;  %v2397_v31 = vld [vmem:[%s2877_s6 + $0x183] sm:$0x1] }
  0xdc   : > { %v1156_v32 = vld [vmem:[%s2884_s17] sm:$0x1]  ;;  %v1157_v33 = vld [vmem:[%s2884_s17 + $0x1] sm:$0x1]  ;;  %1143 = vst.msk [vmem:[#allocation2 + $0xbb] sm:$0x1] %vm738_vm0, %v2397_v31 }
  0xdd   : > { %1357 = vst.msk [vmem:[#allocation2 + $0xc8] sm:$0x1] %vm738_vm0, %v1156_v32  ;;  %1358 = vst.msk [vmem:[#allocation2 + $0xc9] sm:$0x1] %vm738_vm0, %v1157_v33  ;;  %v1158_v34 = vld [vmem:[%s2884_s17 + $0x2] sm:$0x1] }
  0xde   : > { %v1159_v35 = vld [vmem:[%s2884_s17 + $0x3] sm:$0x1]  ;;  %v1160_v36 = vld [vmem:[%s2884_s17 + $0x4] sm:$0x1]  ;;  %1359 = vst.msk [vmem:[#allocation2 + $0xca] sm:$0x1] %vm738_vm0, %v1158_v34 }
  0xdf   : > { %1360 = vst.msk [vmem:[#allocation2 + $0xcb] sm:$0x1] %vm738_vm0, %v1159_v35  ;;  %1361 = vst.msk [vmem:[#allocation2 + $0xcc] sm:$0x1] %vm738_vm0, %v1160_v36  ;;  %v1161_v37 = vld [vmem:[%s2884_s17 + $0x5] sm:$0x1] }
  0xe0   : > { %v1162_v38 = vld [vmem:[%s2884_s17 + $0x6] sm:$0x1]  ;;  %v1163_v39 = vld [vmem:[%s2884_s17 + $0x7] sm:$0x1]  ;;  %1362 = vst.msk [vmem:[#allocation2 + $0xcd] sm:$0x1] %vm738_vm0, %v1161_v37 }
  0xe1   : > { %1363 = vst.msk [vmem:[#allocation2 + $0xce] sm:$0x1] %vm738_vm0, %v1162_v38  ;;  %1364 = vst.msk [vmem:[#allocation2 + $0xcf] sm:$0x1] %vm738_vm0, %v1163_v39  ;;  %v1164_v40 = vld [vmem:[%s2884_s17 + $0x8] sm:$0x1] }
  0xe2   : > { %v1166_v41 = vld [vmem:[%s2884_s17 + $0xa] sm:$0x1]  ;;  %v1167_v42 = vld [vmem:[%s2884_s17 + $0xb] sm:$0x1]  ;;  %1365 = vst.msk [vmem:[#allocation2 + $0xd0] sm:$0x1] %vm738_vm0, %v1164_v40 }
  0xe3   : > { %1367 = vst.msk [vmem:[#allocation2 + $0xd2] sm:$0x1] %vm738_vm0, %v1166_v41  ;;  %1368 = vst.msk [vmem:[#allocation2 + $0xd3] sm:$0x1] %vm738_vm0, %v1167_v42  ;;  %v1168_v43 = vld [vmem:[%s2884_s17 + $0xc] sm:$0x1] }
  0xe4   : > { %v1169_v44 = vld [vmem:[%s2884_s17 + $0xd] sm:$0x1]  ;;  %v1170_v45 = vld [vmem:[%s2884_s17 + $0xe] sm:$0x1]  ;;  %1369 = vst.msk [vmem:[#allocation2 + $0xd4] sm:$0x1] %vm738_vm0, %v1168_v43 }
  0xe5   : > { %1370 = vst.msk [vmem:[#allocation2 + $0xd5] sm:$0x1] %vm738_vm0, %v1169_v44  ;;  %1371 = vst.msk [vmem:[#allocation2 + $0xd6] sm:$0x1] %vm738_vm0, %v1170_v45  ;;  %v1171_v46 = vld [vmem:[%s2884_s17 + $0xf] sm:$0x1] }
  0xe6   : > { %v1172_v47 = vld [vmem:[%s2884_s17 + $0x10] sm:$0x1]  ;;  %v1173_v48 = vld [vmem:[%s2884_s17 + $0x11] sm:$0x1]  ;;  %1372 = vst.msk [vmem:[#allocation2 + $0xd7] sm:$0x1] %vm738_vm0, %v1171_v46 }
  0xe7   : > { %1373 = vst.msk [vmem:[#allocation2 + $0xd8] sm:$0x1] %vm738_vm0, %v1172_v47  ;;  %1374 = vst.msk [vmem:[#allocation2 + $0xd9] sm:$0x1] %vm738_vm0, %v1173_v48  ;;  %v1174_v49 = vld [vmem:[%s2884_s17 + $0x12] sm:$0x1] }
  0xe8   : > { %v1176_v50 = vld [vmem:[%s2884_s17 + $0x14] sm:$0x1]  ;;  %v1177_v51 = vld [vmem:[%s2884_s17 + $0x15] sm:$0x1]  ;;  %1375 = vst.msk [vmem:[#allocation2 + $0xda] sm:$0x1] %vm738_vm0, %v1174_v49 }
  0xe9   : > { %1377 = vst.msk [vmem:[#allocation2 + $0xdc] sm:$0x1] %vm738_vm0, %v1176_v50  ;;  %1378 = vst.msk [vmem:[#allocation2 + $0xdd] sm:$0x1] %vm738_vm0, %v1177_v51  ;;  %v1178_v52 = vld [vmem:[%s2884_s17 + $0x16] sm:$0x1] }
  0xea   : > { %v1179_v53 = vld [vmem:[%s2884_s17 + $0x17] sm:$0x1]  ;;  %v1180_v54 = vld [vmem:[%s2884_s17 + $0x18] sm:$0x1]  ;;  %1379 = vst.msk [vmem:[#allocation2 + $0xde] sm:$0x1] %vm738_vm0, %v1178_v52 }
  0xeb   : > { %1380 = vst.msk [vmem:[#allocation2 + $0xdf] sm:$0x1] %vm738_vm0, %v1179_v53  ;;  %1381 = vst.msk [vmem:[#allocation2 + $0xe0] sm:$0x1] %vm738_vm0, %v1180_v54  ;;  %v1181_v55 = vld [vmem:[%s2884_s17 + $0x19] sm:$0x1] }
  0xec   : > { %v1182_v56 = vld [vmem:[%s2884_s17 + $0x1a] sm:$0x1]  ;;  %v1183_v57 = vld [vmem:[%s2884_s17 + $0x1b] sm:$0x1]  ;;  %1382 = vst.msk [vmem:[#allocation2 + $0xe1] sm:$0x1] %vm738_vm0, %v1181_v55 }
  0xed   : > { %1383 = vst.msk [vmem:[#allocation2 + $0xe2] sm:$0x1] %vm738_vm0, %v1182_v56  ;;  %1384 = vst.msk [vmem:[#allocation2 + $0xe3] sm:$0x1] %vm738_vm0, %v1183_v57  ;;  %v1184_v58 = vld [vmem:[%s2884_s17 + $0x1c] sm:$0x1] }
  0xee   : > { %v1186_v59 = vld [vmem:[%s2884_s17 + $0x1e] sm:$0x1]  ;;  %v1187_v60 = vld [vmem:[%s2884_s17 + $0x1f] sm:$0x1]  ;;  %1385 = vst.msk [vmem:[#allocation2 + $0xe4] sm:$0x1] %vm738_vm0, %v1184_v58 }
  0xef   : > { %1387 = vst.msk [vmem:[#allocation2 + $0xe6] sm:$0x1] %vm738_vm0, %v1186_v59  ;;  %1388 = vst.msk [vmem:[#allocation2 + $0xe7] sm:$0x1] %vm738_vm0, %v1187_v60  ;;  %v1188_v61 = vld [vmem:[%s2884_s17 + $0x20] sm:$0x1] }
  0xf0   : > { %v1189_v62 = vld [vmem:[%s2884_s17 + $0x21] sm:$0x1]  ;;  %v1190_v63 = vld [vmem:[%s2884_s17 + $0x22] sm:$0x1]  ;;  %1389 = vst.msk [vmem:[#allocation2 + $0xe8] sm:$0x1] %vm738_vm0, %v1188_v61 }
  0xf1   : > { %1390 = vst.msk [vmem:[#allocation2 + $0xe9] sm:$0x1] %vm738_vm0, %v1189_v62  ;;  %1391 = vst.msk [vmem:[#allocation2 + $0xea] sm:$0x1] %vm738_vm0, %v1190_v63  ;;  %v1191_v0 = vld [vmem:[%s2884_s17 + $0x23] sm:$0x1] }
  0xf2   : > { %v1192_v1 = vld [vmem:[%s2884_s17 + $0x24] sm:$0x1]  ;;  %v1193_v2 = vld [vmem:[%s2884_s17 + $0x25] sm:$0x1]  ;;  %1392 = vst.msk [vmem:[#allocation2 + $0xeb] sm:$0x1] %vm738_vm0, %v1191_v0 }
  0xf3   : > { %1393 = vst.msk [vmem:[#allocation2 + $0xec] sm:$0x1] %vm738_vm0, %v1192_v1  ;;  %1394 = vst.msk [vmem:[#allocation2 + $0xed] sm:$0x1] %vm738_vm0, %v1193_v2  ;;  %v1194_v3 = vld [vmem:[%s2884_s17 + $0x26] sm:$0x1] }
  0xf4   : > { %v1196_v4 = vld [vmem:[%s2884_s17 + $0x28] sm:$0x1]  ;;  %v1197_v5 = vld [vmem:[%s2884_s17 + $0x29] sm:$0x1]  ;;  %1395 = vst.msk [vmem:[#allocation2 + $0xee] sm:$0x1] %vm738_vm0, %v1194_v3 }
  0xf5   : > { %1397 = vst.msk [vmem:[#allocation2 + $0xf0] sm:$0x1] %vm738_vm0, %v1196_v4  ;;  %1398 = vst.msk [vmem:[#allocation2 + $0xf1] sm:$0x1] %vm738_vm0, %v1197_v5  ;;  %v1198_v6 = vld [vmem:[%s2884_s17 + $0x2a] sm:$0x1] }
  0xf6   : > { %v1199_v7 = vld [vmem:[%s2884_s17 + $0x2b] sm:$0x1]  ;;  %v1200_v8 = vld [vmem:[%s2884_s17 + $0x2c] sm:$0x1]  ;;  %1399 = vst.msk [vmem:[#allocation2 + $0xf2] sm:$0x1] %vm738_vm0, %v1198_v6 }
  0xf7   : > { %1400 = vst.msk [vmem:[#allocation2 + $0xf3] sm:$0x1] %vm738_vm0, %v1199_v7  ;;  %1401 = vst.msk [vmem:[#allocation2 + $0xf4] sm:$0x1] %vm738_vm0, %v1200_v8  ;;  %v1201_v9 = vld [vmem:[%s2884_s17 + $0x2d] sm:$0x1] }
  0xf8   : > { %v1202_v10 = vld [vmem:[%s2884_s17 + $0x2e] sm:$0x1]  ;;  %v1203_v11 = vld [vmem:[%s2884_s17 + $0x2f] sm:$0x1]  ;;  %1402 = vst.msk [vmem:[#allocation2 + $0xf5] sm:$0x1] %vm738_vm0, %v1201_v9 }
  0xf9   : > { %1403 = vst.msk [vmem:[#allocation2 + $0xf6] sm:$0x1] %vm738_vm0, %v1202_v10  ;;  %1404 = vst.msk [vmem:[#allocation2 + $0xf7] sm:$0x1] %vm738_vm0, %v1203_v11  ;;  %v1204_v12 = vld [vmem:[%s2884_s17 + $0x30] sm:$0x1] }
  0xfa   : > { %v1206_v13 = vld [vmem:[%s2884_s17 + $0x32] sm:$0x1]  ;;  %v1207_v14 = vld [vmem:[%s2884_s17 + $0x33] sm:$0x1]  ;;  %1405 = vst.msk [vmem:[#allocation2 + $0xf8] sm:$0x1] %vm738_vm0, %v1204_v12 }
  0xfb   : > { %1407 = vst.msk [vmem:[#allocation2 + $0xfa] sm:$0x1] %vm738_vm0, %v1206_v13  ;;  %1408 = vst.msk [vmem:[#allocation2 + $0xfb] sm:$0x1] %vm738_vm0, %v1207_v14  ;;  %v1208_v15 = vld [vmem:[%s2884_s17 + $0x34] sm:$0x1] }
  0xfc   : > { %v1209_v16 = vld [vmem:[%s2884_s17 + $0x35] sm:$0x1]  ;;  %v1210_v17 = vld [vmem:[%s2884_s17 + $0x36] sm:$0x1]  ;;  %1409 = vst.msk [vmem:[#allocation2 + $0xfc] sm:$0x1] %vm738_vm0, %v1208_v15 }
  0xfd   : > { %1410 = vst.msk [vmem:[#allocation2 + $0xfd] sm:$0x1] %vm738_vm0, %v1209_v16  ;;  %1411 = vst.msk [vmem:[#allocation2 + $0xfe] sm:$0x1] %vm738_vm0, %v1210_v17  ;;  %v1211_v18 = vld [vmem:[%s2884_s17 + $0x37] sm:$0x1] }
  0xfe   : > { %v1212_v19 = vld [vmem:[%s2884_s17 + $0x38] sm:$0x1]  ;;  %v1213_v20 = vld [vmem:[%s2884_s17 + $0x39] sm:$0x1]  ;;  %1412 = vst.msk [vmem:[#allocation2 + $0xff] sm:$0x1] %vm738_vm0, %v1211_v18 }
  0xff   : > { %1413 = vst.msk [vmem:[#allocation2 + $0x100] sm:$0x1] %vm738_vm0, %v1212_v19  ;;  %1414 = vst.msk [vmem:[#allocation2 + $0x101] sm:$0x1] %vm738_vm0, %v1213_v20  ;;  %v1214_v21 = vld [vmem:[%s2884_s17 + $0x3a] sm:$0x1] }
 0x100   : > { %v1216_v22 = vld [vmem:[%s2884_s17 + $0x3c] sm:$0x1]  ;;  %v1217_v23 = vld [vmem:[%s2884_s17 + $0x3d] sm:$0x1]  ;;  %1415 = vst.msk [vmem:[#allocation2 + $0x102] sm:$0x1] %vm738_vm0, %v1214_v21 }
 0x101   : > { %1417 = vst.msk [vmem:[#allocation2 + $0x104] sm:$0x1] %vm738_vm0, %v1216_v22  ;;  %1418 = vst.msk [vmem:[#allocation2 + $0x105] sm:$0x1] %vm738_vm0, %v1217_v23  ;;  %v1218_v24 = vld [vmem:[%s2884_s17 + $0x3e] sm:$0x1] }
 0x102   : > { %v1219_v25 = vld [vmem:[%s2884_s17 + $0x3f] sm:$0x1]  ;;  %v1220_v26 = vld [vmem:[%s2884_s17 + $0x40] sm:$0x1]  ;;  %1419 = vst.msk [vmem:[#allocation2 + $0x106] sm:$0x1] %vm738_vm0, %v1218_v24 }
 0x103   : > { %1420 = vst.msk [vmem:[#allocation2 + $0x107] sm:$0x1] %vm738_vm0, %v1219_v25  ;;  %1421 = vst.msk [vmem:[#allocation2 + $0x108] sm:$0x1] %vm738_vm0, %v1220_v26  ;;  %v1221_v27 = vld [vmem:[%s2884_s17 + $0x41] sm:$0x1] }
 0x104   : > { %v1222_v28 = vld [vmem:[%s2884_s17 + $0x42] sm:$0x1]  ;;  %v1223_v29 = vld [vmem:[%s2884_s17 + $0x43] sm:$0x1]  ;;  %1422 = vst.msk [vmem:[#allocation2 + $0x109] sm:$0x1] %vm738_vm0, %v1221_v27 }
 0x105   : > { %1423 = vst.msk [vmem:[#allocation2 + $0x10a] sm:$0x1] %vm738_vm0, %v1222_v28  ;;  %1424 = vst.msk [vmem:[#allocation2 + $0x10b] sm:$0x1] %vm738_vm0, %v1223_v29  ;;  %v1226_v30 = vld [vmem:[%s2884_s17 + $0x46] sm:$0x1] }
 0x106   : > { %v1227_v31 = vld [vmem:[%s2884_s17 + $0x47] sm:$0x1]  ;;  %v1228_v32 = vld [vmem:[%s2884_s17 + $0x48] sm:$0x1]  ;;  %1427 = vst.msk [vmem:[#allocation2 + $0x10e] sm:$0x1] %vm738_vm0, %v1226_v30 }
 0x107   : > { %1428 = vst.msk [vmem:[#allocation2 + $0x10f] sm:$0x1] %vm738_vm0, %v1227_v31  ;;  %1429 = vst.msk [vmem:[#allocation2 + $0x110] sm:$0x1] %vm738_vm0, %v1228_v32  ;;  %v1229_v33 = vld [vmem:[%s2884_s17 + $0x49] sm:$0x1] }
 0x108   : > { %v1230_v34 = vld [vmem:[%s2884_s17 + $0x4a] sm:$0x1]  ;;  %v1231_v35 = vld [vmem:[%s2884_s17 + $0x4b] sm:$0x1]  ;;  %1430 = vst.msk [vmem:[#allocation2 + $0x111] sm:$0x1] %vm738_vm0, %v1229_v33 }
 0x109   : > { %1431 = vst.msk [vmem:[#allocation2 + $0x112] sm:$0x1] %vm738_vm0, %v1230_v34  ;;  %1432 = vst.msk [vmem:[#allocation2 + $0x113] sm:$0x1] %vm738_vm0, %v1231_v35  ;;  %v1232_v36 = vld [vmem:[%s2884_s17 + $0x4c] sm:$0x1] }
 0x10a   : > { %v1233_v37 = vld [vmem:[%s2884_s17 + $0x4d] sm:$0x1]  ;;  %v2298_v38 = vld [vmem:[%s2877_s6 + $0x120] sm:$0x1]  ;;  %1433 = vst.msk [vmem:[#allocation2 + $0x114] sm:$0x1] %vm738_vm0, %v1232_v36 }
 0x10b   : > { %1434 = vst.msk [vmem:[#allocation2 + $0x115] sm:$0x1] %vm738_vm0, %v1233_v37  ;;  %1044 = vst.msk [vmem:[#allocation2 + $0x58] sm:$0x1] %vm738_vm0, %v2298_v38  ;;  %v2398_v39 = vld [vmem:[%s2877_s6 + $0x184] sm:$0x1] }
 0x10c   : > { %v1224_v40 = vld [vmem:[%s2884_s17 + $0x44] sm:$0x1]  ;;  %v1234_v41 = vld [vmem:[%s2884_s17 + $0x4e] sm:$0x1]  ;;  %1144 = vst.msk [vmem:[#allocation2 + $0xbc] sm:$0x1] %vm738_vm0, %v2398_v39 }
 0x10d   : > { %1425 = vst.msk [vmem:[#allocation2 + $0x10c] sm:$0x1] %vm738_vm0, %v1224_v40  ;;  %1435 = vst.msk [vmem:[#allocation2 + $0x116] sm:$0x1] %vm738_vm0, %v1234_v41  ;;  %v1236_v42 = vld [vmem:[%s2884_s17 + $0x50] sm:$0x1] }
 0x10e   : > { %v1237_v43 = vld [vmem:[%s2884_s17 + $0x51] sm:$0x1]  ;;  %v1238_v44 = vld [vmem:[%s2884_s17 + $0x52] sm:$0x1]  ;;  %1437 = vst.msk [vmem:[#allocation2 + $0x118] sm:$0x1] %vm738_vm0, %v1236_v42 }
 0x10f   : > { %1438 = vst.msk [vmem:[#allocation2 + $0x119] sm:$0x1] %vm738_vm0, %v1237_v43  ;;  %1439 = vst.msk [vmem:[#allocation2 + $0x11a] sm:$0x1] %vm738_vm0, %v1238_v44  ;;  %v1239_v45 = vld [vmem:[%s2884_s17 + $0x53] sm:$0x1] }
 0x110   : > { %v1240_v46 = vld [vmem:[%s2884_s17 + $0x54] sm:$0x1]  ;;  %v1241_v47 = vld [vmem:[%s2884_s17 + $0x55] sm:$0x1]  ;;  %1440 = vst.msk [vmem:[#allocation2 + $0x11b] sm:$0x1] %vm738_vm0, %v1239_v45 }
 0x111   : > { %1441 = vst.msk [vmem:[#allocation2 + $0x11c] sm:$0x1] %vm738_vm0, %v1240_v46  ;;  %1442 = vst.msk [vmem:[#allocation2 + $0x11d] sm:$0x1] %vm738_vm0, %v1241_v47  ;;  %v1242_v48 = vld [vmem:[%s2884_s17 + $0x56] sm:$0x1] }
 0x112   : > { %v1243_v49 = vld [vmem:[%s2884_s17 + $0x57] sm:$0x1]  ;;  %v1244_v50 = vld [vmem:[%s2884_s17 + $0x58] sm:$0x1]  ;;  %1443 = vst.msk [vmem:[#allocation2 + $0x11e] sm:$0x1] %vm738_vm0, %v1242_v48 }
 0x113   : > { %1444 = vst.msk [vmem:[#allocation2 + $0x11f] sm:$0x1] %vm738_vm0, %v1243_v49  ;;  %1445 = vst.msk [vmem:[#allocation2 + $0x120] sm:$0x1] %vm738_vm0, %v1244_v50  ;;  %v229_v51 = vld [vmem:[%s2877_s6] sm:$0x1] }
 0x114   : > { %v230_v52 = vld [vmem:[%s2877_s6 + $0x1] sm:$0x1]  ;;  %v231_v53 = vld [vmem:[%s2877_s6 + $0x2] sm:$0x1]  ;;  %v238_v54 = vld [vmem:[%s2877_s6 + $0xa] sm:$0x1] }
 0x115   : > { %v239_v55 = vld [vmem:[%s2877_s6 + $0xb] sm:$0x1]  ;;  %v240_v56 = vld [vmem:[%s2877_s6 + $0xc] sm:$0x1]  ;;  %v247_v57 = vld [vmem:[%s2877_s6 + $0x14] sm:$0x1] }
 0x116   : > { %v248_v58 = vld [vmem:[%s2877_s6 + $0x15] sm:$0x1]  ;;  %v249_v59 = vld [vmem:[%s2877_s6 + $0x16] sm:$0x1]  ;;  %v310_v60 = vld [vmem:[%s2877_s6 + $0x64] sm:$0x1] }
 0x117   : > { %v311_v61 = vld [vmem:[%s2877_s6 + $0x65] sm:$0x1]  ;;  %v312_v62 = vld [vmem:[%s2877_s6 + $0x66] sm:$0x1]  ;;  %v319_v63 = vld [vmem:[%s2877_s6 + $0x6e] sm:$0x1]  ;;  %v472_v2 = vmax.f32 %v229_v51, %v310_v60 }
 0x118   : > { %v320_v0 = vld [vmem:[%s2877_s6 + $0x6f] sm:$0x1]  ;;  %v321_v1 = vld [vmem:[%s2877_s6 + $0x70] sm:$0x1]  ;;  %v473_v3 = vmax.f32 %v230_v52, %v311_v61  ;;  %v474_v4 = vmax.f32 %v231_v53, %v312_v62  ;;  %v328_v5 = vld [vmem:[%s2877_s6 + $0x78] sm:$0x1]  ;;  %v481_v8 = vmax.f32 %v238_v54, %v319_v63 }
 0x119   : > { %v329_v6 = vld [vmem:[%s2877_s6 + $0x79] sm:$0x1]  ;;  %v330_v7 = vld [vmem:[%s2877_s6 + $0x7a] sm:$0x1]  ;;  %v482_v9 = vmax.f32 %v239_v55, %v320_v0  ;;  %v483_v10 = vmax.f32 %v240_v56, %v321_v1  ;;  %v391_v11 = vld [vmem:[%s2877_s6 + $0xc8] sm:$0x1]  ;;  %v490_v14 = vmax.f32 %v247_v57, %v328_v5 }
 0x11a   : > { %v392_v12 = vld [vmem:[%s2877_s6 + $0xc9] sm:$0x1]  ;;  %v393_v13 = vld [vmem:[%s2877_s6 + $0xca] sm:$0x1]  ;;  %v491_v15 = vmax.f32 %v248_v58, %v329_v6  ;;  %v400_v16 = vld [vmem:[%s2877_s6 + $0xd2] sm:$0x1]  ;;  %v553_v19 = vmax.f32 %v472_v2, %v391_v11  ;;  %v492_v25 = vmax.f32 %v249_v59, %v330_v7 }
 0x11b   : > { %v401_v17 = vld [vmem:[%s2877_s6 + $0xd3] sm:$0x1]  ;;  %v402_v18 = vld [vmem:[%s2877_s6 + $0xd4] sm:$0x1]  ;;  %v554_v20 = vmax.f32 %v473_v3, %v392_v12  ;;  %v555_v21 = vmax.f32 %v474_v4, %v393_v13  ;;  %v409_v22 = vld [vmem:[%s2877_s6 + $0xdc] sm:$0x1]  ;;  %v562_v26 = vmax.f32 %v481_v8, %v400_v16 }
 0x11c   : > { %v410_v23 = vld [vmem:[%s2877_s6 + $0xdd] sm:$0x1]  ;;  %v411_v24 = vld [vmem:[%s2877_s6 + $0xde] sm:$0x1]  ;;  %v563_v27 = vmax.f32 %v482_v9, %v401_v17  ;;  %v564_v28 = vmax.f32 %v483_v10, %v402_v18  ;;  %v3404_v29 = vmax.f32 %v490_v14, %v409_v22  ;;  %v232_v30 = vld [vmem:[%s2877_s6 + $0x3] sm:$0x1] }
 0x11d   : > { %v233_v31 = vld [vmem:[%s2877_s6 + $0x4] sm:$0x1]  ;;  %v241_v32 = vld [vmem:[%s2877_s6 + $0xd] sm:$0x1]  ;;  %v3409_v33 = vmax.f32 %v491_v15, %v410_v23  ;;  %v634_v34 = vmax.f32 %v553_v19, %v562_v26  ;;  %v242_v37 = vld [vmem:[%s2877_s6 + $0xe] sm:$0x1]  ;;  %v3417_v43 = vmax.f32 %v492_v25, %v411_v24 }
 0x11e   : > { %v635_v35 = vmax.f32 %v554_v20, %v563_v27  ;;  %v636_v36 = vmax.f32 %v555_v21, %v564_v28  ;;  %v250_v38 = vld [vmem:[%s2877_s6 + $0x17] sm:$0x1]  ;;  %v251_v39 = vld [vmem:[%s2877_s6 + $0x18] sm:$0x1]  ;;  %v313_v40 = vld [vmem:[%s2877_s6 + $0x67] sm:$0x1] }
 0x11f   : > { %v314_v41 = vld [vmem:[%s2877_s6 + $0x68] sm:$0x1]  ;;  %v322_v42 = vld [vmem:[%s2877_s6 + $0x71] sm:$0x1]  ;;  %v670_v44 = vmax.f32 %v634_v34, %v3404_v29  ;;  %v323_v46 = vld [vmem:[%s2877_s6 + $0x72] sm:$0x1]  ;;  %v475_v49 = vmax.f32 %v232_v30, %v313_v40 }
 0x120   : > { %v671_v45 = vmax.f32 %v635_v35, %v3409_v33  ;;  %v331_v47 = vld [vmem:[%s2877_s6 + $0x7b] sm:$0x1]  ;;  %v332_v48 = vld [vmem:[%s2877_s6 + $0x7c] sm:$0x1]  ;;  %v394_v50 = vld [vmem:[%s2877_s6 + $0xcb] sm:$0x1]  ;;  %v476_v53 = vmax.f32 %v233_v31, %v314_v41  ;;  %v484_v54 = vmax.f32 %v241_v32, %v322_v42  ;;  %v485_v55 = vmax.f32 %v242_v37, %v323_v46 }
 0x121   : > { %v395_v51 = vld [vmem:[%s2877_s6 + $0xcc] sm:$0x1]  ;;  %v403_v52 = vld [vmem:[%s2877_s6 + $0xd5] sm:$0x1]  ;;  %v493_v56 = vmax.f32 %v250_v38, %v331_v47  ;;  %v672_v57 = vmax.f32 %v636_v36, %v3417_v43  ;;  %v404_v59 = vld [vmem:[%s2877_s6 + $0xd6] sm:$0x1]  ;;  %v556_v62 = vmax.f32 %v475_v49, %v394_v50  ;;  %v494_v63 = vmax.f32 %v251_v39, %v332_v48 }
 0x122   : > { %v706_v58 = vmax.f32 %v670_v44, %v671_v45  ;;  %v412_v60 = vld [vmem:[%s2877_s6 + $0xdf] sm:$0x1]  ;;  %v413_v61 = vld [vmem:[%s2877_s6 + $0xe0] sm:$0x1]  ;;  %v557_v0 = vmax.f32 %v476_v53, %v395_v51  ;;  %v565_v1 = vmax.f32 %v484_v54, %v403_v52  ;;  %v566_v2 = vmax.f32 %v485_v55, %v404_v59  ;;  %v234_v3 = vld [vmem:[%s2877_s6 + $0x5] sm:$0x1] }
 0x123   : > { %v235_v4 = vld [vmem:[%s2877_s6 + $0x6] sm:$0x1]  ;;  %v243_v5 = vld [vmem:[%s2877_s6 + $0xf] sm:$0x1]  ;;  %v244_v7 = vld [vmem:[%s2877_s6 + $0x10] sm:$0x1]  ;;  %v3437_v10 = vmax.f32 %v493_v56, %v412_v60  ;;  %v3451_v22 = vmax.f32 %v494_v63, %v413_v61 }
 0x124   : > { %v722_v6 = vmax.f32 %v706_v58, %v672_v57  ;;  %v252_v8 = vld [vmem:[%s2877_s6 + $0x19] sm:$0x1]  ;;  %v253_v9 = vld [vmem:[%s2877_s6 + $0x1a] sm:$0x1]  ;;  %v637_v11 = vmax.f32 %v556_v62, %v565_v1  ;;  %v638_v12 = vmax.f32 %v557_v0, %v566_v2  ;;  %v315_v13 = vld [vmem:[%s2877_s6 + $0x69] sm:$0x1] }
 0x125   : > { %v316_v14 = vld [vmem:[%s2877_s6 + $0x6a] sm:$0x1]  ;;  %v324_v15 = vld [vmem:[%s2877_s6 + $0x73] sm:$0x1]  ;;  %s3444_s30 = scalar_lea.vmem [#allocation8], %s2209_s23  ;;  %v477_v19 = vmax.f32 %v234_v3, %v315_v13  ;;  %s2084_s22 = scalar_lea.sflag [#allocation5], %s2873_s20 }
 0x126   : > { %739 = vst.msk [vmem:[%s3444_s30] sm:$0x1] %vm738_vm0, %v722_v6  ;;  %v325_v16 = vld [vmem:[%s2877_s6 + $0x74] sm:$0x1]  ;;  %v333_v17 = vld [vmem:[%s2877_s6 + $0x7d] sm:$0x1]  ;;  %v478_v20 = vmax.f32 %v235_v4, %v316_v14  ;;  %v486_v21 = vmax.f32 %v243_v5, %v324_v15  ;;  %v673_v23 = vmax.f32 %v637_v11, %v3437_v10  ;;  %v674_v38 = vmax.f32 %v638_v12, %v3451_v22 }
 0x127   : > { %v334_v18 = vld [vmem:[%s2877_s6 + $0x7e] sm:$0x1]  ;;  %v396_v24 = vld [vmem:[%s2877_s6 + $0xcd] sm:$0x1]  ;;  %v397_v25 = vld [vmem:[%s2877_s6 + $0xce] sm:$0x1]  ;;  %v487_v27 = vmax.f32 %v244_v7, %v325_v16  ;;  %v495_v28 = vmax.f32 %v252_v8, %v333_v17 }
 0x128   : > { %v405_v26 = vld [vmem:[%s2877_s6 + $0xd7] sm:$0x1]  ;;  %v406_v30 = vld [vmem:[%s2877_s6 + $0xd8] sm:$0x1]  ;;  %v414_v31 = vld [vmem:[%s2877_s6 + $0xe1] sm:$0x1]  ;;  %v496_v34 = vmax.f32 %v253_v9, %v334_v18  ;;  %v558_v35 = vmax.f32 %v477_v19, %v396_v24  ;;  %v559_v36 = vmax.f32 %v478_v20, %v397_v25  ;;  %v707_v39 = vmax.f32 %v672_v57, %v673_v23 }
 0x129   : > { %v415_v32 = vld [vmem:[%s2877_s6 + $0xe2] sm:$0x1]  ;;  %v567_v37 = vmax.f32 %v486_v21, %v405_v26  ;;  %v568_v40 = vmax.f32 %v487_v27, %v406_v30  ;;  %v236_v41 = vld [vmem:[%s2877_s6 + $0x7] sm:$0x1]  ;;  %v237_v42 = vld [vmem:[%s2877_s6 + $0x8] sm:$0x1]  ;;  %v3464_v45 = vmax.f32 %v495_v28, %v414_v31 }
 0x12a   : > { %v245_v44 = vld [vmem:[%s2877_s6 + $0x11] sm:$0x1]  ;;  %v246_v47 = vld [vmem:[%s2877_s6 + $0x12] sm:$0x1]  ;;  %v254_v48 = vld [vmem:[%s2877_s6 + $0x1b] sm:$0x1]  ;;  %v723_v50 = vmax.f32 %v707_v39, %v674_v38  ;;  %v3469_v51 = vmax.f32 %v496_v34, %v415_v32 }
 0x12b   : > { %v639_v46 = vmax.f32 %v558_v35, %v567_v37  ;;  %v255_v49 = vld [vmem:[%s2877_s6 + $0x1c] sm:$0x1]  ;;  %v640_v52 = vmax.f32 %v559_v36, %v568_v40  ;;  %v317_v53 = vld [vmem:[%s2877_s6 + $0x6b] sm:$0x1]  ;;  %v318_v54 = vld [vmem:[%s2877_s6 + $0x6c] sm:$0x1] }
 0x12c   : > { %v326_v55 = vld [vmem:[%s2877_s6 + $0x75] sm:$0x1]  ;;  %v327_v57 = vld [vmem:[%s2877_s6 + $0x76] sm:$0x1]  ;;  %v335_v58 = vld [vmem:[%s2877_s6 + $0x7f] sm:$0x1]  ;;  %v479_v60 = vmax.f32 %v236_v41, %v317_v53  ;;  %v480_v61 = vmax.f32 %v237_v42, %v318_v54 }
 0x12d   : > { %v675_v56 = vmax.f32 %v639_v46, %v3464_v45  ;;  %v336_v59 = vld [vmem:[%s2877_s6 + $0x80] sm:$0x1]  ;;  %v488_v62 = vmax.f32 %v245_v44, %v326_v55  ;;  %740 = vst.msk [vmem:[%s3444_s30 + $0x1] sm:$0x1] %vm738_vm0, %v723_v50  ;;  %v676_v63 = vmax.f32 %v640_v52, %v3469_v51  ;;  %v398_v0 = vld [vmem:[%s2877_s6 + $0xcf] sm:$0x1]  ;;  %v489_v3 = vmax.f32 %v246_v47, %v327_v57 }
 0x12e   : > { %v399_v1 = vld [vmem:[%s2877_s6 + $0xd0] sm:$0x1]  ;;  %v407_v2 = vld [vmem:[%s2877_s6 + $0xd9] sm:$0x1]  ;;  %v497_v4 = vmax.f32 %v254_v48, %v335_v58  ;;  %v498_v5 = vmax.f32 %v255_v49, %v336_v59  ;;  %v408_v7 = vld [vmem:[%s2877_s6 + $0xda] sm:$0x1]  ;;  %v560_v11 = vmax.f32 %v479_v60, %v398_v0 }
 0x12f   : > { %v708_v6 = vmax.f32 %v674_v38, %v675_v56  ;;  %v416_v8 = vld [vmem:[%s2877_s6 + $0xe3] sm:$0x1]  ;;  %v417_v9 = vld [vmem:[%s2877_s6 + $0xe4] sm:$0x1]  ;;  %v561_v12 = vmax.f32 %v480_v61, %v399_v1  ;;  %v569_v13 = vmax.f32 %v488_v62, %v407_v2  ;;  %v570_v14 = vmax.f32 %v489_v3, %v408_v7  ;;  %v256_v15 = vld [vmem:[%s2877_s6 + $0x1e] sm:$0x1] }
 0x130   : > { %v257_v16 = vld [vmem:[%s2877_s6 + $0x1f] sm:$0x1]  ;;  %v258_v17 = vld [vmem:[%s2877_s6 + $0x20] sm:$0x1]  ;;  %v3490_v19 = vmax.f32 %v497_v4, %v416_v8  ;;  %v265_v21 = vld [vmem:[%s2877_s6 + $0x28] sm:$0x1]  ;;  %v3495_v25 = vmax.f32 %v498_v5, %v417_v9 }
 0x131   : > { %v724_v18 = vmax.f32 %v708_v6, %v676_v63  ;;  %v641_v20 = vmax.f32 %v560_v11, %v569_v13  ;;  %v266_v23 = vld [vmem:[%s2877_s6 + $0x29] sm:$0x1]  ;;  %v267_v24 = vld [vmem:[%s2877_s6 + $0x2a] sm:$0x1]  ;;  %v642_v26 = vmax.f32 %v561_v12, %v570_v14  ;;  %v337_v27 = vld [vmem:[%s2877_s6 + $0x82] sm:$0x1] }
 0x132   : > { %v338_v28 = vld [vmem:[%s2877_s6 + $0x83] sm:$0x1]  ;;  %v339_v30 = vld [vmem:[%s2877_s6 + $0x84] sm:$0x1]  ;;  %v346_v32 = vld [vmem:[%s2877_s6 + $0x8c] sm:$0x1]  ;;  %v499_v36 = vmax.f32 %v256_v15, %v337_v27 }
 0x133   : > { %741 = vst.msk [vmem:[%s3444_s30 + $0x2] sm:$0x1] %vm738_vm0, %v724_v18  ;;  %v677_v31 = vmax.f32 %v641_v20, %v3490_v19  ;;  %v347_v34 = vld [vmem:[%s2877_s6 + $0x8d] sm:$0x1]  ;;  %v348_v35 = vld [vmem:[%s2877_s6 + $0x8e] sm:$0x1]  ;;  %v500_v37 = vmax.f32 %v257_v16, %v338_v28  ;;  %v501_v38 = vmax.f32 %v258_v17, %v339_v30  ;;  %v678_v39 = vmax.f32 %v642_v26, %v3495_v25 }
 0x134   : > { %v418_v40 = vld [vmem:[%s2877_s6 + $0xe6] sm:$0x1]  ;;  %v419_v41 = vld [vmem:[%s2877_s6 + $0xe7] sm:$0x1]  ;;  %v420_v42 = vld [vmem:[%s2877_s6 + $0xe8] sm:$0x1]  ;;  %v508_v44 = vmax.f32 %v265_v21, %v346_v32  ;;  %v509_v46 = vmax.f32 %v266_v23, %v347_v34  ;;  %v510_v47 = vmax.f32 %v267_v24, %v348_v35 }
 0x135   : > { %v709_v48 = vmax.f32 %v676_v63, %v677_v31  ;;  %v427_v49 = vld [vmem:[%s2877_s6 + $0xf0] sm:$0x1]  ;;  %v428_v50 = vld [vmem:[%s2877_s6 + $0xf1] sm:$0x1]  ;;  %v429_v52 = vld [vmem:[%s2877_s6 + $0xf2] sm:$0x1]  ;;  %v580_v53 = vmax.f32 %v499_v36, %v418_v40  ;;  %v581_v54 = vmax.f32 %v500_v37, %v419_v41  ;;  %v582_v55 = vmax.f32 %v501_v38, %v420_v42 }
 0x136   : > { %v3513_v56 = vmax.f32 %v508_v44, %v427_v49  ;;  %v3515_v57 = vmax.f32 %v509_v46, %v428_v50  ;;  %v259_v58 = vld [vmem:[%s2877_s6 + $0x21] sm:$0x1]  ;;  %v260_v59 = vld [vmem:[%s2877_s6 + $0x22] sm:$0x1]  ;;  %v268_v60 = vld [vmem:[%s2877_s6 + $0x2b] sm:$0x1] }
 0x137   : > { %v725_v61 = vmax.f32 %v709_v48, %v678_v39  ;;  %v643_v62 = vmax.f32 %v3404_v29, %v580_v53  ;;  %v644_v63 = vmax.f32 %v3409_v33, %v581_v54  ;;  %v645_v0 = vmax.f32 %v3417_v43, %v582_v55  ;;  %v269_v1 = vld [vmem:[%s2877_s6 + $0x2c] sm:$0x1]  ;;  %v340_v2 = vld [vmem:[%s2877_s6 + $0x85] sm:$0x1]  ;;  %v341_v3 = vld [vmem:[%s2877_s6 + $0x86] sm:$0x1] }
 0x138   : > { %v349_v4 = vld [vmem:[%s2877_s6 + $0x8f] sm:$0x1]  ;;  %v350_v5 = vld [vmem:[%s2877_s6 + $0x90] sm:$0x1]  ;;  %v421_v6 = vld [vmem:[%s2877_s6 + $0xe9] sm:$0x1]  ;;  %v502_v7 = vmax.f32 %v259_v58, %v340_v2  ;;  %v503_v8 = vmax.f32 %v260_v59, %v341_v3  ;;  %v3531_v29 = vmax.f32 %v510_v47, %v429_v52 }
 0x139   : > { %742 = vst.msk [vmem:[%s3444_s30 + $0x3] sm:$0x1] %vm738_vm0, %v725_v61  ;;  %v679_v33 = vmax.f32 %v643_v62, %v3513_v56  ;;  %v680_v43 = vmax.f32 %v644_v63, %v3515_v57  ;;  %v422_v9 = vld [vmem:[%s2877_s6 + $0xea] sm:$0x1]  ;;  %v430_v11 = vld [vmem:[%s2877_s6 + $0xf3] sm:$0x1]  ;;  %v511_v13 = vmax.f32 %v268_v60, %v349_v4  ;;  %v512_v14 = vmax.f32 %v269_v1, %v350_v5 }
 0x13a   : > { %v431_v12 = vld [vmem:[%s2877_s6 + $0xf4] sm:$0x1]  ;;  %v583_v15 = vmax.f32 %v502_v7, %v421_v6  ;;  %v584_v16 = vmax.f32 %v503_v8, %v422_v9  ;;  %v261_v17 = vld [vmem:[%s2877_s6 + $0x23] sm:$0x1]  ;;  %v262_v18 = vld [vmem:[%s2877_s6 + $0x24] sm:$0x1]  ;;  %v681_v21 = vmax.f32 %v645_v0, %v3531_v29 }
 0x13b   : > { %v270_v20 = vld [vmem:[%s2877_s6 + $0x2d] sm:$0x1]  ;;  %v710_v23 = vmax.f32 %v679_v33, %v680_v43  ;;  %v3542_v24 = vmax.f32 %v511_v13, %v430_v11  ;;  %v271_v26 = vld [vmem:[%s2877_s6 + $0x2e] sm:$0x1]  ;;  %v342_v27 = vld [vmem:[%s2877_s6 + $0x87] sm:$0x1]  ;;  %v3547_v30 = vmax.f32 %v512_v14, %v431_v12 }
 0x13c   : > { %v343_v28 = vld [vmem:[%s2877_s6 + $0x88] sm:$0x1]  ;;  %v646_v31 = vmax.f32 %v3437_v10, %v583_v15  ;;  %v647_v32 = vmax.f32 %v3451_v22, %v584_v16  ;;  %v351_v34 = vld [vmem:[%s2877_s6 + $0x91] sm:$0x1]  ;;  %v352_v35 = vld [vmem:[%s2877_s6 + $0x92] sm:$0x1]  ;;  %v504_v37 = vmax.f32 %v261_v17, %v342_v27 }
 0x13d   : > { %v423_v36 = vld [vmem:[%s2877_s6 + $0xeb] sm:$0x1]  ;;  %v726_v38 = vmax.f32 %v710_v23, %v681_v21  ;;  %v424_v39 = vld [vmem:[%s2877_s6 + $0xec] sm:$0x1]  ;;  %v432_v40 = vld [vmem:[%s2877_s6 + $0xf5] sm:$0x1]  ;;  %v505_v42 = vmax.f32 %v262_v18, %v343_v28  ;;  %v513_v44 = vmax.f32 %v270_v20, %v351_v34  ;;  %v514_v10 = vmax.f32 %v271_v26, %v352_v35 }
 0x13e   : > { %v433_v41 = vld [vmem:[%s2877_s6 + $0xf6] sm:$0x1]  ;;  %v682_v22 = vmax.f32 %v646_v31, %v3542_v24  ;;  %v585_v46 = vmax.f32 %v504_v37, %v423_v36  ;;  %v263_v47 = vld [vmem:[%s2877_s6 + $0x25] sm:$0x1]  ;;  %v264_v48 = vld [vmem:[%s2877_s6 + $0x26] sm:$0x1]  ;;  %v683_v50 = vmax.f32 %v647_v32, %v3547_v30 }
 0x13f   : > { %v272_v49 = vld [vmem:[%s2877_s6 + $0x2f] sm:$0x1]  ;;  %743 = vst.msk [vmem:[%s3444_s30 + $0x4] sm:$0x1] %vm738_vm0, %v726_v38  ;;  %v586_v52 = vmax.f32 %v505_v42, %v424_v39  ;;  %v3564_v53 = vmax.f32 %v513_v44, %v432_v40  ;;  %v273_v54 = vld [vmem:[%s2877_s6 + $0x30] sm:$0x1]  ;;  %v3573_v2 = vmax.f32 %v514_v10, %v433_v41 }
 0x140   : > { %v344_v55 = vld [vmem:[%s2877_s6 + $0x89] sm:$0x1]  ;;  %v345_v58 = vld [vmem:[%s2877_s6 + $0x8a] sm:$0x1]  ;;  %v711_v59 = vmax.f32 %v681_v21, %v682_v22  ;;  %v648_v60 = vmax.f32 %v3464_v45, %v585_v46  ;;  %v353_v61 = vld [vmem:[%s2877_s6 + $0x93] sm:$0x1] }
 0x141   : > { %v354_v62 = vld [vmem:[%s2877_s6 + $0x94] sm:$0x1]  ;;  %v425_v63 = vld [vmem:[%s2877_s6 + $0xed] sm:$0x1]  ;;  %v506_v0 = vmax.f32 %v263_v47, %v344_v55  ;;  %v507_v1 = vmax.f32 %v264_v48, %v345_v58  ;;  %v649_v3 = vmax.f32 %v3469_v51, %v586_v52  ;;  %v426_v4 = vld [vmem:[%s2877_s6 + $0xee] sm:$0x1]  ;;  %v515_v45 = vmax.f32 %v272_v49, %v353_v61 }
 0x142   : > { %v434_v5 = vld [vmem:[%s2877_s6 + $0xf7] sm:$0x1]  ;;  %v435_v6 = vld [vmem:[%s2877_s6 + $0xf8] sm:$0x1]  ;;  %v516_v7 = vmax.f32 %v273_v54, %v354_v62  ;;  %v727_v8 = vmax.f32 %v711_v59, %v683_v50  ;;  %v684_v33 = vmax.f32 %v648_v60, %v3564_v53  ;;  %v274_v11 = vld [vmem:[%s2877_s6 + $0x32] sm:$0x1] }
 0x143   : > { %v587_v43 = vmax.f32 %v506_v0, %v425_v63  ;;  %v588_v9 = vmax.f32 %v507_v1, %v426_v4  ;;  %v275_v12 = vld [vmem:[%s2877_s6 + $0x33] sm:$0x1]  ;;  %v276_v51 = vld [vmem:[%s2877_s6 + $0x34] sm:$0x1]  ;;  %v685_v13 = vmax.f32 %v649_v3, %v3573_v2  ;;  %v3584_v14 = vmax.f32 %v515_v45, %v434_v5  ;;  %v283_v15 = vld [vmem:[%s2877_s6 + $0x3c] sm:$0x1] }
 0x144   : > { %v284_v16 = vld [vmem:[%s2877_s6 + $0x3d] sm:$0x1]  ;;  %v285_v17 = vld [vmem:[%s2877_s6 + $0x3e] sm:$0x1]  ;;  %744 = vst.msk [vmem:[%s3444_s30 + $0x5] sm:$0x1] %vm738_vm0, %v727_v8  ;;  %v712_v18 = vmax.f32 %v683_v50, %v684_v33  ;;  %v3591_v20 = vmax.f32 %v516_v7, %v435_v6 }
 0x145   : > { %v650_v21 = vmax.f32 %v3490_v19, %v587_v43  ;;  %v651_v23 = vmax.f32 %v3495_v25, %v588_v9  ;;  %v355_v26 = vld [vmem:[%s2877_s6 + $0x96] sm:$0x1]  ;;  %v356_v27 = vld [vmem:[%s2877_s6 + $0x97] sm:$0x1]  ;;  %v357_v28 = vld [vmem:[%s2877_s6 + $0x98] sm:$0x1] }
 0x146   : > { %v364_v31 = vld [vmem:[%s2877_s6 + $0xa0] sm:$0x1]  ;;  %v365_v32 = vld [vmem:[%s2877_s6 + $0xa1] sm:$0x1]  ;;  %v366_v34 = vld [vmem:[%s2877_s6 + $0xa2] sm:$0x1]  ;;  %v517_v35 = vmax.f32 %v274_v11, %v355_v26  ;;  %v518_v36 = vmax.f32 %v275_v12, %v356_v27  ;;  %v519_v37 = vmax.f32 %v276_v51, %v357_v28  ;;  %v728_v38 = vmax.f32 %v712_v18, %v685_v13 }
 0x147   : > { %v686_v39 = vmax.f32 %v650_v21, %v3584_v14  ;;  %v687_v19 = vmax.f32 %v651_v23, %v3591_v20  ;;  %v436_v25 = vld [vmem:[%s2877_s6 + $0xfa] sm:$0x1]  ;;  %v437_v40 = vld [vmem:[%s2877_s6 + $0xfb] sm:$0x1]  ;;  %v438_v41 = vld [vmem:[%s2877_s6 + $0xfc] sm:$0x1]  ;;  %v526_v42 = vmax.f32 %v283_v15, %v364_v31  ;;  %v527_v46 = vmax.f32 %v284_v16, %v365_v32 }
 0x148   : > { %v445_v44 = vld [vmem:[%s2877_s6 + $0x104] sm:$0x1]  ;;  %v446_v10 = vld [vmem:[%s2877_s6 + $0x105] sm:$0x1]  ;;  %v447_v22 = vld [vmem:[%s2877_s6 + $0x106] sm:$0x1]  ;;  %v528_v47 = vmax.f32 %v285_v17, %v366_v34  ;;  %v598_v48 = vmax.f32 %v517_v35, %v436_v25  ;;  %v599_v49 = vmax.f32 %v518_v36, %v437_v40  ;;  %v600_v52 = vmax.f32 %v519_v37, %v438_v41 }
 0x149   : > { %745 = vst.msk [vmem:[%s3444_s30 + $0x6] sm:$0x1] %vm738_vm0, %v728_v38  ;;  %v713_v50 = vmax.f32 %v685_v13, %v686_v39  ;;  %v3611_v54 = vmax.f32 %v526_v42, %v445_v44  ;;  %v277_v55 = vld [vmem:[%s2877_s6 + $0x35] sm:$0x1]  ;;  %v278_v58 = vld [vmem:[%s2877_s6 + $0x36] sm:$0x1]  ;;  %v3616_v60 = vmax.f32 %v527_v46, %v446_v10 }
 0x14a   : > { %v286_v59 = vld [vmem:[%s2877_s6 + $0x3f] sm:$0x1]  ;;  %v3618_v61 = vmax.f32 %v528_v47, %v447_v22  ;;  %v652_v62 = vmax.f32 %v3513_v56, %v598_v48  ;;  %v653_v63 = vmax.f32 %v3515_v57, %v599_v49  ;;  %v287_v0 = vld [vmem:[%s2877_s6 + $0x40] sm:$0x1]  ;;  %v358_v1 = vld [vmem:[%s2877_s6 + $0x99] sm:$0x1]  ;;  %v654_v5 = vmax.f32 %v3531_v29, %v600_v52 }
 0x14b   : > { %v359_v3 = vld [vmem:[%s2877_s6 + $0x9a] sm:$0x1]  ;;  %v729_v4 = vmax.f32 %v713_v50, %v687_v19  ;;  %v367_v6 = vld [vmem:[%s2877_s6 + $0xa3] sm:$0x1]  ;;  %v368_v45 = vld [vmem:[%s2877_s6 + $0xa4] sm:$0x1]  ;;  %v520_v8 = vmax.f32 %v277_v55, %v358_v1 }
 0x14c   : > { %v439_v7 = vld [vmem:[%s2877_s6 + $0xfd] sm:$0x1]  ;;  %v521_v33 = vmax.f32 %v278_v58, %v359_v3  ;;  %v688_v56 = vmax.f32 %v652_v62, %v3611_v54  ;;  %v689_v57 = vmax.f32 %v653_v63, %v3616_v60  ;;  %v440_v43 = vld [vmem:[%s2877_s6 + $0xfe] sm:$0x1]  ;;  %v448_v9 = vld [vmem:[%s2877_s6 + $0x107] sm:$0x1]  ;;  %v529_v12 = vmax.f32 %v286_v59, %v367_v6 }
 0x14d   : > { %v449_v11 = vld [vmem:[%s2877_s6 + $0x108] sm:$0x1]  ;;  %v530_v29 = vmax.f32 %v287_v0, %v368_v45  ;;  %746 = vst.msk [vmem:[%s3444_s30 + $0x7] sm:$0x1] %vm738_vm0, %v729_v4  ;;  %v601_v51 = vmax.f32 %v520_v8, %v439_v7  ;;  %v279_v15 = vld [vmem:[%s2877_s6 + $0x37] sm:$0x1]  ;;  %v690_v18 = vmax.f32 %v654_v5, %v3618_v61 }
 0x14e   : > { %v602_v13 = vmax.f32 %v521_v33, %v440_v43  ;;  %v280_v16 = vld [vmem:[%s2877_s6 + $0x38] sm:$0x1]  ;;  %v288_v17 = vld [vmem:[%s2877_s6 + $0x41] sm:$0x1]  ;;  %v714_v21 = vmax.f32 %v688_v56, %v689_v57  ;;  %v3640_v23 = vmax.f32 %v529_v12, %v448_v9  ;;  %v289_v26 = vld [vmem:[%s2877_s6 + $0x42] sm:$0x1] }
 0x14f   : > { %v360_v27 = vld [vmem:[%s2877_s6 + $0x9b] sm:$0x1]  ;;  %v361_v28 = vld [vmem:[%s2877_s6 + $0x9c] sm:$0x1]  ;;  %v655_v31 = vmax.f32 %v3542_v24, %v601_v51  ;;  %v369_v34 = vld [vmem:[%s2877_s6 + $0xa5] sm:$0x1]  ;;  %v3650_v19 = vmax.f32 %v530_v29, %v449_v11 }
 0x150   : > { %v656_v32 = vmax.f32 %v3547_v30, %v602_v13  ;;  %v370_v35 = vld [vmem:[%s2877_s6 + $0xa6] sm:$0x1]  ;;  %v441_v36 = vld [vmem:[%s2877_s6 + $0xff] sm:$0x1]  ;;  %v522_v37 = vmax.f32 %v279_v15, %v360_v27  ;;  %v523_v38 = vmax.f32 %v280_v16, %v361_v28  ;;  %v730_v39 = vmax.f32 %v714_v21, %v690_v18  ;;  %v442_v25 = vld [vmem:[%s2877_s6 + $0x100] sm:$0x1] }
 0x151   : > { %v450_v40 = vld [vmem:[%s2877_s6 + $0x109] sm:$0x1]  ;;  %v451_v24 = vld [vmem:[%s2877_s6 + $0x10a] sm:$0x1]  ;;  %v531_v41 = vmax.f32 %v288_v17, %v369_v34  ;;  %v532_v30 = vmax.f32 %v289_v26, %v370_v35  ;;  %v691_v42 = vmax.f32 %v655_v31, %v3640_v23  ;;  %v281_v22 = vld [vmem:[%s2877_s6 + $0x39] sm:$0x1] }
 0x152   : > { %v603_v44 = vmax.f32 %v522_v37, %v441_v36  ;;  %v604_v10 = vmax.f32 %v523_v38, %v442_v25  ;;  %v282_v46 = vld [vmem:[%s2877_s6 + $0x3a] sm:$0x1]  ;;  %v290_v47 = vld [vmem:[%s2877_s6 + $0x43] sm:$0x1]  ;;  %747 = vst.msk [vmem:[%s3444_s30 + $0x8] sm:$0x1] %vm738_vm0, %v730_v39  ;;  %v692_v48 = vmax.f32 %v656_v32, %v3650_v19 }
 0x153   : > { %v3662_v49 = vmax.f32 %v531_v41, %v450_v40  ;;  %v291_v50 = vld [vmem:[%s2877_s6 + $0x44] sm:$0x1]  ;;  %v362_v52 = vld [vmem:[%s2877_s6 + $0x9d] sm:$0x1]  ;;  %v363_v55 = vld [vmem:[%s2877_s6 + $0x9e] sm:$0x1]  ;;  %v715_v58 = vmax.f32 %v690_v18, %v691_v42  ;;  %v3672_v4 = vmax.f32 %v532_v30, %v451_v24 }
 0x154   : > { %v657_v59 = vmax.f32 %v3564_v53, %v603_v44  ;;  %v658_v62 = vmax.f32 %v3573_v2, %v604_v10  ;;  %v371_v63 = vld [vmem:[%s2877_s6 + $0xa7] sm:$0x1]  ;;  %v372_v0 = vld [vmem:[%s2877_s6 + $0xa8] sm:$0x1]  ;;  %v443_v1 = vld [vmem:[%s2877_s6 + $0x101] sm:$0x1]  ;;  %v524_v3 = vmax.f32 %v281_v22, %v362_v52  ;;  %v525_v7 = vmax.f32 %v282_v46, %v363_v55 }
 0x155   : > { %v444_v5 = vld [vmem:[%s2877_s6 + $0x102] sm:$0x1]  ;;  %v452_v6 = vld [vmem:[%s2877_s6 + $0x10b] sm:$0x1]  ;;  %v453_v45 = vld [vmem:[%s2877_s6 + $0x10c] sm:$0x1]  ;;  %v533_v53 = vmax.f32 %v290_v47, %v371_v63  ;;  %v534_v8 = vmax.f32 %v291_v50, %v372_v0  ;;  %v731_v33 = vmax.f32 %v715_v58, %v692_v48 }
 0x156   : > { %v693_v2 = vmax.f32 %v657_v59, %v3662_v49  ;;  %v605_v56 = vmax.f32 %v524_v3, %v443_v1  ;;  %v292_v57 = vld [vmem:[%s2877_s6 + $0x46] sm:$0x1]  ;;  %v293_v43 = vld [vmem:[%s2877_s6 + $0x47] sm:$0x1]  ;;  %v294_v9 = vld [vmem:[%s2877_s6 + $0x48] sm:$0x1]  ;;  %v694_v11 = vmax.f32 %v658_v62, %v3672_v4  ;;  %v606_v12 = vmax.f32 %v525_v7, %v444_v5 }
 0x157   : > { %v301_v29 = vld [vmem:[%s2877_s6 + $0x50] sm:$0x1]  ;;  %v302_v51 = vld [vmem:[%s2877_s6 + $0x51] sm:$0x1]  ;;  %v303_v13 = vld [vmem:[%s2877_s6 + $0x52] sm:$0x1]  ;;  %v3687_v16 = vmax.f32 %v533_v53, %v452_v6  ;;  %v3689_v17 = vmax.f32 %v534_v8, %v453_v45 }
 0x158   : > { %748 = vst.msk [vmem:[%s3444_s30 + $0x9] sm:$0x1] %vm738_vm0, %v731_v33  ;;  %v716_v15 = vmax.f32 %v692_v48, %v693_v2  ;;  %v659_v18 = vmax.f32 %v3584_v14, %v605_v56  ;;  %v373_v21 = vld [vmem:[%s2877_s6 + $0xaa] sm:$0x1]  ;;  %v374_v26 = vld [vmem:[%s2877_s6 + $0xab] sm:$0x1]  ;;  %v660_v28 = vmax.f32 %v3591_v20, %v606_v12 }
 0x159   : > { %v375_v27 = vld [vmem:[%s2877_s6 + $0xac] sm:$0x1]  ;;  %v382_v31 = vld [vmem:[%s2877_s6 + $0xb4] sm:$0x1]  ;;  %v383_v32 = vld [vmem:[%s2877_s6 + $0xb5] sm:$0x1]  ;;  %v535_v35 = vmax.f32 %v292_v57, %v373_v21  ;;  %v536_v36 = vmax.f32 %v293_v43, %v374_v26 }
 0x15a   : > { %v384_v34 = vld [vmem:[%s2877_s6 + $0xb6] sm:$0x1]  ;;  %v537_v37 = vmax.f32 %v294_v9, %v375_v27  ;;  %v732_v38 = vmax.f32 %v716_v15, %v694_v11  ;;  %v695_v39 = vmax.f32 %v659_v18, %v3687_v16  ;;  %v454_v25 = vld [vmem:[%s2877_s6 + $0x10e] sm:$0x1]  ;;  %v455_v14 = vld [vmem:[%s2877_s6 + $0x10f] sm:$0x1]  ;;  %v544_v24 = vmax.f32 %v301_v29, %v382_v31 }
 0x15b   : > { %v456_v40 = vld [vmem:[%s2877_s6 + $0x110] sm:$0x1]  ;;  %v545_v20 = vmax.f32 %v302_v51, %v383_v32  ;;  %v696_v41 = vmax.f32 %v660_v28, %v3689_v17  ;;  %v463_v30 = vld [vmem:[%s2877_s6 + $0x118] sm:$0x1]  ;;  %v464_v42 = vld [vmem:[%s2877_s6 + $0x119] sm:$0x1]  ;;  %v546_v10 = vmax.f32 %v303_v13, %v384_v34  ;;  %v616_v22 = vmax.f32 %v535_v35, %v454_v25 }
 0x15c   : > { %v465_v44 = vld [vmem:[%s2877_s6 + $0x11a] sm:$0x1]  ;;  %v617_v46 = vmax.f32 %v536_v36, %v455_v14  ;;  %749 = vst.msk [vmem:[%s3444_s30 + $0xa] sm:$0x1] %vm738_vm0, %v732_v38  ;;  %v717_v47 = vmax.f32 %v694_v11, %v695_v39  ;;  %v618_v48 = vmax.f32 %v537_v37, %v456_v40  ;;  %v625_v50 = vmax.f32 %v544_v24, %v463_v30  ;;  %v295_v55 = vld [vmem:[%s2877_s6 + $0x49] sm:$0x1] }
 0x15d   : > { %v626_v52 = vmax.f32 %v545_v20, %v464_v42  ;;  %v296_v58 = vld [vmem:[%s2877_s6 + $0x4a] sm:$0x1]  ;;  %v304_v59 = vld [vmem:[%s2877_s6 + $0x53] sm:$0x1]  ;;  %v627_v62 = vmax.f32 %v546_v10, %v465_v44  ;;  %v661_v63 = vmax.f32 %v3611_v54, %v616_v22  ;;  %v305_v1 = vld [vmem:[%s2877_s6 + $0x54] sm:$0x1] }
 0x15e   : > { %v662_v0 = vmax.f32 %v3616_v60, %v617_v46  ;;  %v376_v3 = vld [vmem:[%s2877_s6 + $0xad] sm:$0x1]  ;;  %v377_v5 = vld [vmem:[%s2877_s6 + $0xae] sm:$0x1]  ;;  %v733_v6 = vmax.f32 %v717_v47, %v696_v41  ;;  %v663_v45 = vmax.f32 %v3618_v61, %v618_v48  ;;  %v385_v7 = vld [vmem:[%s2877_s6 + $0xb7] sm:$0x1] }
 0x15f   : > { %v386_v53 = vld [vmem:[%s2877_s6 + $0xb8] sm:$0x1]  ;;  %v457_v8 = vld [vmem:[%s2877_s6 + $0x111] sm:$0x1]  ;;  %v538_v33 = vmax.f32 %v295_v55, %v376_v3  ;;  %v539_v2 = vmax.f32 %v296_v58, %v377_v5  ;;  %v697_v56 = vmax.f32 %v661_v63, %v625_v50  ;;  %v458_v57 = vld [vmem:[%s2877_s6 + $0x112] sm:$0x1]  ;;  %v547_v9 = vmax.f32 %v304_v59, %v385_v7 }
 0x160   : > { %v698_v54 = vmax.f32 %v662_v0, %v626_v52  ;;  %v466_v60 = vld [vmem:[%s2877_s6 + $0x11b] sm:$0x1]  ;;  %v467_v43 = vld [vmem:[%s2877_s6 + $0x11c] sm:$0x1]  ;;  %v548_v11 = vmax.f32 %v305_v1, %v386_v53  ;;  %750 = vst.msk [vmem:[%s3444_s30 + $0xb] sm:$0x1] %vm738_vm0, %v733_v6  ;;  %v699_v15 = vmax.f32 %v663_v45, %v627_v62 }
 0x161   : > { %v619_v61 = vmax.f32 %v538_v33, %v457_v8  ;;  %v620_v12 = vmax.f32 %v539_v2, %v458_v57  ;;  %v297_v29 = vld [vmem:[%s2877_s6 + $0x4b] sm:$0x1]  ;;  %v298_v51 = vld [vmem:[%s2877_s6 + $0x4c] sm:$0x1]  ;;  %v306_v13 = vld [vmem:[%s2877_s6 + $0x55] sm:$0x1]  ;;  %v628_v21 = vmax.f32 %v547_v9, %v466_v60 }
 0x162   : > { %v718_v18 = vmax.f32 %v697_v56, %v698_v54  ;;  %v629_v26 = vmax.f32 %v548_v11, %v467_v43  ;;  %v307_v27 = vld [vmem:[%s2877_s6 + $0x56] sm:$0x1]  ;;  %v378_v28 = vld [vmem:[%s2877_s6 + $0xaf] sm:$0x1]  ;;  %v379_v31 = vld [vmem:[%s2877_s6 + $0xb0] sm:$0x1] }
 0x163   : > { %v664_v32 = vmax.f32 %v3640_v23, %v619_v61  ;;  %v665_v34 = vmax.f32 %v3650_v19, %v620_v12  ;;  %v387_v35 = vld [vmem:[%s2877_s6 + $0xb9] sm:$0x1]  ;;  %v388_v36 = vld [vmem:[%s2877_s6 + $0xba] sm:$0x1]  ;;  %v459_v37 = vld [vmem:[%s2877_s6 + $0x113] sm:$0x1]  ;;  %v540_v38 = vmax.f32 %v297_v29, %v378_v28  ;;  %v541_v39 = vmax.f32 %v298_v51, %v379_v31 }
 0x164   : > { %v734_v25 = vmax.f32 %v718_v18, %v699_v15  ;;  %v460_v14 = vld [vmem:[%s2877_s6 + $0x114] sm:$0x1]  ;;  %v468_v40 = vld [vmem:[%s2877_s6 + $0x11d] sm:$0x1]  ;;  %v469_v24 = vld [vmem:[%s2877_s6 + $0x11e] sm:$0x1]  ;;  %v549_v20 = vmax.f32 %v306_v13, %v387_v35  ;;  %v550_v23 = vmax.f32 %v307_v27, %v388_v36 }
 0x165   : > { %v700_v41 = vmax.f32 %v664_v32, %v628_v21  ;;  %v621_v19 = vmax.f32 %v540_v38, %v459_v37  ;;  %v622_v30 = vmax.f32 %v541_v39, %v460_v14  ;;  %v299_v42 = vld [vmem:[%s2877_s6 + $0x4d] sm:$0x1]  ;;  %v300_v44 = vld [vmem:[%s2877_s6 + $0x4e] sm:$0x1]  ;;  %v308_v10 = vld [vmem:[%s2877_s6 + $0x57] sm:$0x1]  ;;  %v701_v22 = vmax.f32 %v665_v34, %v629_v26 }
 0x166   : > { %751 = vst.msk [vmem:[%s3444_s30 + $0xc] sm:$0x1] %vm738_vm0, %v734_v25  ;;  %v630_v46 = vmax.f32 %v549_v20, %v468_v40  ;;  %v631_v47 = vmax.f32 %v550_v23, %v469_v24  ;;  %v309_v48 = vld [vmem:[%s2877_s6 + $0x58] sm:$0x1]  ;;  %v380_v50 = vld [vmem:[%s2877_s6 + $0xb1] sm:$0x1] }
 0x167   : > { %v381_v52 = vld [vmem:[%s2877_s6 + $0xb2] sm:$0x1]  ;;  %v719_v55 = vmax.f32 %v699_v15, %v700_v41  ;;  %v666_v58 = vmax.f32 %v3662_v49, %v621_v19  ;;  %v667_v59 = vmax.f32 %v3672_v4, %v622_v30  ;;  %v389_v62 = vld [vmem:[%s2877_s6 + $0xbb] sm:$0x1]  ;;  %v390_v63 = vld [vmem:[%s2877_s6 + $0xbc] sm:$0x1]  ;;  %v542_v1 = vmax.f32 %v299_v42, %v380_v50 }
 0x168   : > { %v461_v0 = vld [vmem:[%s2877_s6 + $0x115] sm:$0x1]  ;;  %v462_v3 = vld [vmem:[%s2877_s6 + $0x116] sm:$0x1]  ;;  %v470_v5 = vld [vmem:[%s2877_s6 + $0x11f] sm:$0x1]  ;;  %v543_v45 = vmax.f32 %v300_v44, %v381_v52  ;;  %v551_v7 = vmax.f32 %v308_v10, %v389_v62  ;;  %v552_v53 = vmax.f32 %v309_v48, %v390_v63 }
 0x169   : > { %v471_v6 = vld [vmem:[%s2877_s6 + $0x120] sm:$0x1]  ;;  %v735_v8 = vmax.f32 %v719_v55, %v701_v22  ;;  %v702_v33 = vmax.f32 %v666_v58, %v630_v46  ;;  %v623_v2 = vmax.f32 %v542_v1, %v461_v0  ;;  %v1558_v54 = vld [vmem:[#allocation2 + $0x1] sm:$0x1]  ;;  %v1559_v57 = vld [vmem:[#allocation2 + $0x2] sm:$0x1]  ;;  %v703_v61 = vmax.f32 %v667_v59, %v631_v47 }
 0x16a   : > { %v1557_v56 = vld [vmem:[#allocation2] sm:$0x1]  ;;  %v624_v49 = vmax.f32 %v543_v45, %v462_v3  ;;  %v632_v60 = vmax.f32 %v551_v7, %v470_v5  ;;  %v633_v4 = vmax.f32 %v552_v53, %v471_v6  ;;  %v1566_v43 = vld [vmem:[#allocation2 + $0xa] sm:$0x1]  ;;  %v1567_v9 = vld [vmem:[#allocation2 + $0xb] sm:$0x1] }
 0x16b   : > { %v1568_v11 = vld [vmem:[#allocation2 + $0xc] sm:$0x1]  ;;  %752 = vst.msk [vmem:[%s3444_s30 + $0xd] sm:$0x1] %vm738_vm0, %v735_v8  ;;  %v720_v12 = vmax.f32 %v701_v22, %v702_v33  ;;  %v668_v29 = vmax.f32 %v3687_v16, %v623_v2  ;;  %v1575_v51 = vld [vmem:[#allocation2 + $0x14] sm:$0x1] }
 0x16c   : > { %v1576_v13 = vld [vmem:[#allocation2 + $0x15] sm:$0x1]  ;;  %v1577_v15 = vld [vmem:[#allocation2 + $0x16] sm:$0x1]  ;;  %v669_v18 = vmax.f32 %v3689_v17, %v624_v49  ;;  %v1638_v21 = vld [vmem:[#allocation2 + $0x64] sm:$0x1] }
 0x16d   : > { %v1639_v26 = vld [vmem:[#allocation2 + $0x65] sm:$0x1]  ;;  %v1640_v27 = vld [vmem:[#allocation2 + $0x66] sm:$0x1]  ;;  %v736_v28 = vmax.f32 %v720_v12, %v703_v61  ;;  %v704_v31 = vmax.f32 %v668_v29, %v632_v60  ;;  %v1647_v32 = vld [vmem:[#allocation2 + $0x6e] sm:$0x1]  ;;  %v1800_v36 = vmax.f32 %v1557_v56, %v1638_v21 }
 0x16e   : > { %v1648_v34 = vld [vmem:[#allocation2 + $0x6f] sm:$0x1]  ;;  %v1649_v35 = vld [vmem:[#allocation2 + $0x70] sm:$0x1]  ;;  %v1801_v37 = vmax.f32 %v1558_v54, %v1639_v26  ;;  %v705_v38 = vmax.f32 %v669_v18, %v633_v4  ;;  %v1656_v39 = vld [vmem:[#allocation2 + $0x78] sm:$0x1]  ;;  %v1802_v14 = vmax.f32 %v1559_v57, %v1640_v27  ;;  %v1809_v40 = vmax.f32 %v1566_v43, %v1647_v32 }
 0x16f   : > { %v1657_v25 = vld [vmem:[#allocation2 + $0x79] sm:$0x1]  ;;  %v1658_v16 = vld [vmem:[#allocation2 + $0x7a] sm:$0x1]  ;;  %v1810_v24 = vmax.f32 %v1567_v9, %v1648_v34  ;;  %753 = vst.msk [vmem:[%s3444_s30 + $0xe] sm:$0x1] %vm738_vm0, %v736_v28  ;;  %v721_v17 = vmax.f32 %v703_v61, %v704_v31  ;;  %v1811_v19 = vmax.f32 %v1568_v11, %v1649_v35  ;;  %v1818_v30 = vmax.f32 %v1575_v51, %v1656_v39 }
 0x170   : > { %v1719_v20 = vld [vmem:[#allocation2 + $0xc8] sm:$0x1]  ;;  %v1720_v23 = vld [vmem:[#allocation2 + $0xc9] sm:$0x1]  ;;  %v1721_v41 = vld [vmem:[#allocation2 + $0xca] sm:$0x1]  ;;  %v1819_v42 = vmax.f32 %v1576_v13, %v1657_v25  ;;  %v1820_v46 = vmax.f32 %v1577_v15, %v1658_v16 }
 0x171   : > { %v1728_v44 = vld [vmem:[#allocation2 + $0xd2] sm:$0x1]  ;;  %v1729_v10 = vld [vmem:[#allocation2 + $0xd3] sm:$0x1]  ;;  %v1730_v22 = vld [vmem:[#allocation2 + $0xd4] sm:$0x1]  ;;  %v1881_v47 = vmax.f32 %v1800_v36, %v1719_v20  ;;  %v1882_v48 = vmax.f32 %v1801_v37, %v1720_v23  ;;  %v1883_v50 = vmax.f32 %v1802_v14, %v1721_v41  ;;  %v737_v52 = vmax.f32 %v721_v17, %v705_v38 }
 0x172   : > { %v1737_v55 = vld [vmem:[#allocation2 + $0xdc] sm:$0x1]  ;;  %v1738_v58 = vld [vmem:[#allocation2 + $0xdd] sm:$0x1]  ;;  %v1739_v59 = vld [vmem:[#allocation2 + $0xde] sm:$0x1]  ;;  %v1890_v62 = vmax.f32 %v1809_v40, %v1728_v44  ;;  %v1891_v63 = vmax.f32 %v1810_v24, %v1729_v10  ;;  %v1892_v0 = vmax.f32 %v1811_v19, %v1730_v22 }
 0x173   : > { %v3762_v1 = vmax.f32 %v1818_v30, %v1737_v55  ;;  %v1560_v3 = vld [vmem:[#allocation2 + $0x3] sm:$0x1]  ;;  %v1561_v5 = vld [vmem:[#allocation2 + $0x4] sm:$0x1]  ;;  %v1569_v6 = vld [vmem:[#allocation2 + $0xd] sm:$0x1]  ;;  %v3766_v45 = vmax.f32 %v1819_v42, %v1738_v58  ;;  %v3768_v60 = vmax.f32 %v1820_v46, %v1739_v59 }
 0x174   : > { %754 = vst.msk [vmem:[%s3444_s30 + $0xf] sm:$0x1] %vm738_vm0, %v737_v52  ;;  %v1962_v7 = vmax.f32 %v1881_v47, %v1890_v62  ;;  %v1963_v53 = vmax.f32 %v1882_v48, %v1891_v63  ;;  %v1964_v8 = vmax.f32 %v1883_v50, %v1892_v0  ;;  %v1570_v33 = vld [vmem:[#allocation2 + $0xe] sm:$0x1]  ;;  %v1578_v2 = vld [vmem:[#allocation2 + $0x17] sm:$0x1] }
 0x175   : > { %v1579_v56 = vld [vmem:[#allocation2 + $0x18] sm:$0x1]  ;;  %v1641_v54 = vld [vmem:[#allocation2 + $0x67] sm:$0x1]  ;;  %v1642_v57 = vld [vmem:[#allocation2 + $0x68] sm:$0x1] }
 0x176   : > { %v1650_v49 = vld [vmem:[#allocation2 + $0x71] sm:$0x1]  ;;  %v1998_v4 = vmax.f32 %v1962_v7, %v3762_v1  ;;  %v1999_v43 = vmax.f32 %v1963_v53, %v3766_v45  ;;  %v1651_v9 = vld [vmem:[#allocation2 + $0x72] sm:$0x1]  ;;  %v1659_v11 = vld [vmem:[#allocation2 + $0x7b] sm:$0x1]  ;;  %v1803_v12 = vmax.f32 %v1560_v3, %v1641_v54  ;;  %v1804_v15 = vmax.f32 %v1561_v5, %v1642_v57 }
 0x177   : > { %v1660_v61 = vld [vmem:[#allocation2 + $0x7c] sm:$0x1]  ;;  %v1722_v29 = vld [vmem:[#allocation2 + $0xcb] sm:$0x1]  ;;  %v1723_v51 = vld [vmem:[#allocation2 + $0xcc] sm:$0x1]  ;;  %v1812_v18 = vmax.f32 %v1569_v6, %v1650_v49  ;;  %v1813_v21 = vmax.f32 %v1570_v33, %v1651_v9  ;;  %v1821_v26 = vmax.f32 %v1578_v2, %v1659_v11  ;;  %v2000_v27 = vmax.f32 %v1964_v8, %v3768_v60 }
 0x178   : > { %v1731_v13 = vld [vmem:[#allocation2 + $0xd5] sm:$0x1]  ;;  %v2034_v28 = vmax.f32 %v1998_v4, %v1999_v43  ;;  %v1732_v31 = vld [vmem:[#allocation2 + $0xd6] sm:$0x1]  ;;  %v1740_v32 = vld [vmem:[#allocation2 + $0xdf] sm:$0x1]  ;;  %v1884_v35 = vmax.f32 %v1803_v12, %v1722_v29  ;;  %v1822_v36 = vmax.f32 %v1579_v56, %v1660_v61  ;;  %v1885_v37 = vmax.f32 %v1804_v15, %v1723_v51 }
 0x179   : > { %v1741_v34 = vld [vmem:[#allocation2 + $0xe0] sm:$0x1]  ;;  %v1893_v38 = vmax.f32 %v1812_v18, %v1731_v13  ;;  %v1894_v39 = vmax.f32 %v1813_v21, %v1732_v31  ;;  %v1562_v25 = vld [vmem:[#allocation2 + $0x5] sm:$0x1]  ;;  %v1563_v16 = vld [vmem:[#allocation2 + $0x6] sm:$0x1]  ;;  %v3773_v23 = vmax.f32 %v1821_v26, %v1740_v32 }
 0x17a   : > { %v1571_v14 = vld [vmem:[#allocation2 + $0xf] sm:$0x1]  ;;  %v2050_v40 = vmax.f32 %v2034_v28, %v2000_v27  ;;  %v1572_v24 = vld [vmem:[#allocation2 + $0x10] sm:$0x1]  ;;  %v1580_v17 = vld [vmem:[#allocation2 + $0x19] sm:$0x1]  ;;  %v3777_v52 = vmax.f32 %v1822_v36, %v1741_v34 }
 0x17b   : > { %v1581_v20 = vld [vmem:[#allocation2 + $0x1a] sm:$0x1]  ;;  %v1965_v41 = vmax.f32 %v1884_v35, %v1893_v38  ;;  %v1966_v19 = vmax.f32 %v1885_v37, %v1894_v39  ;;  %v1643_v30 = vld [vmem:[#allocation2 + $0x69] sm:$0x1]  ;;  %v1644_v42 = vld [vmem:[#allocation2 + $0x6a] sm:$0x1] }
 0x17c   : > { %v1652_v44 = vld [vmem:[#allocation2 + $0x73] sm:$0x1]  ;;  %2410 = vst.msk [vmem:[%s3444_s30 + $0x10] sm:$0x1] %vm738_vm0, %v2050_v40  ;;  %v1653_v10 = vld [vmem:[#allocation2 + $0x74] sm:$0x1]  ;;  %v1805_v47 = vmax.f32 %v1562_v25, %v1643_v30  ;;  %v1806_v48 = vmax.f32 %v1563_v16, %v1644_v42 }
 0x17d   : > { %v1661_v22 = vld [vmem:[#allocation2 + $0x7d] sm:$0x1]  ;;  %v1662_v46 = vld [vmem:[#allocation2 + $0x7e] sm:$0x1]  ;;  %v1814_v50 = vmax.f32 %v1571_v14, %v1652_v44  ;;  %v2001_v55 = vmax.f32 %v1965_v41, %v3773_v23  ;;  %v1724_v58 = vld [vmem:[#allocation2 + $0xcd] sm:$0x1]  ;;  %v1815_v63 = vmax.f32 %v1572_v24, %v1653_v10  ;;  %v2002_v2 = vmax.f32 %v1966_v19, %v3777_v52 }
 0x17e   : > { %v1725_v59 = vld [vmem:[#allocation2 + $0xce] sm:$0x1]  ;;  %v1733_v62 = vld [vmem:[#allocation2 + $0xd7] sm:$0x1]  ;;  %v1823_v0 = vmax.f32 %v1580_v17, %v1661_v22  ;;  %v1734_v3 = vld [vmem:[#allocation2 + $0xd8] sm:$0x1]  ;;  %v1824_v7 = vmax.f32 %v1581_v20, %v1662_v46  ;;  %v1886_v53 = vmax.f32 %v1805_v47, %v1724_v58 }
 0x17f   : > { %v1742_v5 = vld [vmem:[#allocation2 + $0xe1] sm:$0x1]  ;;  %v1743_v6 = vld [vmem:[#allocation2 + $0xe2] sm:$0x1]  ;;  %v1887_v8 = vmax.f32 %v1806_v48, %v1725_v59  ;;  %v1895_v33 = vmax.f32 %v1814_v50, %v1733_v62  ;;  %v2035_v56 = vmax.f32 %v2000_v27, %v2001_v55  ;;  %v1896_v54 = vmax.f32 %v1815_v63, %v1734_v3  ;;  %v1564_v57 = vld [vmem:[#allocation2 + $0x7] sm:$0x1] }
 0x180   : > { %v1565_v49 = vld [vmem:[#allocation2 + $0x8] sm:$0x1]  ;;  %v1573_v4 = vld [vmem:[#allocation2 + $0x11] sm:$0x1]  ;;  %v3781_v43 = vmax.f32 %v1823_v0, %v1742_v5  ;;  %v1574_v11 = vld [vmem:[#allocation2 + $0x12] sm:$0x1]  ;;  %v3783_v51 = vmax.f32 %v1824_v7, %v1743_v6 }
 0x181   : > { %v1967_v9 = vmax.f32 %v1886_v53, %v1895_v33  ;;  %v1582_v61 = vld [vmem:[#allocation2 + $0x1b] sm:$0x1]  ;;  %v1583_v12 = vld [vmem:[#allocation2 + $0x1c] sm:$0x1]  ;;  %v2051_v29 = vmax.f32 %v2035_v56, %v2002_v2  ;;  %v1968_v13 = vmax.f32 %v1887_v8, %v1896_v54  ;;  %v1645_v15 = vld [vmem:[#allocation2 + $0x6b] sm:$0x1] }
 0x182   : > { %v1646_v18 = vld [vmem:[#allocation2 + $0x6c] sm:$0x1]  ;;  %v1654_v21 = vld [vmem:[#allocation2 + $0x75] sm:$0x1]  ;;  %v1655_v27 = vld [vmem:[#allocation2 + $0x76] sm:$0x1]  ;;  %v1807_v32 = vmax.f32 %v1564_v57, %v1645_v15 }
 0x183   : > { %v2003_v26 = vmax.f32 %v1967_v9, %v3781_v43  ;;  %v1663_v28 = vld [vmem:[#allocation2 + $0x7f] sm:$0x1]  ;;  %v1664_v31 = vld [vmem:[#allocation2 + $0x80] sm:$0x1]  ;;  %v1808_v34 = vmax.f32 %v1565_v49, %v1646_v18  ;;  %v1816_v35 = vmax.f32 %v1573_v4, %v1654_v21  ;;  %2411 = vst.msk [vmem:[%s3444_s30 + $0x11] sm:$0x1] %vm738_vm0, %v2051_v29  ;;  %v2004_v36 = vmax.f32 %v1968_v13, %v3783_v51 }
 0x184   : > { %v1726_v37 = vld [vmem:[#allocation2 + $0xcf] sm:$0x1]  ;;  %v1727_v38 = vld [vmem:[#allocation2 + $0xd0] sm:$0x1]  ;;  %v1735_v39 = vld [vmem:[#allocation2 + $0xd9] sm:$0x1]  ;;  %v1817_v25 = vmax.f32 %v1574_v11, %v1655_v27  ;;  %v1825_v16 = vmax.f32 %v1582_v61, %v1663_v28  ;;  %v1826_v14 = vmax.f32 %v1583_v12, %v1664_v31 }
 0x185   : > { %v2036_v40 = vmax.f32 %v2002_v2, %v2003_v26  ;;  %v1736_v24 = vld [vmem:[#allocation2 + $0xda] sm:$0x1]  ;;  %v1744_v17 = vld [vmem:[#allocation2 + $0xe3] sm:$0x1]  ;;  %v1745_v20 = vld [vmem:[#allocation2 + $0xe4] sm:$0x1]  ;;  %v1888_v41 = vmax.f32 %v1807_v32, %v1726_v37  ;;  %v1889_v19 = vmax.f32 %v1808_v34, %v1727_v38  ;;  %v1897_v30 = vmax.f32 %v1816_v35, %v1735_v39 }
 0x186   : > { %v1898_v42 = vmax.f32 %v1817_v25, %v1736_v24  ;;  %v1584_v44 = vld [vmem:[#allocation2 + $0x1e] sm:$0x1]  ;;  %v1585_v10 = vld [vmem:[#allocation2 + $0x1f] sm:$0x1]  ;;  %v1586_v22 = vld [vmem:[#allocation2 + $0x20] sm:$0x1]  ;;  %v3789_v47 = vmax.f32 %v1825_v16, %v1744_v17  ;;  %v3791_v59 = vmax.f32 %v1826_v14, %v1745_v20 }
 0x187   : > { %v2052_v46 = vmax.f32 %v2036_v40, %v2004_v36  ;;  %v1969_v48 = vmax.f32 %v1888_v41, %v1897_v30  ;;  %v1593_v50 = vld [vmem:[#allocation2 + $0x28] sm:$0x1]  ;;  %v1594_v55 = vld [vmem:[#allocation2 + $0x29] sm:$0x1]  ;;  %v1595_v58 = vld [vmem:[#allocation2 + $0x2a] sm:$0x1] }
 0x188   : > { %v1970_v62 = vmax.f32 %v1889_v19, %v1898_v42  ;;  %v1665_v63 = vld [vmem:[#allocation2 + $0x82] sm:$0x1]  ;;  %v1666_v0 = vld [vmem:[#allocation2 + $0x83] sm:$0x1]  ;;  %v1667_v3 = vld [vmem:[#allocation2 + $0x84] sm:$0x1] }
 0x189   : > { %2412 = vst.msk [vmem:[%s3444_s30 + $0x12] sm:$0x1] %vm738_vm0, %v2052_v46  ;;  %v2005_v5 = vmax.f32 %v1969_v48, %v3789_v47  ;;  %v1674_v6 = vld [vmem:[#allocation2 + $0x8c] sm:$0x1]  ;;  %v1675_v7 = vld [vmem:[#allocation2 + $0x8d] sm:$0x1]  ;;  %v1827_v8 = vmax.f32 %v1584_v44, %v1665_v63  ;;  %v1828_v33 = vmax.f32 %v1585_v10, %v1666_v0  ;;  %v1829_v2 = vmax.f32 %v1586_v22, %v1667_v3 }
 0x18a   : > { %v1676_v53 = vld [vmem:[#allocation2 + $0x8e] sm:$0x1]  ;;  %v2006_v56 = vmax.f32 %v1970_v62, %v3791_v59  ;;  %v1746_v54 = vld [vmem:[#allocation2 + $0xe6] sm:$0x1]  ;;  %v1747_v57 = vld [vmem:[#allocation2 + $0xe7] sm:$0x1]  ;;  %v1836_v4 = vmax.f32 %v1593_v50, %v1674_v6  ;;  %v1837_v9 = vmax.f32 %v1594_v55, %v1675_v7 }
 0x18b   : > { %v1748_v49 = vld [vmem:[#allocation2 + $0xe8] sm:$0x1]  ;;  %v1838_v11 = vmax.f32 %v1595_v58, %v1676_v53  ;;  %v2037_v61 = vmax.f32 %v2004_v36, %v2005_v5  ;;  %v1755_v12 = vld [vmem:[#allocation2 + $0xf0] sm:$0x1]  ;;  %v1756_v29 = vld [vmem:[#allocation2 + $0xf1] sm:$0x1]  ;;  %v1908_v15 = vmax.f32 %v1827_v8, %v1746_v54  ;;  %v1909_v18 = vmax.f32 %v1828_v33, %v1747_v57 }
 0x18c   : > { %v1757_v13 = vld [vmem:[#allocation2 + $0xf2] sm:$0x1]  ;;  %v1910_v21 = vmax.f32 %v1829_v2, %v1748_v49  ;;  %v3797_v26 = vmax.f32 %v1836_v4, %v1755_v12  ;;  %v3799_v27 = vmax.f32 %v1837_v9, %v1756_v29  ;;  %v1587_v28 = vld [vmem:[#allocation2 + $0x21] sm:$0x1]  ;;  %v1588_v31 = vld [vmem:[#allocation2 + $0x22] sm:$0x1] }
 0x18d   : > { %v1596_v32 = vld [vmem:[#allocation2 + $0x2b] sm:$0x1]  ;;  %v2053_v34 = vmax.f32 %v2037_v61, %v2006_v56  ;;  %v1971_v35 = vmax.f32 %v3762_v1, %v1908_v15  ;;  %v1972_v37 = vmax.f32 %v3766_v45, %v1909_v18  ;;  %v1597_v38 = vld [vmem:[#allocation2 + $0x2c] sm:$0x1]  ;;  %v1668_v39 = vld [vmem:[#allocation2 + $0x85] sm:$0x1]  ;;  %v3806_v20 = vmax.f32 %v1838_v11, %v1757_v13 }
 0x18e   : > { %v1973_v36 = vmax.f32 %v3768_v60, %v1910_v21  ;;  %v1669_v25 = vld [vmem:[#allocation2 + $0x86] sm:$0x1]  ;;  %v1677_v16 = vld [vmem:[#allocation2 + $0x8f] sm:$0x1]  ;;  %v1678_v14 = vld [vmem:[#allocation2 + $0x90] sm:$0x1]  ;;  %v1830_v24 = vmax.f32 %v1587_v28, %v1668_v39 }
 0x18f   : > { %v1749_v40 = vld [vmem:[#allocation2 + $0xe9] sm:$0x1]  ;;  %v1831_v17 = vmax.f32 %v1588_v31, %v1669_v25  ;;  %2413 = vst.msk [vmem:[%s3444_s30 + $0x13] sm:$0x1] %vm738_vm0, %v2053_v34  ;;  %v2007_v41 = vmax.f32 %v1971_v35, %v3797_v26  ;;  %v2008_v1 = vmax.f32 %v1972_v37, %v3799_v27  ;;  %v1750_v19 = vld [vmem:[#allocation2 + $0xea] sm:$0x1]  ;;  %v1839_v60 = vmax.f32 %v1596_v32, %v1677_v16 }
 0x190   : > { %v1758_v45 = vld [vmem:[#allocation2 + $0xf3] sm:$0x1]  ;;  %v1759_v30 = vld [vmem:[#allocation2 + $0xf4] sm:$0x1]  ;;  %v1840_v42 = vmax.f32 %v1597_v38, %v1678_v14  ;;  %v1911_v44 = vmax.f32 %v1830_v24, %v1749_v40  ;;  %v1589_v22 = vld [vmem:[#allocation2 + $0x23] sm:$0x1]  ;;  %v2009_v50 = vmax.f32 %v1973_v36, %v3806_v20 }
 0x191   : > { %v1912_v10 = vmax.f32 %v1831_v17, %v1750_v19  ;;  %v1590_v46 = vld [vmem:[#allocation2 + $0x24] sm:$0x1]  ;;  %v1598_v48 = vld [vmem:[#allocation2 + $0x2d] sm:$0x1]  ;;  %v2038_v55 = vmax.f32 %v2007_v41, %v2008_v1  ;;  %v3811_v58 = vmax.f32 %v1839_v60, %v1758_v45  ;;  %v1599_v62 = vld [vmem:[#allocation2 + $0x2e] sm:$0x1] }
 0x192   : > { %v1670_v63 = vld [vmem:[#allocation2 + $0x87] sm:$0x1]  ;;  %v1671_v0 = vld [vmem:[#allocation2 + $0x88] sm:$0x1]  ;;  %v3813_v3 = vmax.f32 %v1840_v42, %v1759_v30  ;;  %v1974_v5 = vmax.f32 %v3773_v23, %v1911_v44  ;;  %v1679_v7 = vld [vmem:[#allocation2 + $0x91] sm:$0x1] }
 0x193   : > { %v1975_v6 = vmax.f32 %v3777_v52, %v1912_v10  ;;  %v1680_v53 = vld [vmem:[#allocation2 + $0x92] sm:$0x1]  ;;  %v1751_v8 = vld [vmem:[#allocation2 + $0xeb] sm:$0x1]  ;;  %v1832_v33 = vmax.f32 %v1589_v22, %v1670_v63  ;;  %v2054_v2 = vmax.f32 %v2038_v55, %v2009_v50  ;;  %v1752_v56 = vld [vmem:[#allocation2 + $0xec] sm:$0x1]  ;;  %v1833_v49 = vmax.f32 %v1590_v46, %v1671_v0 }
 0x194   : > { %v1760_v54 = vld [vmem:[#allocation2 + $0xf5] sm:$0x1]  ;;  %v1761_v57 = vld [vmem:[#allocation2 + $0xf6] sm:$0x1]  ;;  %v1841_v4 = vmax.f32 %v1598_v48, %v1679_v7  ;;  %v1842_v9 = vmax.f32 %v1599_v62, %v1680_v53  ;;  %v2010_v11 = vmax.f32 %v1974_v5, %v3811_v58  ;;  %v1591_v12 = vld [vmem:[#allocation2 + $0x25] sm:$0x1] }
 0x195   : > { %v1913_v61 = vmax.f32 %v1832_v33, %v1751_v8  ;;  %v1592_v29 = vld [vmem:[#allocation2 + $0x26] sm:$0x1]  ;;  %v1600_v23 = vld [vmem:[#allocation2 + $0x2f] sm:$0x1]  ;;  %2414 = vst.msk [vmem:[%s3444_s30 + $0x14] sm:$0x1] %vm738_vm0, %v2054_v2  ;;  %v2011_v52 = vmax.f32 %v1975_v6, %v3813_v3  ;;  %v1914_v13 = vmax.f32 %v1833_v49, %v1752_v56 }
 0x196   : > { %v3821_v15 = vmax.f32 %v1841_v4, %v1760_v54  ;;  %v1601_v18 = vld [vmem:[#allocation2 + $0x30] sm:$0x1]  ;;  %v1672_v21 = vld [vmem:[#allocation2 + $0x89] sm:$0x1]  ;;  %v1673_v28 = vld [vmem:[#allocation2 + $0x8a] sm:$0x1]  ;;  %v2039_v31 = vmax.f32 %v2009_v50, %v2010_v11  ;;  %v3824_v39 = vmax.f32 %v1842_v9, %v1761_v57 }
 0x197   : > { %v1976_v32 = vmax.f32 %v3781_v43, %v1913_v61  ;;  %v1681_v34 = vld [vmem:[#allocation2 + $0x93] sm:$0x1]  ;;  %v1682_v35 = vld [vmem:[#allocation2 + $0x94] sm:$0x1]  ;;  %v1753_v37 = vld [vmem:[#allocation2 + $0xed] sm:$0x1]  ;;  %v1834_v36 = vmax.f32 %v1591_v12, %v1672_v21  ;;  %v1835_v38 = vmax.f32 %v1592_v29, %v1673_v28  ;;  %v1977_v25 = vmax.f32 %v3783_v51, %v1914_v13 }
 0x198   : > { %v1754_v16 = vld [vmem:[#allocation2 + $0xee] sm:$0x1]  ;;  %v1762_v14 = vld [vmem:[#allocation2 + $0xf7] sm:$0x1]  ;;  %v1763_v40 = vld [vmem:[#allocation2 + $0xf8] sm:$0x1]  ;;  %v1843_v24 = vmax.f32 %v1600_v23, %v1681_v34  ;;  %v1844_v17 = vmax.f32 %v1601_v18, %v1682_v35  ;;  %v2055_v41 = vmax.f32 %v2039_v31, %v2011_v52 }
 0x199   : > { %v2012_v1 = vmax.f32 %v1976_v32, %v3821_v15  ;;  %v1915_v19 = vmax.f32 %v1834_v36, %v1753_v37  ;;  %v1916_v43 = vmax.f32 %v1835_v38, %v1754_v16  ;;  %v1602_v45 = vld [vmem:[#allocation2 + $0x32] sm:$0x1]  ;;  %v1603_v30 = vld [vmem:[#allocation2 + $0x33] sm:$0x1]  ;;  %v1604_v60 = vld [vmem:[#allocation2 + $0x34] sm:$0x1]  ;;  %v2013_v42 = vmax.f32 %v1977_v25, %v3824_v39 }
 0x19a   : > { %v1611_v44 = vld [vmem:[#allocation2 + $0x3c] sm:$0x1]  ;;  %v1612_v10 = vld [vmem:[#allocation2 + $0x3d] sm:$0x1]  ;;  %v1613_v22 = vld [vmem:[#allocation2 + $0x3e] sm:$0x1]  ;;  %v3831_v46 = vmax.f32 %v1843_v24, %v1762_v14  ;;  %v3835_v2 = vmax.f32 %v1844_v17, %v1763_v40 }
 0x19b   : > { %2415 = vst.msk [vmem:[%s3444_s30 + $0x15] sm:$0x1] %vm738_vm0, %v2055_v41  ;;  %v2040_v51 = vmax.f32 %v2011_v52, %v2012_v1  ;;  %v1978_v48 = vmax.f32 %v3789_v47, %v1915_v19  ;;  %v1979_v50 = vmax.f32 %v3791_v59, %v1916_v43  ;;  %v1683_v55 = vld [vmem:[#allocation2 + $0x96] sm:$0x1]  ;;  %v1684_v62 = vld [vmem:[#allocation2 + $0x97] sm:$0x1] }
 0x19c   : > { %v1685_v63 = vld [vmem:[#allocation2 + $0x98] sm:$0x1]  ;;  %v1692_v0 = vld [vmem:[#allocation2 + $0xa0] sm:$0x1]  ;;  %v1693_v5 = vld [vmem:[#allocation2 + $0xa1] sm:$0x1]  ;;  %v1845_v7 = vmax.f32 %v1602_v45, %v1683_v55  ;;  %v1846_v53 = vmax.f32 %v1603_v30, %v1684_v62 }
 0x19d   : > { %v1694_v6 = vld [vmem:[#allocation2 + $0xa2] sm:$0x1]  ;;  %v1847_v8 = vmax.f32 %v1604_v60, %v1685_v63  ;;  %v2056_v33 = vmax.f32 %v2040_v51, %v2013_v42  ;;  %v2014_v56 = vmax.f32 %v1978_v48, %v3831_v46  ;;  %v1764_v54 = vld [vmem:[#allocation2 + $0xfa] sm:$0x1]  ;;  %v1765_v57 = vld [vmem:[#allocation2 + $0xfb] sm:$0x1]  ;;  %v1854_v49 = vmax.f32 %v1611_v44, %v1692_v0 }
 0x19e   : > { %v1766_v47 = vld [vmem:[#allocation2 + $0xfc] sm:$0x1]  ;;  %v1773_v59 = vld [vmem:[#allocation2 + $0x104] sm:$0x1]  ;;  %v1774_v4 = vld [vmem:[#allocation2 + $0x105] sm:$0x1]  ;;  %v1855_v11 = vmax.f32 %v1612_v10, %v1693_v5  ;;  %v1856_v61 = vmax.f32 %v1613_v22, %v1694_v6  ;;  %v1926_v12 = vmax.f32 %v1845_v7, %v1764_v54  ;;  %v1927_v29 = vmax.f32 %v1846_v53, %v1765_v57 }
 0x19f   : > { %v1775_v9 = vld [vmem:[#allocation2 + $0x106] sm:$0x1]  ;;  %2416 = vst.msk [vmem:[%s3444_s30 + $0x16] sm:$0x1] %vm738_vm0, %v2056_v33  ;;  %v2015_v23 = vmax.f32 %v1979_v50, %v3835_v2  ;;  %v2041_v52 = vmax.f32 %v2013_v42, %v2014_v56  ;;  %v1928_v13 = vmax.f32 %v1847_v8, %v1766_v47  ;;  %v3841_v18 = vmax.f32 %v1854_v49, %v1773_v59  ;;  %v1605_v21 = vld [vmem:[#allocation2 + $0x35] sm:$0x1] }
 0x1a0   : > { %v1606_v28 = vld [vmem:[#allocation2 + $0x36] sm:$0x1]  ;;  %v1614_v31 = vld [vmem:[#allocation2 + $0x3f] sm:$0x1]  ;;  %v3843_v32 = vmax.f32 %v1855_v11, %v1774_v4  ;;  %v3845_v34 = vmax.f32 %v1856_v61, %v1775_v9  ;;  %v1980_v35 = vmax.f32 %v3797_v26, %v1926_v12  ;;  %v1981_v37 = vmax.f32 %v3799_v27, %v1927_v29  ;;  %v1615_v36 = vld [vmem:[#allocation2 + $0x40] sm:$0x1] }
 0x1a1   : > { %v1686_v38 = vld [vmem:[#allocation2 + $0x99] sm:$0x1]  ;;  %v1687_v25 = vld [vmem:[#allocation2 + $0x9a] sm:$0x1]  ;;  %v2057_v16 = vmax.f32 %v2041_v52, %v2015_v23  ;;  %v1982_v14 = vmax.f32 %v3806_v20, %v1928_v13  ;;  %v1695_v40 = vld [vmem:[#allocation2 + $0xa3] sm:$0x1] }
 0x1a2   : > { %v1696_v24 = vld [vmem:[#allocation2 + $0xa4] sm:$0x1]  ;;  %v1767_v17 = vld [vmem:[#allocation2 + $0xfd] sm:$0x1]  ;;  %v1848_v41 = vmax.f32 %v1605_v21, %v1686_v38  ;;  %v1849_v1 = vmax.f32 %v1606_v28, %v1687_v25  ;;  %v2016_v19 = vmax.f32 %v1980_v35, %v3841_v18  ;;  %v2017_v43 = vmax.f32 %v1981_v37, %v3843_v32  ;;  %v1768_v45 = vld [vmem:[#allocation2 + $0xfe] sm:$0x1] }
 0x1a3   : > { %v1776_v26 = vld [vmem:[#allocation2 + $0x107] sm:$0x1]  ;;  %v1777_v30 = vld [vmem:[#allocation2 + $0x108] sm:$0x1]  ;;  %v1857_v27 = vmax.f32 %v1614_v31, %v1695_v40  ;;  %v1858_v60 = vmax.f32 %v1615_v36, %v1696_v24  ;;  %2417 = vst.msk [vmem:[%s3444_s30 + $0x17] sm:$0x1] %vm738_vm0, %v2057_v16  ;;  %v2018_v51 = vmax.f32 %v1982_v14, %v3845_v34 }
 0x1a4   : > { %v1929_v42 = vmax.f32 %v1848_v41, %v1767_v17  ;;  %v1930_v44 = vmax.f32 %v1849_v1, %v1768_v45  ;;  %v1607_v10 = vld [vmem:[#allocation2 + $0x37] sm:$0x1]  ;;  %v1608_v20 = vld [vmem:[#allocation2 + $0x38] sm:$0x1]  ;;  %v1616_v22 = vld [vmem:[#allocation2 + $0x41] sm:$0x1]  ;;  %v2042_v48 = vmax.f32 %v2016_v19, %v2017_v43 }
 0x1a5   : > { %v3855_v50 = vmax.f32 %v1857_v27, %v1776_v26  ;;  %v1617_v55 = vld [vmem:[#allocation2 + $0x42] sm:$0x1]  ;;  %v1688_v62 = vld [vmem:[#allocation2 + $0x9b] sm:$0x1]  ;;  %v1689_v63 = vld [vmem:[#allocation2 + $0x9c] sm:$0x1]  ;;  %v3859_v54 = vmax.f32 %v1858_v60, %v1777_v30 }
 0x1a6   : > { %v1983_v0 = vmax.f32 %v3811_v58, %v1929_v42  ;;  %v1984_v5 = vmax.f32 %v3813_v3, %v1930_v44  ;;  %v1697_v6 = vld [vmem:[#allocation2 + $0xa5] sm:$0x1]  ;;  %v1698_v7 = vld [vmem:[#allocation2 + $0xa6] sm:$0x1]  ;;  %v1769_v53 = vld [vmem:[#allocation2 + $0xff] sm:$0x1]  ;;  %v1850_v8 = vmax.f32 %v1607_v10, %v1688_v62  ;;  %v1851_v33 = vmax.f32 %v1608_v20, %v1689_v63 }
 0x1a7   : > { %v2058_v56 = vmax.f32 %v2042_v48, %v2018_v51  ;;  %v1770_v57 = vld [vmem:[#allocation2 + $0x100] sm:$0x1]  ;;  %v1778_v47 = vld [vmem:[#allocation2 + $0x109] sm:$0x1]  ;;  %v1779_v49 = vld [vmem:[#allocation2 + $0x10a] sm:$0x1]  ;;  %v1859_v59 = vmax.f32 %v1616_v22, %v1697_v6  ;;  %v1860_v9 = vmax.f32 %v1617_v55, %v1698_v7 }
 0x1a8   : > { %v2019_v4 = vmax.f32 %v1983_v0, %v3855_v50  ;;  %v1931_v11 = vmax.f32 %v1850_v8, %v1769_v53  ;;  %v1932_v58 = vmax.f32 %v1851_v33, %v1770_v57  ;;  %v1609_v61 = vld [vmem:[#allocation2 + $0x39] sm:$0x1]  ;;  %v1610_v3 = vld [vmem:[#allocation2 + $0x3a] sm:$0x1]  ;;  %v1618_v12 = vld [vmem:[#allocation2 + $0x43] sm:$0x1]  ;;  %v2020_v29 = vmax.f32 %v1984_v5, %v3859_v54 }
 0x1a9   : > { %2418 = vst.msk [vmem:[%s3444_s30 + $0x18] sm:$0x1] %vm738_vm0, %v2058_v56  ;;  %v3865_v23 = vmax.f32 %v1859_v59, %v1778_v47  ;;  %v1619_v52 = vld [vmem:[#allocation2 + $0x44] sm:$0x1]  ;;  %v1690_v13 = vld [vmem:[#allocation2 + $0x9d] sm:$0x1]  ;;  %v3869_v19 = vmax.f32 %v1860_v9, %v1779_v49 }
 0x1aa   : > { %v1691_v21 = vld [vmem:[#allocation2 + $0x9e] sm:$0x1]  ;;  %v2043_v28 = vmax.f32 %v2018_v51, %v2019_v4  ;;  %v1985_v31 = vmax.f32 %v3821_v15, %v1931_v11  ;;  %v1986_v35 = vmax.f32 %v3824_v39, %v1932_v58  ;;  %v1699_v37 = vld [vmem:[#allocation2 + $0xa7] sm:$0x1]  ;;  %v1700_v36 = vld [vmem:[#allocation2 + $0xa8] sm:$0x1]  ;;  %v1852_v25 = vmax.f32 %v1609_v61, %v1690_v13 }
 0x1ab   : > { %v1771_v38 = vld [vmem:[#allocation2 + $0x101] sm:$0x1]  ;;  %v1772_v16 = vld [vmem:[#allocation2 + $0x102] sm:$0x1]  ;;  %v1780_v14 = vld [vmem:[#allocation2 + $0x10b] sm:$0x1]  ;;  %v1853_v24 = vmax.f32 %v1610_v3, %v1691_v21  ;;  %v1861_v17 = vmax.f32 %v1618_v12, %v1699_v37  ;;  %v1862_v41 = vmax.f32 %v1619_v52, %v1700_v36 }
 0x1ac   : > { %v1781_v40 = vld [vmem:[#allocation2 + $0x10c] sm:$0x1]  ;;  %v2059_v1 = vmax.f32 %v2043_v28, %v2020_v29  ;;  %v2021_v43 = vmax.f32 %v1985_v31, %v3865_v23  ;;  %v1933_v45 = vmax.f32 %v1852_v25, %v1771_v38  ;;  %v1620_v15 = vld [vmem:[#allocation2 + $0x46] sm:$0x1]  ;;  %v1621_v26 = vld [vmem:[#allocation2 + $0x47] sm:$0x1]  ;;  %v2022_v10 = vmax.f32 %v1986_v35, %v3869_v19 }
 0x1ad   : > { %v1622_v39 = vld [vmem:[#allocation2 + $0x48] sm:$0x1]  ;;  %v1934_v30 = vmax.f32 %v1853_v24, %v1772_v16  ;;  %v3872_v27 = vmax.f32 %v1862_v41, %v1781_v40  ;;  %v1629_v60 = vld [vmem:[#allocation2 + $0x50] sm:$0x1]  ;;  %v1630_v42 = vld [vmem:[#allocation2 + $0x51] sm:$0x1]  ;;  %v3877_v22 = vmax.f32 %v1861_v17, %v1780_v14 }
 0x1ae   : > { %v1631_v44 = vld [vmem:[#allocation2 + $0x52] sm:$0x1]  ;;  %2419 = vst.msk [vmem:[%s3444_s30 + $0x19] sm:$0x1] %vm738_vm0, %v2059_v1  ;;  %v2044_v20 = vmax.f32 %v2020_v29, %v2021_v43  ;;  %v1987_v51 = vmax.f32 %v3831_v46, %v1933_v45  ;;  %v1701_v48 = vld [vmem:[#allocation2 + $0xaa] sm:$0x1] }
 0x1af   : > { %v1702_v55 = vld [vmem:[#allocation2 + $0xab] sm:$0x1]  ;;  %v1703_v62 = vld [vmem:[#allocation2 + $0xac] sm:$0x1]  ;;  %v1988_v63 = vmax.f32 %v3835_v2, %v1934_v30  ;;  %v1710_v0 = vld [vmem:[#allocation2 + $0xb4] sm:$0x1]  ;;  %v1863_v7 = vmax.f32 %v1620_v15, %v1701_v48 }
 0x1b0   : > { %v1711_v5 = vld [vmem:[#allocation2 + $0xb5] sm:$0x1]  ;;  %v1712_v6 = vld [vmem:[#allocation2 + $0xb6] sm:$0x1]  ;;  %v1864_v53 = vmax.f32 %v1621_v26, %v1702_v55  ;;  %v1865_v8 = vmax.f32 %v1622_v39, %v1703_v62  ;;  %v2060_v33 = vmax.f32 %v2044_v20, %v2022_v10  ;;  %v2023_v56 = vmax.f32 %v1987_v51, %v3877_v22  ;;  %v1782_v57 = vld [vmem:[#allocation2 + $0x10e] sm:$0x1] }
 0x1b1   : > { %v1783_v47 = vld [vmem:[#allocation2 + $0x10f] sm:$0x1]  ;;  %v1784_v49 = vld [vmem:[#allocation2 + $0x110] sm:$0x1]  ;;  %v1872_v59 = vmax.f32 %v1629_v60, %v1710_v0  ;;  %v1873_v46 = vmax.f32 %v1630_v42, %v1711_v5  ;;  %v2024_v4 = vmax.f32 %v1988_v63, %v3872_v27  ;;  %v1791_v9 = vld [vmem:[#allocation2 + $0x118] sm:$0x1]  ;;  %v1874_v58 = vmax.f32 %v1631_v44, %v1712_v6 }
 0x1b2   : > { %v1792_v11 = vld [vmem:[#allocation2 + $0x119] sm:$0x1]  ;;  %v1793_v2 = vld [vmem:[#allocation2 + $0x11a] sm:$0x1]  ;;  %v1944_v61 = vmax.f32 %v1863_v7, %v1782_v57  ;;  %v1945_v3 = vmax.f32 %v1864_v53, %v1783_v47  ;;  %2420 = vst.msk [vmem:[%s3444_s30 + $0x1a] sm:$0x1] %vm738_vm0, %v2060_v33  ;;  %v2045_v12 = vmax.f32 %v2022_v10, %v2023_v56  ;;  %v1946_v29 = vmax.f32 %v1865_v8, %v1784_v49 }
 0x1b3   : > { %v1953_v52 = vmax.f32 %v1872_v59, %v1791_v9  ;;  %v1954_v13 = vmax.f32 %v1873_v46, %v1792_v11  ;;  %v1623_v21 = vld [vmem:[#allocation2 + $0x49] sm:$0x1]  ;;  %v1624_v28 = vld [vmem:[#allocation2 + $0x4a] sm:$0x1]  ;;  %v1632_v31 = vld [vmem:[#allocation2 + $0x53] sm:$0x1]  ;;  %v1955_v35 = vmax.f32 %v1874_v58, %v1793_v2 }
 0x1b4   : > { %v1989_v37 = vmax.f32 %v3841_v18, %v1944_v61  ;;  %v1990_v36 = vmax.f32 %v3843_v32, %v1945_v3  ;;  %v1633_v38 = vld [vmem:[#allocation2 + $0x54] sm:$0x1]  ;;  %v1704_v25 = vld [vmem:[#allocation2 + $0xad] sm:$0x1]  ;;  %v1705_v16 = vld [vmem:[#allocation2 + $0xae] sm:$0x1]  ;;  %v2061_v14 = vmax.f32 %v2045_v12, %v2024_v4  ;;  %v1991_v40 = vmax.f32 %v3845_v34, %v1946_v29 }
 0x1b5   : > { %v1713_v24 = vld [vmem:[#allocation2 + $0xb7] sm:$0x1]  ;;  %v1714_v17 = vld [vmem:[#allocation2 + $0xb8] sm:$0x1]  ;;  %v1785_v41 = vld [vmem:[#allocation2 + $0x111] sm:$0x1]  ;;  %v1866_v1 = vmax.f32 %v1623_v21, %v1704_v25  ;;  %v1867_v43 = vmax.f32 %v1624_v28, %v1705_v16 }
 0x1b6   : > { %v2025_v45 = vmax.f32 %v1989_v37, %v1953_v52  ;;  %v2026_v15 = vmax.f32 %v1990_v36, %v1954_v13  ;;  %v1786_v26 = vld [vmem:[#allocation2 + $0x112] sm:$0x1]  ;;  %v1794_v39 = vld [vmem:[#allocation2 + $0x11b] sm:$0x1]  ;;  %v1795_v30 = vld [vmem:[#allocation2 + $0x11c] sm:$0x1]  ;;  %v1875_v18 = vmax.f32 %v1632_v31, %v1713_v24  ;;  %v1876_v60 = vmax.f32 %v1633_v38, %v1714_v17 }
 0x1b7   : > { %2421 = vst.msk [vmem:[%s3444_s30 + $0x1b] sm:$0x1] %vm738_vm0, %v2061_v14  ;;  %v1947_v32 = vmax.f32 %v1866_v1, %v1785_v41  ;;  %v1948_v42 = vmax.f32 %v1867_v43, %v1786_v26  ;;  %v1625_v44 = vld [vmem:[#allocation2 + $0x4b] sm:$0x1]  ;;  %v1626_v10 = vld [vmem:[#allocation2 + $0x4c] sm:$0x1]  ;;  %v2027_v34 = vmax.f32 %v1991_v40, %v1955_v35 }
 0x1b8   : > { %v1634_v20 = vld [vmem:[#allocation2 + $0x55] sm:$0x1]  ;;  %v2046_v51 = vmax.f32 %v2025_v45, %v2026_v15  ;;  %v1956_v48 = vmax.f32 %v1875_v18, %v1794_v39  ;;  %v1957_v55 = vmax.f32 %v1876_v60, %v1795_v30  ;;  %v1635_v62 = vld [vmem:[#allocation2 + $0x56] sm:$0x1]  ;;  %v1706_v63 = vld [vmem:[#allocation2 + $0xaf] sm:$0x1] }
 0x1b9   : > { %v1707_v0 = vld [vmem:[#allocation2 + $0xb0] sm:$0x1]  ;;  %v1992_v5 = vmax.f32 %v3855_v50, %v1947_v32  ;;  %v1993_v6 = vmax.f32 %v3859_v54, %v1948_v42  ;;  %v1715_v7 = vld [vmem:[#allocation2 + $0xb9] sm:$0x1]  ;;  %v1716_v53 = vld [vmem:[#allocation2 + $0xba] sm:$0x1]  ;;  %v1868_v33 = vmax.f32 %v1625_v44, %v1706_v63 }
 0x1ba   : > { %v1787_v8 = vld [vmem:[#allocation2 + $0x113] sm:$0x1]  ;;  %v1869_v56 = vmax.f32 %v1626_v10, %v1707_v0  ;;  %v2062_v57 = vmax.f32 %v2046_v51, %v2027_v34  ;;  %v1788_v47 = vld [vmem:[#allocation2 + $0x114] sm:$0x1]  ;;  %v1796_v49 = vld [vmem:[#allocation2 + $0x11d] sm:$0x1]  ;;  %v1877_v46 = vmax.f32 %v1634_v20, %v1715_v7  ;;  %v1878_v4 = vmax.f32 %v1635_v62, %v1716_v53 }
 0x1bb   : > { %v1797_v59 = vld [vmem:[#allocation2 + $0x11e] sm:$0x1]  ;;  %v2028_v9 = vmax.f32 %v1992_v5, %v1956_v48  ;;  %v1949_v11 = vmax.f32 %v1868_v33, %v1787_v8  ;;  %v1627_v58 = vld [vmem:[#allocation2 + $0x4d] sm:$0x1]  ;;  %v1628_v61 = vld [vmem:[#allocation2 + $0x4e] sm:$0x1]  ;;  %v2029_v54 = vmax.f32 %v1993_v6, %v1957_v55 }
 0x1bc   : > { %v1950_v2 = vmax.f32 %v1869_v56, %v1788_v47  ;;  %v1636_v50 = vld [vmem:[#allocation2 + $0x57] sm:$0x1]  ;;  %2422 = vst.msk [vmem:[%s3444_s30 + $0x1c] sm:$0x1] %vm738_vm0, %v2062_v57  ;;  %v1958_v3 = vmax.f32 %v1877_v46, %v1796_v49  ;;  %v1959_v12 = vmax.f32 %v1878_v4, %v1797_v59  ;;  %v1637_v29 = vld [vmem:[#allocation2 + $0x58] sm:$0x1] }
 0x1bd   : > { %v1708_v52 = vld [vmem:[#allocation2 + $0xb1] sm:$0x1]  ;;  %v1709_v13 = vld [vmem:[#allocation2 + $0xb2] sm:$0x1]  ;;  %v2047_v21 = vmax.f32 %v2027_v34, %v2028_v9  ;;  %v1994_v28 = vmax.f32 %v3865_v23, %v1949_v11  ;;  %v1717_v35 = vld [vmem:[#allocation2 + $0xbb] sm:$0x1] }
 0x1be   : > { %v1995_v31 = vmax.f32 %v3869_v19, %v1950_v2  ;;  %v1718_v37 = vld [vmem:[#allocation2 + $0xbc] sm:$0x1]  ;;  %v1789_v36 = vld [vmem:[#allocation2 + $0x115] sm:$0x1]  ;;  %v1870_v38 = vmax.f32 %v1627_v58, %v1708_v52  ;;  %v1790_v25 = vld [vmem:[#allocation2 + $0x116] sm:$0x1]  ;;  %v1871_v40 = vmax.f32 %v1628_v61, %v1709_v13  ;;  %v1879_v24 = vmax.f32 %v1636_v50, %v1717_v35 }
 0x1bf   : > { %v1798_v16 = vld [vmem:[#allocation2 + $0x11f] sm:$0x1]  ;;  %v1799_v14 = vld [vmem:[#allocation2 + $0x120] sm:$0x1]  ;;  %v1880_v17 = vmax.f32 %v1637_v29, %v1718_v37  ;;  %v2063_v41 = vmax.f32 %v2047_v21, %v2029_v54  ;;  %v2030_v1 = vmax.f32 %v1994_v28, %v1958_v3  ;;  %s2098_s24 = sshll.u32 %s3444_s30, 4  ;;  %p3979_p8 = scmp.ne.s32.totalorder %s3975_s4, 0  ;;  %s3911_s24 = int_to_ptr.vmem [resolvable:$true] %s2098_s24 }
 0x1c0   : > { %v1951_v43 = vmax.f32 %v1870_v38, %v1789_v36  ;;  %v1952_v23 = vmax.f32 %v1871_v40, %v1790_v25  ;;  %v1960_v45 = vmax.f32 %v1879_v24, %v1798_v16  ;;  %v2031_v15 = vmax.f32 %v1995_v31, %v1959_v12  ;;  %s2570_s26 = scalar_lea.vmem %s3911_s24, 512  ;;  %s2670_s27 = smov [#allocation8]  }
 0x1c1   : > { %v1961_v19 = vmax.f32 %v1880_v17, %v1799_v14  ;;  %2423 = vst.msk [vmem:[%s3444_s30 + $0x1d] sm:$0x1] %vm738_vm0, %v2063_v41  ;;  %v2048_v26 = vmax.f32 %v2029_v54, %v2030_v1  ;;  %p2571_p6 = scmp.ne.s32.totalorder %s3911_s24, %s2570_s26  ;;  %s2574_s25 = sshll.u32 %s2670_s27, 4  ;;  %s2575_s25 = int_to_ptr.vmem [resolvable:$false] %s2574_s25 }
 0x1c2   : > { %v1996_v39 = vmax.f32 %v3877_v22, %v1951_v43  ;;  %v1997_v30 = vmax.f32 %v3872_v27, %v1952_v23  ;;  %s2576_s16 = scalar_lea.vmem %s2575_s25, 1024  ;;  %p2577_p0 = scmp.lt.s32.totalorder %s3911_s24, %s2575_s25 }
 0x1c3   : > { %v2064_v18 = vmax.f32 %v2048_v26, %v2031_v15  ;;  %p2572_p12 = pnand %p2571_p6, %p3979_p8  ;;  %p2578_p5 = scmp.lt.s32.totalorder %s2576_s16, %s2570_s26 }
 0x1c4   : > { %v2032_v60 = vmax.f32 %v1996_v39, %v1960_v45  ;;  %v2033_v32 = vmax.f32 %v1997_v30, %v1961_v19 }
 0x1c5   : > { %2424 = vst.msk [vmem:[%s3444_s30 + $0x1e] sm:$0x1] %vm738_vm0, %v2064_v18  ;;  %p2573_p13 = pneg %p2572_p12  ;;  %p2579_p7 = por %p2578_p5, %p2577_p0 }
 0x1c6   : > { %v2049_v42 = vmax.f32 %v2031_v15, %v2032_v60 }
 0x1c7   : > { %p2580_p10 = pnand %p2579_p7, %p2573_p13 }
 0x1c8   : > { %v2065_v44 = vmax.f32 %v2049_v42, %v2033_v32 }
 0x1ca   : > { %2425 = vst.msk [vmem:[%s3444_s30 + $0x1f] sm:$0x1] %vm738_vm0, %v2065_v44 }
 0x1cb   : > { %2583 = shalt.err (!%p2580_p10)
}
 0x1cc   : > { %s2584_s28 = scalar_lea.hbm %s3908_s9, 512  ;;  %s2588_s29 = scalar_lea.hbm %s3965_s2, 1024 }
 0x1cd   : > { %p2585_p11 = scmp.ne.s32.totalorder %s3908_s9, %s2584_s28  ;;  %p2589_p4 = scmp.lt.s32.totalorder %s3908_s9, %s3965_s2 }
 0x1ce   : > { %p2590_p3 = scmp.lt.s32.totalorder %s2588_s29, %s2584_s28 }
 0x1cf   : > { %p2586_p1 = pnand %p2585_p11, %p3979_p8 }
 0x1d0   : > { %p2591_p9 = por %p2590_p3, %p2589_p4 }
 0x1d1   : > { %p2587_p2 = pneg %p2586_p1 }
 0x1d3   : > { %p2592_p6 = pnand %p2591_p9, %p2587_p2 }
 0x1d5   : > { %2595 = shalt.err (!%p2592_p6)
}
 0x1d6   : > { %s2671_s23 = smov 16   ;;  %s2672_s30 = smov 1  }
 0x1d7   : > { %2448 = dma.vmem_to_hbm [thread:$0]  (%p3979_p8), %s3911_s24, 512, %s3908_s9, %s2084_s22, %s2671_s23, %s2671_s23, %s2672_s30  }
 0x1d8 PF: > { %s2113_s8 = sand.u32 1, %s2650_s12   ;;  %p3980_p12 = scmp.ne.s32.totalorder %s3976_s5, 0 }
 0x1d9   : > { %p3981_p13 = scmp.ge.s32.totalorder %s2662_s15, 2  ;;  %s2114_s19 = scalar_lea.sflag [#allocation5], %s2113_s8 }
 0x1db   : > { %p2451_p0 = pnand %p3981_p13, %p3980_p12 }
 0x1dd   : > { %p2452_p5 = pneg %p2451_p0 }
 0x1df   : > { %2633 = dma.done.wait (%p2452_p5), %s2114_s19, 512  }
 0x1e0   : > { %2635 = vsyncadd (%p2452_p5), %s2114_s19, 4294966784  ;;  %s3982_s4 = sld [smem:[#allocation12_spill]]  ;;  %p18_p8 = scmp.ge.s32.totalorder %s2726_s18, 4  }
 0x1e1   : > { %s3983_s9 = smov %s2642_s10  ;;  %s3984_s10 = smov %s2646_s11 }
 0x1e2   : > { %s3985_s11 = smov %s2777_s3  ;;  %s3986_s12 = smov %s2654_s13 }
 0x1e3   : > { %s3987_s13 = smov %s2658_s14  ;;  %s3989_s15 = smov %s2726_s18 }
 0x1e4   :  { %20 = sbr.rel (!%p18_p8) target bundleno = 11 (0xb), region = 89 }
 0x1e6   : > { %s3988_s14 = smov %s3982_s4 }
 0x1e9   :  { %2119 = vsyncpa [#allocation4], 1 }
 0x1ea   :  { %2121 = vsyncpa [#allocation4 + $0x1], 1 }
 0x1eb   :  { %2122 = vsyncpa [#allocation7], 1 }
 0x1ec   :  { %2124 = vsyncpa [#allocation7 + $0x1], 1 }
 0x1ed   :  { %2125 = vsyncpa [#allocation5], 1 }
 0x1ee   :  { %2127 = vsyncpa [#allocation5 + $0x1], 1 }

</bundles_post_ra>
